<compile_context>
chip_gen: v5e
topology: v5e:2x2
jax: 0.10.0
libtpu: 0.0.40
codegen_flags: <defaults>
</compile_context>

<pallas_src>
import jax
import jax.numpy as jnp
from jax.experimental import pallas as pl
from jax.experimental.pallas import tpu as pltpu


# ---------------------------------------------------------------------------
# helpers
# ---------------------------------------------------------------------------
def _round_up(n, m):
    return (n + m - 1) // m * m


def _vmem_limit_bytes():
    # Generation-aware VMEM budget: leave double-buffer headroom on v7x's
    # 64 MiB, allow more on v5e/v6e's 128 MiB.  Falls back to a safe default.
    try:
        cap = int(pltpu.get_tpu_info().vmem_capacity_bytes)
        return int(min(max(cap - 16 * 1024 * 1024, 16 * 1024 * 1024),
                       96 * 1024 * 1024))
    except Exception:
        return 32 * 1024 * 1024


def _im2col_3x3(x_nchw):
    """NCHW -> (B, H*W, 9*C_in) patches (kh, kw, c order). Reference only."""
    B, C, H, W = x_nchw.shape
    x = jnp.transpose(x_nchw, (0, 2, 3, 1))                    # NHWC
    xp = jnp.pad(x, ((0, 0), (1, 1), (1, 1), (0, 0)))
    pats = [xp[:, kh:kh + H, kw:kw + W, :]
            for kh in range(3) for kw in range(3)]
    return jnp.stack(pats, axis=3).reshape(B, H * W, 9 * C)


def _prepare_fused_params(params_net1, params_net2, c_in):
    """Fuse both nets' weights (channel concat / block-diagonal), pad to 128s.

    Runs ONCE per model, outside the jitted forward (perf-review item)."""
    w1c, b1c, w1e, b1e, w1l, b1l = params_net1
    w2c, b2c, w2e, b2e, w2l, b2l = params_net2
    c1, c2 = w1c.shape[1], w2c.shape[1]
    f1, f2 = w1e.shape[1], w2e.shape[1]
    n1, n2 = w1l.shape[1], w2l.shape[1]
    cp = max(8, _round_up(c_in, 8))              # per-tap contraction width
    cmid_p = _round_up(c1 + c2, 128)
    feat_p = _round_up(f1 + f2, 128)
    cls_p = _round_up(n1 + n2, 128)

    # conv weights: channel-concat both nets, pad cols to cmid_p, then pad each
    # of the 9 per-tap C_in row blocks to cp rows (matches in-kernel slicing).
    wconv = jnp.zeros((9 * c_in, cmid_p), jnp.float32)
    wconv = wconv.at[:, :c1].set(w1c).at[:, c1:c1 + c2].set(w2c)
    wconv = wconv.reshape(9, c_in, cmid_p)
    wconv = jnp.pad(wconv, ((0, 0), (0, cp - c_in), (0, 0)))
    wconv = wconv.reshape(9 * cp, cmid_p)
    bconv = jnp.zeros((1, cmid_p), jnp.float32)
    bconv = bconv.at[0, :c1].set(b1c).at[0, c1:c1 + c2].set(b2c)

    # block-diagonal head weights (net1 block then net2 block), f32 for accuracy.
    wemb = jnp.zeros((cmid_p, feat_p), jnp.float32)
    wemb = wemb.at[:c1, :f1].set(w1e).at[c1:c1 + c2, f1:f1 + f2].set(w2e)
    bemb = jnp.zeros((1, feat_p), jnp.float32)
    bemb = bemb.at[0, :f1].set(b1e).at[0, f1:f1 + f2].set(b2e)

    wcls = jnp.zeros((feat_p, cls_p), jnp.float32)
    wcls = wcls.at[:f1, :n1].set(w1l).at[f1:f1 + f2, n1:n1 + n2].set(w2l)
    bcls = jnp.zeros((1, cls_p), jnp.float32)
    bcls = bcls.at[0, :n1].set(b1l).at[0, n1:n1 + n2].set(b2l)

    dims = dict(c1=c1, c2=c2, f1=f1, f2=f2, n1=n1, n2=n2, cp=cp,
                cmid_p=cmid_p, feat_p=feat_p, cls_p=cls_p)
    fused = (wconv.astype(jnp.bfloat16), bconv, wemb, bemb, wcls, bcls)
    return fused, dims


# ---------------------------------------------------------------------------
# main kernel: in-kernel im2col (9 shifted matmuls) + bias + ReLU + masked GAP
# grid = (B,); one image per grid step; subtiled over 256-row chunks.
# ---------------------------------------------------------------------------
def _make_conv_gap_kernel(offsets, cp, cmid_p, m_valid, chunk, edge_pad, inv_hw):
    def kernel(x_ref, wconv_ref, bconv_ref, mask_ref, pooled_ref):
        # x_ref:     (Mext, cp)      bf16  flattened padded image (one batch)
        # wconv_ref: (9*cp, cmid_p)  bf16  per-tap conv weight blocks
        # bconv_ref: (1, cmid_p)     f32
        # mask_ref:  (m_valid, 1)    f32   1.0 on interior (valid conv) rows
        # pooled_ref:(1, cmid_p)     f32   GAP output for this image
        acc = jnp.zeros((1, cmid_p), jnp.float32)
        for c0 in range(0, m_valid, chunk):          # static subtile loop
            length = min(chunk, m_valid - c0)        # multiple of 8
            act = None
            for k, d in enumerate(offsets):          # 9 conv taps
                xs = x_ref[pl.ds(c0 + d + edge_pad, length), :]
                ws = wconv_ref[pl.ds(k * cp, cp), :]
                part = jnp.dot(xs, ws, preferred_element_type=jnp.float32)
                act = part if act is None else act + part
            act = jnp.maximum(act + bconv_ref[...], 0.0)
            act = act * mask_ref[pl.ds(c0, length), :]       # zero border rows
            acc = acc + jnp.sum(act, axis=0, keepdims=True)  # partial GAP sum
        pooled_ref[...] = acc * inv_hw
    return kernel


# ---------------------------------------------------------------------------
# batched epilogue kernel: both embedding + classifier heads for all images
# (single invocation, whole arrays resident in VMEM).
# ---------------------------------------------------------------------------
def _heads_kernel(pooled_ref, wemb_ref, bemb_ref, wcls_ref, bcls_ref,
                  emb_ref, logit_ref):
    emb = jnp.dot(pooled_ref[...], wemb_ref[...],
                  preferred_element_type=jnp.float32) + bemb_ref[...]
    emb_ref[...] = emb
    logit_ref[...] = jnp.dot(emb, wcls_ref[...],
                             preferred_element_type=jnp.float32) + bcls_ref[...]


# ---------------------------------------------------------------------------
# CrossNets.forward factory (weight prep hoisted out of the jitted hot path)
# ---------------------------------------------------------------------------
def make_cross_nets_forward(params_net1, params_net2, image_shape):
    """image_shape = (C_in, H, W). Returns a jitted forward(x_nchw)."""
    c_in, H, W = image_shape
    fused, d = _prepare_fused_params(params_net1, params_net2, c_in)
    wconv, bconv, wemb, bemb, wcls, bcls = fused
    cp, cmid_p, feat_p, cls_p = d["cp"], d["cmid_p"], d["feat_p"], d["cls_p"]

    # --- static geometry for the flat-shift conv formulation ----------------
    wp2 = W + 2
    mp = (H + 2) * wp2                       # padded-grid flat length
    mp_pad = _round_up(mp, 8)                # rows processed (8-aligned)
    edge_pad = W + 16                        # zero rows each side (|shift|<=W+3)
    mext = mp + 2 * edge_pad
    # tap (kh, kw) reads flat position p + (kh-1)*(W+2) + (kw-1)
    offsets = tuple((kh - 1) * wp2 + (kw - 1)
                    for kh in range(3) for kw in range(3))
    chunk = min(mp_pad, 256)                 # ~128 KiB f32 activation subtile
    inv_hw = 1.0 / float(H * W)

    # interior mask (constant per model/shape): valid conv-output rows only.
    p = jnp.arange(mp_pad)
    hp, wpos = p // wp2, p % wp2
    valid = (p < mp) & (hp >= 1) & (hp <= H) & (wpos >= 1) & (wpos <= W)
    mask = valid.astype(jnp.float32)[:, None]          # (mp_pad, 1)

    conv_kernel = _make_conv_gap_kernel(offsets, cp, cmid_p, mp_pad, chunk,
                                        edge_pad, inv_hw)
    vmem_limit = _vmem_limit_bytes()

    @jax.jit
    def forward(x_nchw):
        B = x_nchw.shape[0]

        # Input prep: NCHW -> padded NHWC -> flatten (h,w) -> edge-pad -> bf16.
        # ~1x the image bytes (no 9x im2col expansion in HBM any more).
        x = jnp.transpose(x_nchw, (0, 2, 3, 1))
        xp = jnp.pad(x, ((0, 0), (1, 1), (1, 1), (0, cp - c_in)))
        xflat = xp.reshape(B, mp, cp)
        xe = jnp.pad(xflat, ((0, 0), (edge_pad, edge_pad), (0, 0)))
        xe = xe.astype(jnp.bfloat16)                    # (B, mext, cp)

        conv_cost = pl.CostEstimate(
            flops=2 * B * mp_pad * (9 * cp) * cmid_p,
            transcendentals=0,
            bytes_accessed=(B * mext * cp * 2 + 9 * cp * cmid_p * 2
                            + cmid_p * 4 + mp_pad * 4 + B * cmid_p * 4),
        )

        # Conv weights/bias/mask use constant index_maps -> fetched once; their
        # default double-buffering costs <0.1 MiB here so pl.Buffered(1) is not
        # needed.  No cross-step accumulator exists (whole image per step).
        pooled = pl.pallas_call(
            conv_kernel,
            out_shape=jax.ShapeDtypeStruct((B, 1, cmid_p), jnp.float32),
            grid=(B,),
            in_specs=[
                pl.BlockSpec((None, mext, cp), lambda b: (b, 0, 0)),
                pl.BlockSpec((9 * cp, cmid_p), lambda b: (0, 0)),
                pl.BlockSpec((1, cmid_p), lambda b: (0, 0)),
                pl.BlockSpec((mp_pad, 1), lambda b: (0, 0)),
            ],
            out_specs=pl.BlockSpec((None, 1, cmid_p), lambda b: (b, 0, 0)),
            compiler_params=pltpu.CompilerParams(
                dimension_semantics=("parallel",),
                vmem_limit_bytes=vmem_limit),
            cost_estimate=conv_cost,
        )(xe, wconv, bconv, mask)

        pooled2 = pooled.reshape(B, cmid_p)

        heads_cost = pl.CostEstimate(
            flops=2 * B * cmid_p * feat_p + 2 * B * feat_p * cls_p,
            transcendentals=0,
            bytes_accessed=(B * cmid_p * 4 + cmid_p * feat_p * 4 + feat_p * 4
                            + feat_p * cls_p * 4 + cls_p * 4
                            + B * (feat_p + cls_p) * 4),
        )

        # Batched epilogue: one MXU matmul per head for the whole batch
        # (whole arrays in VMEM, single invocation).
        emb_cat, logit_cat = pl.pallas_call(
            _heads_kernel,
            out_shape=(jax.ShapeDtypeStruct((B, feat_p), jnp.float32),
                       jax.ShapeDtypeStruct((B, cls_p), jnp.float32)),
            cost_estimate=heads_cost,
        )(pooled2, wemb, bemb, wcls, bcls)

        emb1 = emb_cat[:, :d["f1"]]
        emb2 = emb_cat[:, d["f1"]:d["f1"] + d["f2"]]
        logit1 = logit_cat[:, :d["n1"]]
        logit2 = logit_cat[:, d["n1"]:d["n1"] + d["n2"]]
        return ([emb1, emb2], [logit1, logit2])

    return forward


# ---------------------------------------------------------------------------
# pure-JAX reference (f32) for a correctness spot-check
# ---------------------------------------------------------------------------
def _reference_forward(x_nchw, params_net1, params_net2):
    patches = _im2col_3x3(x_nchw)                               # (B, HW, 9C)

    def one(params):
        wc, bc, we, be, wl, bl = params
        act = jnp.maximum(jnp.einsum("bpk,kc->bpc", patches, wc) + bc, 0.0)
        pooled = jnp.mean(act, axis=1)
        emb = pooled @ we + be
        logit = emb @ wl + bl
        return emb, logit

    e1, l1 = one(params_net1)
    e2, l2 = one(params_net2)
    return ([e1, e2], [l1, l2])


def _init_net_params(key, c_in, c_mid, feat_dim, num_classes):
    """Deterministic synthetic parameters for one representative sub-network.

    Conv weight is stored as (KH*KW*C_in, C_mid): the PyTorch
    (C_out, C_in, KH, KW) weight transposed to (KH, KW, C_in, C_out) and
    reshaped -- matching the (kh, kw, c) tap ordering used by the kernel."""
    k = jax.random.split(key, 6)
    wconv = jax.random.normal(k[0], (9 * c_in, c_mid), jnp.float32) * 0.1
    bconv = jax.random.normal(k[1], (c_mid,), jnp.float32) * 0.01
    wemb = jax.random.normal(k[2], (c_mid, feat_dim), jnp.float32) * 0.1
    bemb = jax.random.normal(k[3], (feat_dim,), jnp.float32) * 0.01
    wcls = jax.random.normal(k[4], (feat_dim, num_classes), jnp.float32) * 0.1
    bcls = jax.random.normal(k[5], (num_classes,), jnp.float32) * 0.01
    return (wconv, bconv, wemb, bemb, wcls, bcls)


if __name__ == "__main__":
    key = jax.random.PRNGKey(0)
    kx, k1, k2 = jax.random.split(key, 3)

    # small shapes consistent with an NCHW image-classification forward
    B, C_in, H, W = 2, 4, 16, 16
    num_classes = 16

    x = jax.random.normal(kx, (B, C_in, H, W), jnp.float32)

    # heterogeneous sub-nets (different hidden / embedding widths)
    params_net1 = _init_net_params(k1, C_in, c_mid=32, feat_dim=32,
                                   num_classes=num_classes)
    params_net2 = _init_net_params(k2, C_in, c_mid=48, feat_dim=64,
                                   num_classes=num_classes)

    forward = make_cross_nets_forward(params_net1, params_net2, (C_in, H, W))
    embeddings, logits = forward(x)
    jax.block_until_ready(embeddings)
    jax.block_until_ready(logits)

    assert embeddings[0].shape == (B, 32)
    assert embeddings[1].shape == (B, 64)
    assert logits[0].shape == (B, num_classes)
    assert logits[1].shape == (B, num_classes)

    # correctness spot-check vs pure-JAX reference (bf16 conv operands -> loose tol)
    ref_emb, ref_logit = _reference_forward(x, params_net1, params_net2)
    for got, want in zip(embeddings + logits, ref_emb + ref_logit):
        assert jnp.allclose(got, want, rtol=3e-2, atol=3e-2)

    print("KERNEL_OK")
</pallas_src>

<mosaic_0001>
module attributes {stable_mosaic.version = 11 : i64} {
  func.func @_heads_kernel(%arg0: memref<2x128xf32, #tpu.memory_space<vmem>>, %arg1: memref<128x128xf32, #tpu.memory_space<vmem>>, %arg2: memref<1x128xf32, #tpu.memory_space<vmem>>, %arg3: memref<128x128xf32, #tpu.memory_space<vmem>>, %arg4: memref<1x128xf32, #tpu.memory_space<vmem>>, %arg5: memref<2x128xf32, #tpu.memory_space<vmem>>, %arg6: memref<2x128xf32, #tpu.memory_space<vmem>>) attributes {dimension_semantics = [], scalar_prefetch = 0 : i64, scratch_operands = 0 : i64, tpu.core_type = #tpu.core_type<tc>} {
    %c0 = arith.constant 0 : index
    %c0_0 = arith.constant 0 : index
    %0 = vector.load %arg0[%c0, %c0_0] : memref<2x128xf32, #tpu.memory_space<vmem>>, vector<2x128xf32>
    %c0_1 = arith.constant 0 : index
    %c0_2 = arith.constant 0 : index
    %1 = vector.load %arg1[%c0_1, %c0_2] : memref<128x128xf32, #tpu.memory_space<vmem>>, vector<128x128xf32>
    %cst = arith.constant dense<0.000000e+00> : vector<2x128xf32>
    %2 = tpu.matmul %0, %1, %cst {dimension_numbers = #tpu.dot_dimension_numbers<[1], [0], [0], [1], [0, 0, 1, 1], [], []>} : vector<2x128xf32>, vector<128x128xf32>, vector<2x128xf32> -> vector<2x128xf32>
    %c0_3 = arith.constant 0 : index
    %c0_4 = arith.constant 0 : index
    %3 = vector.load %arg2[%c0_3, %c0_4] : memref<1x128xf32, #tpu.memory_space<vmem>>, vector<1x128xf32>
    %4 = vector.broadcast %3 : vector<1x128xf32> to vector<2x128xf32>
    %5 = arith.addf %2, %4 : vector<2x128xf32>
    %c0_5 = arith.constant 0 : index
    %c0_6 = arith.constant 0 : index
    %6 = vector.load %arg5[%c0_5, %c0_6] : memref<2x128xf32, #tpu.memory_space<vmem>>, vector<2x128xf32>
    tpu.vector_store %arg5[%c0_5, %c0_6], %5 {strides = array<i32>} : memref<2x128xf32, #tpu.memory_space<vmem>>, vector<2x128xf32>,
    %c0_7 = arith.constant 0 : index
    %c0_8 = arith.constant 0 : index
    %7 = vector.load %arg3[%c0_7, %c0_8] : memref<128x128xf32, #tpu.memory_space<vmem>>, vector<128x128xf32>
    %cst_9 = arith.constant dense<0.000000e+00> : vector<2x128xf32>
    %8 = tpu.matmul %5, %7, %cst_9 {dimension_numbers = #tpu.dot_dimension_numbers<[1], [0], [0], [1], [0, 0, 1, 1], [], []>} : vector<2x128xf32>, vector<128x128xf32>, vector<2x128xf32> -> vector<2x128xf32>
    %c0_10 = arith.constant 0 : index
    %c0_11 = arith.constant 0 : index
    %9 = vector.load %arg4[%c0_10, %c0_11] : memref<1x128xf32, #tpu.memory_space<vmem>>, vector<1x128xf32>
    %10 = vector.broadcast %9 : vector<1x128xf32> to vector<2x128xf32>
    %11 = arith.addf %8, %10 : vector<2x128xf32>
    %c0_12 = arith.constant 0 : index
    %c0_13 = arith.constant 0 : index
    %12 = vector.load %arg6[%c0_12, %c0_13] : memref<2x128xf32, #tpu.memory_space<vmem>>, vector<2x128xf32>
    tpu.vector_store %arg6[%c0_12, %c0_13], %11 {strides = array<i32>} : memref<2x128xf32, #tpu.memory_space<vmem>>, vector<2x128xf32>,
    return
  }
}

module attributes {stable_mosaic.version = 11 : i64} {
  func.func @kernel(%arg0: i32, %arg1: memref<1x388x8xbf16, #tpu.memory_space<vmem>>, %arg2: memref<72x128xbf16, #tpu.memory_space<vmem>>, %arg3: memref<1x128xf32, #tpu.memory_space<vmem>>, %arg4: memref<328x1xf32, #tpu.memory_space<vmem>>, %arg5: memref<1x1x128xf32, #tpu.memory_space<vmem>>) attributes {dimension_semantics = [#tpu.dimension_semantics<parallel>], iteration_bounds = array<i64: 2>, scalar_prefetch = 0 : i64, scratch_operands = 0 : i64, tpu.core_type = #tpu.core_type<tc>, window_params = [{transform_indices = @transform_0, window_bounds = array<i64: 1, 388, 8>}, {pipeline_mode = #tpu.pipeline_mode<synchronous>, transform_indices = @transform_1, window_bounds = array<i64: 72, 128>}, {pipeline_mode = #tpu.pipeline_mode<synchronous>, transform_indices = @transform_2, window_bounds = array<i64: 1, 128>}, {pipeline_mode = #tpu.pipeline_mode<synchronous>, transform_indices = @transform_3, window_bounds = array<i64: 328, 1>}, {transform_indices = @transform_4, window_bounds = array<i64: 1, 1, 128>}]} {
    %cst = arith.constant 0.000000e+00 : f32
    %0 = vector.broadcast %cst : f32 to vector<1x128xf32>
    %c0 = arith.constant 0 : index
    %c13 = arith.constant 13 : index
    %c0_0 = arith.constant 0 : index
    %1 = vector.load %arg1[%c0, %c13, %c0_0] : memref<1x388x8xbf16, #tpu.memory_space<vmem>>, vector<1x256x8xbf16>
    %2 = vector.shape_cast %1 : vector<1x256x8xbf16> to vector<256x8xbf16>
    %c0_1 = arith.constant 0 : index
    %c0_2 = arith.constant 0 : index
    %3 = vector.load %arg2[%c0_1, %c0_2] : memref<72x128xbf16, #tpu.memory_space<vmem>>, vector<8x128xbf16>
    %cst_3 = arith.constant dense<0.000000e+00> : vector<256x128xf32>
    %4 = tpu.matmul %2, %3, %cst_3 {dimension_numbers = #tpu.dot_dimension_numbers<[1], [0], [0], [1], [0, 0, 1, 1], [], []>} : vector<256x8xbf16>, vector<8x128xbf16>, vector<256x128xf32> -> vector<256x128xf32>
    %c0_4 = arith.constant 0 : index
    %c14 = arith.constant 14 : index
    %c0_5 = arith.constant 0 : index
    %5 = vector.load %arg1[%c0_4, %c14, %c0_5] : memref<1x388x8xbf16, #tpu.memory_space<vmem>>, vector<1x256x8xbf16>
    %6 = vector.shape_cast %5 : vector<1x256x8xbf16> to vector<256x8xbf16>
    %c8 = arith.constant 8 : index
    %c0_6 = arith.constant 0 : index
    %7 = vector.load %arg2[%c8, %c0_6] : memref<72x128xbf16, #tpu.memory_space<vmem>>, vector<8x128xbf16>
    %cst_7 = arith.constant dense<0.000000e+00> : vector<256x128xf32>
    %8 = tpu.matmul %6, %7, %cst_7 {dimension_numbers = #tpu.dot_dimension_numbers<[1], [0], [0], [1], [0, 0, 1, 1], [], []>} : vector<256x8xbf16>, vector<8x128xbf16>, vector<256x128xf32> -> vector<256x128xf32>
    %9 = arith.addf %4, %8 : vector<256x128xf32>
    %c0_8 = arith.constant 0 : index
    %c15 = arith.constant 15 : index
    %c0_9 = arith.constant 0 : index
    %10 = vector.load %arg1[%c0_8, %c15, %c0_9] : memref<1x388x8xbf16, #tpu.memory_space<vmem>>, vector<1x256x8xbf16>
    %11 = vector.shape_cast %10 : vector<1x256x8xbf16> to vector<256x8xbf16>
    %c16 = arith.constant 16 : index
    %c0_10 = arith.constant 0 : index
    %12 = vector.load %arg2[%c16, %c0_10] : memref<72x128xbf16, #tpu.memory_space<vmem>>, vector<8x128xbf16>
    %cst_11 = arith.constant dense<0.000000e+00> : vector<256x128xf32>
    %13 = tpu.matmul %11, %12, %cst_11 {dimension_numbers = #tpu.dot_dimension_numbers<[1], [0], [0], [1], [0, 0, 1, 1], [], []>} : vector<256x8xbf16>, vector<8x128xbf16>, vector<256x128xf32> -> vector<256x128xf32>
    %14 = arith.addf %9, %13 : vector<256x128xf32>
    %c0_12 = arith.constant 0 : index
    %c31 = arith.constant 31 : index
    %c0_13 = arith.constant 0 : index
    %15 = vector.load %arg1[%c0_12, %c31, %c0_13] : memref<1x388x8xbf16, #tpu.memory_space<vmem>>, vector<1x256x8xbf16>
    %16 = vector.shape_cast %15 : vector<1x256x8xbf16> to vector<256x8xbf16>
    %c24 = arith.constant 24 : index
    %c0_14 = arith.constant 0 : index
    %17 = vector.load %arg2[%c24, %c0_14] : memref<72x128xbf16, #tpu.memory_space<vmem>>, vector<8x128xbf16>
    %cst_15 = arith.constant dense<0.000000e+00> : vector<256x128xf32>
    %18 = tpu.matmul %16, %17, %cst_15 {dimension_numbers = #tpu.dot_dimension_numbers<[1], [0], [0], [1], [0, 0, 1, 1], [], []>} : vector<256x8xbf16>, vector<8x128xbf16>, vector<256x128xf32> -> vector<256x128xf32>
    %19 = arith.addf %14, %18 : vector<256x128xf32>
    %c0_16 = arith.constant 0 : index
    %c32 = arith.constant 32 : index
    %c0_17 = arith.constant 0 : index
    %20 = vector.load %arg1[%c0_16, %c32, %c0_17] : memref<1x388x8xbf16, #tpu.memory_space<vmem>>, vector<1x256x8xbf16>
    %21 = vector.shape_cast %20 : vector<1x256x8xbf16> to vector<256x8xbf16>
    %c32_18 = arith.constant 32 : index
    %c0_19 = arith.constant 0 : index
    %22 = vector.load %arg2[%c32_18, %c0_19] : memref<72x128xbf16, #tpu.memory_space<vmem>>, vector<8x128xbf16>
    %cst_20 = arith.constant dense<0.000000e+00> : vector<256x128xf32>
    %23 = tpu.matmul %21, %22, %cst_20 {dimension_numbers = #tpu.dot_dimension_numbers<[1], [0], [0], [1], [0, 0, 1, 1], [], []>} : vector<256x8xbf16>, vector<8x128xbf16>, vector<256x128xf32> -> vector<256x128xf32>
    %24 = arith.addf %19, %23 : vector<256x128xf32>
    %c0_21 = arith.constant 0 : index
    %c33 = arith.constant 33 : index
    %c0_22 = arith.constant 0 : index
    %25 = vector.load %arg1[%c0_21, %c33, %c0_22] : memref<1x388x8xbf16, #tpu.memory_space<vmem>>, vector<1x256x8xbf16>
    %26 = vector.shape_cast %25 : vector<1x256x8xbf16> to vector<256x8xbf16>
    %c40 = arith.constant 40 : index
    %c0_23 = arith.constant 0 : index
    %27 = vector.load %arg2[%c40, %c0_23] : memref<72x128xbf16, #tpu.memory_space<vmem>>, vector<8x128xbf16>
    %cst_24 = arith.constant dense<0.000000e+00> : vector<256x128xf32>
    %28 = tpu.matmul %26, %27, %cst_24 {dimension_numbers = #tpu.dot_dimension_numbers<[1], [0], [0], [1], [0, 0, 1, 1], [], []>} : vector<256x8xbf16>, vector<8x128xbf16>, vector<256x128xf32> -> vector<256x128xf32>
    %29 = arith.addf %24, %28 : vector<256x128xf32>
    %c0_25 = arith.constant 0 : index
    %c49 = arith.constant 49 : index
    %c0_26 = arith.constant 0 : index
    %30 = vector.load %arg1[%c0_25, %c49, %c0_26] : memref<1x388x8xbf16, #tpu.memory_space<vmem>>, vector<1x256x8xbf16>
    %31 = vector.shape_cast %30 : vector<1x256x8xbf16> to vector<256x8xbf16>
    %c48 = arith.constant 48 : index
    %c0_27 = arith.constant 0 : index
    %32 = vector.load %arg2[%c48, %c0_27] : memref<72x128xbf16, #tpu.memory_space<vmem>>, vector<8x128xbf16>
    %cst_28 = arith.constant dense<0.000000e+00> : vector<256x128xf32>
    %33 = tpu.matmul %31, %32, %cst_28 {dimension_numbers = #tpu.dot_dimension_numbers<[1], [0], [0], [1], [0, 0, 1, 1], [], []>} : vector<256x8xbf16>, vector<8x128xbf16>, vector<256x128xf32> -> vector<256x128xf32>
    %34 = arith.addf %29, %33 : vector<256x128xf32>
    %c0_29 = arith.constant 0 : index
    %c50 = arith.constant 50 : index
    %c0_30 = arith.constant 0 : index
    %35 = vector.load %arg1[%c0_29, %c50, %c0_30] : memref<1x388x8xbf16, #tpu.memory_space<vmem>>, vector<1x256x8xbf16>
    %36 = vector.shape_cast %35 : vector<1x256x8xbf16> to vector<256x8xbf16>
    %c56 = arith.constant 56 : index
    %c0_31 = arith.constant 0 : index
    %37 = vector.load %arg2[%c56, %c0_31] : memref<72x128xbf16, #tpu.memory_space<vmem>>, vector<8x128xbf16>
    %cst_32 = arith.constant dense<0.000000e+00> : vector<256x128xf32>
    %38 = tpu.matmul %36, %37, %cst_32 {dimension_numbers = #tpu.dot_dimension_numbers<[1], [0], [0], [1], [0, 0, 1, 1], [], []>} : vector<256x8xbf16>, vector<8x128xbf16>, vector<256x128xf32> -> vector<256x128xf32>
    %39 = arith.addf %34, %38 : vector<256x128xf32>
    %c0_33 = arith.constant 0 : index
    %c51 = arith.constant 51 : index
    %c0_34 = arith.constant 0 : index
    %40 = vector.load %arg1[%c0_33, %c51, %c0_34] : memref<1x388x8xbf16, #tpu.memory_space<vmem>>, vector<1x256x8xbf16>
    %41 = vector.shape_cast %40 : vector<1x256x8xbf16> to vector<256x8xbf16>
    %c64 = arith.constant 64 : index
    %c0_35 = arith.constant 0 : index
    %42 = vector.load %arg2[%c64, %c0_35] : memref<72x128xbf16, #tpu.memory_space<vmem>>, vector<8x128xbf16>
    %cst_36 = arith.constant dense<0.000000e+00> : vector<256x128xf32>
    %43 = tpu.matmul %41, %42, %cst_36 {dimension_numbers = #tpu.dot_dimension_numbers<[1], [0], [0], [1], [0, 0, 1, 1], [], []>} : vector<256x8xbf16>, vector<8x128xbf16>, vector<256x128xf32> -> vector<256x128xf32>
    %44 = arith.addf %39, %43 : vector<256x128xf32>
    %c0_37 = arith.constant 0 : index
    %c0_38 = arith.constant 0 : index
    %45 = vector.load %arg3[%c0_37, %c0_38] : memref<1x128xf32, #tpu.memory_space<vmem>>, vector<1x128xf32>
    %46 = vector.broadcast %45 : vector<1x128xf32> to vector<256x128xf32>
    %47 = arith.addf %44, %46 : vector<256x128xf32>
    %cst_39 = arith.constant 0.000000e+00 : f32
    %48 = vector.broadcast %cst_39 : f32 to vector<256x128xf32>
    %49 = arith.maximumf %47, %48 : vector<256x128xf32>
    %c0_40 = arith.constant 0 : index
    %c0_41 = arith.constant 0 : index
    %50 = vector.load %arg4[%c0_40, %c0_41] : memref<328x1xf32, #tpu.memory_space<vmem>>, vector<256x1xf32>
    %51 = vector.broadcast %50 : vector<256x1xf32> to vector<256x128xf32>
    %52 = arith.mulf %49, %51 : vector<256x128xf32>
    %cst_42 = arith.constant dense<0.000000e+00> : vector<128xf32>
    %53 = vector.multi_reduction <add>, %52, %cst_42 [0] : vector<256x128xf32> to vector<128xf32>
    %54 = vector.shape_cast %53 : vector<128xf32> to vector<1x128xf32>
    %55 = arith.addf %0, %54 : vector<1x128xf32>
    %c0_43 = arith.constant 0 : index
    %c269 = arith.constant 269 : index
    %c0_44 = arith.constant 0 : index
    %56 = vector.load %arg1[%c0_43, %c269, %c0_44] : memref<1x388x8xbf16, #tpu.memory_space<vmem>>, vector<1x72x8xbf16>
    %57 = vector.shape_cast %56 : vector<1x72x8xbf16> to vector<72x8xbf16>
    %c0_45 = arith.constant 0 : index
    %c0_46 = arith.constant 0 : index
    %58 = vector.load %arg2[%c0_45, %c0_46] : memref<72x128xbf16, #tpu.memory_space<vmem>>, vector<8x128xbf16>
    %cst_47 = arith.constant dense<0.000000e+00> : vector<72x128xf32>
    %59 = tpu.matmul %57, %58, %cst_47 {dimension_numbers = #tpu.dot_dimension_numbers<[1], [0], [0], [1], [0, 0, 1, 1], [], []>} : vector<72x8xbf16>, vector<8x128xbf16>, vector<72x128xf32> -> vector<72x128xf32>
    %c0_48 = arith.constant 0 : index
    %c270 = arith.constant 270 : index
    %c0_49 = arith.constant 0 : index
    %60 = vector.load %arg1[%c0_48, %c270, %c0_49] : memref<1x388x8xbf16, #tpu.memory_space<vmem>>, vector<1x72x8xbf16>
    %61 = vector.shape_cast %60 : vector<1x72x8xbf16> to vector<72x8xbf16>
    %c8_50 = arith.constant 8 : index
    %c0_51 = arith.constant 0 : index
    %62 = vector.load %arg2[%c8_50, %c0_51] : memref<72x128xbf16, #tpu.memory_space<vmem>>, vector<8x128xbf16>
    %cst_52 = arith.constant dense<0.000000e+00> : vector<72x128xf32>
    %63 = tpu.matmul %61, %62, %cst_52 {dimension_numbers = #tpu.dot_dimension_numbers<[1], [0], [0], [1], [0, 0, 1, 1], [], []>} : vector<72x8xbf16>, vector<8x128xbf16>, vector<72x128xf32> -> vector<72x128xf32>
    %64 = arith.addf %59, %63 : vector<72x128xf32>
    %c0_53 = arith.constant 0 : index
    %c271 = arith.constant 271 : index
    %c0_54 = arith.constant 0 : index
    %65 = vector.load %arg1[%c0_53, %c271, %c0_54] : memref<1x388x8xbf16, #tpu.memory_space<vmem>>, vector<1x72x8xbf16>
    %66 = vector.shape_cast %65 : vector<1x72x8xbf16> to vector<72x8xbf16>
    %c16_55 = arith.constant 16 : index
    %c0_56 = arith.constant 0 : index
    %67 = vector.load %arg2[%c16_55, %c0_56] : memref<72x128xbf16, #tpu.memory_space<vmem>>, vector<8x128xbf16>
    %cst_57 = arith.constant dense<0.000000e+00> : vector<72x128xf32>
    %68 = tpu.matmul %66, %67, %cst_57 {dimension_numbers = #tpu.dot_dimension_numbers<[1], [0], [0], [1], [0, 0, 1, 1], [], []>} : vector<72x8xbf16>, vector<8x128xbf16>, vector<72x128xf32> -> vector<72x128xf32>
    %69 = arith.addf %64, %68 : vector<72x128xf32>
    %c0_58 = arith.constant 0 : index
    %c287 = arith.constant 287 : index
    %c0_59 = arith.constant 0 : index
    %70 = vector.load %arg1[%c0_58, %c287, %c0_59] : memref<1x388x8xbf16, #tpu.memory_space<vmem>>, vector<1x72x8xbf16>
    %71 = vector.shape_cast %70 : vector<1x72x8xbf16> to vector<72x8xbf16>
    %c24_60 = arith.constant 24 : index
    %c0_61 = arith.constant 0 : index
    %72 = vector.load %arg2[%c24_60, %c0_61] : memref<72x128xbf16, #tpu.memory_space<vmem>>, vector<8x128xbf16>
    %cst_62 = arith.constant dense<0.000000e+00> : vector<72x128xf32>
    %73 = tpu.matmul %71, %72, %cst_62 {dimension_numbers = #tpu.dot_dimension_numbers<[1], [0], [0], [1], [0, 0, 1, 1], [], []>} : vector<72x8xbf16>, vector<8x128xbf16>, vector<72x128xf32> -> vector<72x128xf32>
    %74 = arith.addf %69, %73 : vector<72x128xf32>
    %c0_63 = arith.constant 0 : index
    %c288 = arith.constant 288 : index
    %c0_64 = arith.constant 0 : index
    %75 = vector.load %arg1[%c0_63, %c288, %c0_64] : memref<1x388x8xbf16, #tpu.memory_space<vmem>>, vector<1x72x8xbf16>
    %76 = vector.shape_cast %75 : vector<1x72x8xbf16> to vector<72x8xbf16>
    %c32_65 = arith.constant 32 : index
    %c0_66 = arith.constant 0 : index
    %77 = vector.load %arg2[%c32_65, %c0_66] : memref<72x128xbf16, #tpu.memory_space<vmem>>, vector<8x128xbf16>
    %cst_67 = arith.constant dense<0.000000e+00> : vector<72x128xf32>
    %78 = tpu.matmul %76, %77, %cst_67 {dimension_numbers = #tpu.dot_dimension_numbers<[1], [0], [0], [1], [0, 0, 1, 1], [], []>} : vector<72x8xbf16>, vector<8x128xbf16>, vector<72x128xf32> -> vector<72x128xf32>
    %79 = arith.addf %74, %78 : vector<72x128xf32>
    %c0_68 = arith.constant 0 : index
    %c289 = arith.constant 289 : index
    %c0_69 = arith.constant 0 : index
    %80 = vector.load %arg1[%c0_68, %c289, %c0_69] : memref<1x388x8xbf16, #tpu.memory_space<vmem>>, vector<1x72x8xbf16>
    %81 = vector.shape_cast %80 : vector<1x72x8xbf16> to vector<72x8xbf16>
    %c40_70 = arith.constant 40 : index
    %c0_71 = arith.constant 0 : index
    %82 = vector.load %arg2[%c40_70, %c0_71] : memref<72x128xbf16, #tpu.memory_space<vmem>>, vector<8x128xbf16>
    %cst_72 = arith.constant dense<0.000000e+00> : vector<72x128xf32>
    %83 = tpu.matmul %81, %82, %cst_72 {dimension_numbers = #tpu.dot_dimension_numbers<[1], [0], [0], [1], [0, 0, 1, 1], [], []>} : vector<72x8xbf16>, vector<8x128xbf16>, vector<72x128xf32> -> vector<72x128xf32>
    %84 = arith.addf %79, %83 : vector<72x128xf32>
    %c0_73 = arith.constant 0 : index
    %c305 = arith.constant 305 : index
    %c0_74 = arith.constant 0 : index
    %85 = vector.load %arg1[%c0_73, %c305, %c0_74] : memref<1x388x8xbf16, #tpu.memory_space<vmem>>, vector<1x72x8xbf16>
    %86 = vector.shape_cast %85 : vector<1x72x8xbf16> to vector<72x8xbf16>
    %c48_75 = arith.constant 48 : index
    %c0_76 = arith.constant 0 : index
    %87 = vector.load %arg2[%c48_75, %c0_76] : memref<72x128xbf16, #tpu.memory_space<vmem>>, vector<8x128xbf16>
    %cst_77 = arith.constant dense<0.000000e+00> : vector<72x128xf32>
    %88 = tpu.matmul %86, %87, %cst_77 {dimension_numbers = #tpu.dot_dimension_numbers<[1], [0], [0], [1], [0, 0, 1, 1], [], []>} : vector<72x8xbf16>, vector<8x128xbf16>, vector<72x128xf32> -> vector<72x128xf32>
    %89 = arith.addf %84, %88 : vector<72x128xf32>
    %c0_78 = arith.constant 0 : index
    %c306 = arith.constant 306 : index
    %c0_79 = arith.constant 0 : index
    %90 = vector.load %arg1[%c0_78, %c306, %c0_79] : memref<1x388x8xbf16, #tpu.memory_space<vmem>>, vector<1x72x8xbf16>
    %91 = vector.shape_cast %90 : vector<1x72x8xbf16> to vector<72x8xbf16>
    %c56_80 = arith.constant 56 : index
    %c0_81 = arith.constant 0 : index
    %92 = vector.load %arg2[%c56_80, %c0_81] : memref<72x128xbf16, #tpu.memory_space<vmem>>, vector<8x128xbf16>
    %cst_82 = arith.constant dense<0.000000e+00> : vector<72x128xf32>
    %93 = tpu.matmul %91, %92, %cst_82 {dimension_numbers = #tpu.dot_dimension_numbers<[1], [0], [0], [1], [0, 0, 1, 1], [], []>} : vector<72x8xbf16>, vector<8x128xbf16>, vector<72x128xf32> -> vector<72x128xf32>
    %94 = arith.addf %89, %93 : vector<72x128xf32>
    %c0_83 = arith.constant 0 : index
    %c307 = arith.constant 307 : index
    %c0_84 = arith.constant 0 : index
    %95 = vector.load %arg1[%c0_83, %c307, %c0_84] : memref<1x388x8xbf16, #tpu.memory_space<vmem>>, vector<1x72x8xbf16>
    %96 = vector.shape_cast %95 : vector<1x72x8xbf16> to vector<72x8xbf16>
    %c64_85 = arith.constant 64 : index
    %c0_86 = arith.constant 0 : index
    %97 = vector.load %arg2[%c64_85, %c0_86] : memref<72x128xbf16, #tpu.memory_space<vmem>>, vector<8x128xbf16>
    %cst_87 = arith.constant dense<0.000000e+00> : vector<72x128xf32>
    %98 = tpu.matmul %96, %97, %cst_87 {dimension_numbers = #tpu.dot_dimension_numbers<[1], [0], [0], [1], [0, 0, 1, 1], [], []>} : vector<72x8xbf16>, vector<8x128xbf16>, vector<72x128xf32> -> vector<72x128xf32>
    %99 = arith.addf %94, %98 : vector<72x128xf32>
    %c0_88 = arith.constant 0 : index
    %c0_89 = arith.constant 0 : index
    %100 = vector.load %arg3[%c0_88, %c0_89] : memref<1x128xf32, #tpu.memory_space<vmem>>, vector<1x128xf32>
    %101 = vector.broadcast %100 : vector<1x128xf32> to vector<72x128xf32>
    %102 = arith.addf %99, %101 : vector<72x128xf32>
    %cst_90 = arith.constant 0.000000e+00 : f32
    %103 = vector.broadcast %cst_90 : f32 to vector<72x128xf32>
    %104 = arith.maximumf %102, %103 : vector<72x128xf32>
    %c256 = arith.constant 256 : index
    %c0_91 = arith.constant 0 : index
    %105 = vector.load %arg4[%c256, %c0_91] : memref<328x1xf32, #tpu.memory_space<vmem>>, vector<72x1xf32>
    %106 = vector.broadcast %105 : vector<72x1xf32> to vector<72x128xf32>
    %107 = arith.mulf %104, %106 : vector<72x128xf32>
    %cst_92 = arith.constant dense<0.000000e+00> : vector<128xf32>
    %108 = vector.multi_reduction <add>, %107, %cst_92 [0] : vector<72x128xf32> to vector<128xf32>
    %109 = vector.shape_cast %108 : vector<128xf32> to vector<1x128xf32>
    %110 = arith.addf %55, %109 : vector<1x128xf32>
    %cst_93 = arith.constant 3.906250e-03 : f32
    %111 = vector.broadcast %cst_93 : f32 to vector<1x128xf32>
    %112 = arith.mulf %110, %111 : vector<1x128xf32>
    %c0_94 = arith.constant 0 : index
    %c0_95 = arith.constant 0 : index
    %c0_96 = arith.constant 0 : index
    %113 = vector.load %arg5[%c0_94, %c0_95, %c0_96] : memref<1x1x128xf32, #tpu.memory_space<vmem>>, vector<1x1x128xf32>
    %114 = vector.shape_cast %113 : vector<1x1x128xf32> to vector<1x128xf32>
    %115 = vector.shape_cast %112 : vector<1x128xf32> to vector<1x1x128xf32>
    tpu.vector_store %arg5[%c0_94, %c0_95, %c0_96], %115 {strides = array<i32>} : memref<1x1x128xf32, #tpu.memory_space<vmem>>, vector<1x1x128xf32>,
    return
  }
  func.func @transform_0(%arg0: i32) -> (i32, i32, i32) {
    %c0_i32 = arith.constant 0 : i32
    %c0_i32_0 = arith.constant 0 : i32
    %c0_i32_1 = arith.constant 0 : i32
    return %arg0, %c0_i32, %c0_i32_0 : i32, i32, i32
  }
  func.func @transform_1(%arg0: i32) -> (i32, i32) {
    %c0_i32 = arith.constant 0 : i32
    %c0_i32_0 = arith.constant 0 : i32
    %c0_i32_1 = arith.constant 0 : i32
    return %c0_i32, %c0_i32_0 : i32, i32
  }
  func.func @transform_2(%arg0: i32) -> (i32, i32) {
    %c0_i32 = arith.constant 0 : i32
    %c0_i32_0 = arith.constant 0 : i32
    %c0_i32_1 = arith.constant 0 : i32
    return %c0_i32, %c0_i32_0 : i32, i32
  }
  func.func @transform_3(%arg0: i32) -> (i32, i32) {
    %c0_i32 = arith.constant 0 : i32
    %c0_i32_0 = arith.constant 0 : i32
    %c0_i32_1 = arith.constant 0 : i32
    return %c0_i32, %c0_i32_0 : i32, i32
  }
  func.func @transform_4(%arg0: i32) -> (i32, i32, i32) {
    %c0_i32 = arith.constant 0 : i32
    %c0_i32_0 = arith.constant 0 : i32
    %c0_i32_1 = arith.constant 0 : i32
    return %arg0, %c0_i32, %c0_i32_0 : i32, i32, i32
  }
}

</mosaic_0001>

<bundles_post_ra>
// kernel: forward.3
= control target key start
LH: loop header
LB: loop body
LE: loop exit
PB: predicated region body
PF: predicated region fallthrough
CT: control target
= control target key end

     0   :  { %s261_s1 = inlined_call_operand.vmem [shape: f32[128,128], index: 1, kind: input, shape index: {}]   ;;  %s262_s3 = inlined_call_operand.vmem [shape: f32[128,128], index: 3, kind: input, shape index: {}]   ;;  %s263_s2 = inlined_call_operand.vmem [shape: f32[1,128], index: 2, kind: input, shape index: {}]   ;;  %s264_s0 = inlined_call_operand.vmem [shape: f32[2,128], index: 0, kind: input, shape index: {}]   ;;  %s265_s4 = inlined_call_operand.vmem [shape: f32[1,128], index: 4, kind: input, shape index: {}]   ;;  %s266_s5 = inlined_call_operand.vmem [shape: f32[2,128], index: 5, kind: output, shape index: {0}]   ;;  %s267_s6 = inlined_call_operand.vmem [shape: f32[2,128], index: 6, kind: output, shape index: {1}]  }
   0x1   :  { %v38_v0 = vld [vmem:[%s261_s1 + $0x78] sm:$0xff]  ;;  %v37_v1 = vld [vmem:[%s261_s1 + $0x70] sm:$0xff]  ;;  %v36_v2 = vld [vmem:[%s261_s1 + $0x68] sm:$0xff] }
   0x2   :  { %43 = vmatpush.msra.mxu0 %v38_v0  ;;  %v35_v3 = vld [vmem:[%s261_s1 + $0x60] sm:$0xff]  ;;  %v79_v4 = vld [vmem:[%s262_s3 + $0x78] sm:$0xff]  ;;  %v78_v6 = vld [vmem:[%s262_s3 + $0x70] sm:$0xff] }
   0x3   :  { %v34_v5 = vld [vmem:[%s261_s1 + $0x58] sm:$0xff]  ;;  %84 = vmatpush.msra.mxu1 %v79_v4  ;;  %v77_v7 = vld [vmem:[%s262_s3 + $0x68] sm:$0xff]  ;;  %v33_v8 = vld [vmem:[%s261_s1 + $0x50] sm:$0xff] }
   0x4   :  { %44 = vmatpush.msra.mxu0 %v37_v1  ;;  %v76_v9 = vld [vmem:[%s262_s3 + $0x60] sm:$0xff]  ;;  %v32_v10 = vld [vmem:[%s261_s1 + $0x48] sm:$0xff]  ;;  %v75_v11 = vld [vmem:[%s262_s3 + $0x58] sm:$0xff] }
   0x5   :  { %85 = vmatpush.msra.mxu1 %v78_v6  ;;  %v31_v12 = vld [vmem:[%s261_s1 + $0x40] sm:$0xff]  ;;  %v74_v13 = vld [vmem:[%s262_s3 + $0x50] sm:$0xff]  ;;  %v30_v14 = vld [vmem:[%s261_s1 + $0x38] sm:$0xff] }
   0x6   :  { %45 = vmatpush.msra.mxu0 %v36_v2  ;;  %v73_v15 = vld [vmem:[%s262_s3 + $0x48] sm:$0xff]  ;;  %v29_v16 = vld [vmem:[%s261_s1 + $0x30] sm:$0xff]  ;;  %v72_v17 = vld [vmem:[%s262_s3 + $0x40] sm:$0xff] }
   0x7   :  { %86 = vmatpush.msra.mxu1 %v77_v7  ;;  %v28_v18 = vld [vmem:[%s261_s1 + $0x28] sm:$0xff]  ;;  %v71_v19 = vld [vmem:[%s262_s3 + $0x38] sm:$0xff]  ;;  %v27_v20 = vld [vmem:[%s261_s1 + $0x20] sm:$0xff] }
   0x8   :  { %46 = vmatpush.msra.mxu0 %v35_v3  ;;  %v70_v21 = vld [vmem:[%s262_s3 + $0x30] sm:$0xff]  ;;  %v26_v22 = vld [vmem:[%s261_s1 + $0x18] sm:$0xff]  ;;  %v69_v23 = vld [vmem:[%s262_s3 + $0x28] sm:$0xff] }
   0x9   :  { %87 = vmatpush.msra.mxu1 %v76_v9  ;;  %v25_v24 = vld [vmem:[%s261_s1 + $0x10] sm:$0xff]  ;;  %v68_v25 = vld [vmem:[%s262_s3 + $0x20] sm:$0xff]  ;;  %v24_v26 = vld [vmem:[%s261_s1 + $0x8] sm:$0xff] }
   0xa   :  { %47 = vmatpush.msra.mxu0 %v34_v5  ;;  %v67_v27 = vld [vmem:[%s262_s3 + $0x18] sm:$0xff]  ;;  %v23_v28 = vld [vmem:[%s261_s1] sm:$0xff]  ;;  %v66_v30 = vld [vmem:[%s262_s3 + $0x10] sm:$0xff] }
   0xb   :  { %88 = vmatpush.msra.mxu1 %v75_v11  ;;  %v22_v29 = vld [vmem:[%s264_s0] sm:$0x3]  ;;  %v65_v31 = vld [vmem:[%s262_s3 + $0x8] sm:$0xff] }
   0xc   :  { %48 = vmatpush.msra.mxu0 %v33_v8  ;;  %v64_v32 = vld [vmem:[%s262_s3] sm:$0xff] }
   0xd   :  { %89 = vmatpush.msra.mxu1 %v74_v13  ;;  %v113_v33 = vld [vmem:[%s263_s2] ss:$0 sm:$0xff] }
   0xe   :  { %49 = vmatpush.msra.mxu0 %v32_v10  ;;  %v114_v36 = vld [vmem:[%s265_s4] ss:$0 sm:$0xff] }
   0xf   :  { %90 = vmatpush.msra.mxu1 %v73_v15 }
  0x10   :  { %50 = vmatpush.msra.mxu0 %v31_v12 }
  0x11   :  { %91 = vmatpush.msra.mxu1 %v72_v17 }
  0x12   :  { %51 = vmatpush.msra.mxu0 %v30_v14 }
  0x13   :  { %92 = vmatpush.msra.mxu1 %v71_v19 }
  0x14   :  { %52 = vmatpush.msra.mxu0 %v29_v16 }
  0x15   :  { %93 = vmatpush.msra.mxu1 %v70_v21 }
  0x16   :  { %53 = vmatpush.msra.mxu0 %v28_v18 }
  0x17   :  { %94 = vmatpush.msra.mxu1 %v69_v23 }
  0x18   :  { %54 = vmatpush.msra.mxu0 %v27_v20 }
  0x19   :  { %95 = vmatpush.msra.mxu1 %v68_v25 }
  0x1a   :  { %55 = vmatpush.msra.mxu0 %v26_v22 }
  0x1b   :  { %96 = vmatpush.msra.mxu1 %v67_v27 }
  0x1c   :  { %56 = vmatpush.msra.mxu0 %v25_v24 }
  0x1d   :  { %97 = vmatpush.msra.mxu1 %v66_v30 }
  0x1e   :  { %57 = vmatpush.msra.mxu0 %v24_v26 }
  0x1f   :  { %98 = vmatpush.msra.mxu1 %v65_v31 }
  0x20   :  { %58 = vmatpush.msra.mxu0 %v23_v28 }
  0x21   :  { %59 = vmatmul.f32.vlgmr.msra.gmra.mxu0 %v22_v29  ;;  %99 = vmatpush.msra.mxu1 %v64_v32 }
  0x9e   :  { %v60_v34 = vpop.f32.mrf.mxu0 }
  0x9f   :  { %v61_v35 = vadd.f32 %v113_v33, %v60_v34 }
  0xa1   :  { %63 = vst [vmem:[%s266_s5] sm:$0x3] %v61_v35  ;;  %100 = vmatmul.f32.vlgmr.msra.gmra.mxu1 %v61_v35 }
 0x11e   :  { %v101_v37 = vpop.f32.mrf.mxu1 }
 0x11f   :  { %v102_v38 = vadd.f32 %v114_v36, %v101_v37 }
 0x121   :  { %104 = vst [vmem:[%s267_s6] sm:$0x3] %v102_v38 }

// kernel: forward.2
= control target key start
LH: loop header
LB: loop body
LE: loop exit
PB: predicated region body
PF: predicated region fallthrough
CT: control target
= control target key end

     0   :  { %s5142_s15 = smov 0   ;;  %s6506_s0 = inlined_call_operand.vmem [shape: bf16[2,388,8], index: 0, kind: input, shape index: {}]   ;;  %s6507_s1 = inlined_call_operand.vmem [shape: bf16[72,128], index: 1, kind: input, shape index: {}]   ;;  %s6508_s2 = inlined_call_operand.vmem [shape: f32[1,128], index: 2, kind: input, shape index: {}]   ;;  %s6509_s3 = inlined_call_operand.vmem [shape: f32[328,1], index: 3, kind: input, shape index: {}]   ;;  %s6510_s4 = inlined_call_operand.vmem [shape: f32[2,1,128], index: 4, kind: output, shape index: {}]  }
   0x1 LB: > { %s4353_s16 = sadd.s32 4294967295, %s5114_s15   ;;  %p4357_p0 = scmp.ge.s32.totalorder %s5114_s15, 1  ;;  %s5114_s15 = sphi %s5142_s15, %s14_s15  }
   0x2   : > { %p162_p1 = scmp.lt.s32.totalorder %s5114_s15, 3 }
   0x4   : > { %p163_p2 = pnand %p4357_p0, %p162_p1 }
   0x6   : > { %166 = sbr.rel (%p163_p2) target bundleno = 938 (0x3aa), region = 36 }
   0xb   : > { %v230_v0 = vld [vmem:[%s6507_s1 + $0x4] sm:$0xf]  ;;  %vm397_vm0 = vcmask 1043456   ;;  %p186_p3 = scmp.lt.s32.totalorder %s4353_s16, 1  ;;  %v1482_v2 = vld [vmem:[%s6507_s1 + $0x10] sm:$0xf] }
   0xc   : > { %v5154_v1 = vsel %vm397_vm0, %v230_v0, 0  ;;  %v228_v3 = vld [vmem:[%s6507_s1] sm:$0xf]  ;;  %v5166_v4 = vsel %vm397_vm0, %v1482_v2, 0  ;;  %v787_v6 = vld [vmem:[%s6507_s1 + $0x8] sm:$0xf] }
   0xd   : > { %408 = vmatpush.bf16.msra.mxu0 %v5154_v1  ;;  %s6598_s16 = smov (!%p186_p3, %s4353_s16), 1  ;;  %v5169_v5 = vsel %vm397_vm0, %v228_v3, 0  ;;  %v5177_v7 = vsel %vm397_vm0, %v787_v6, 0  ;;  %v1074_v8 = vld [vmem:[%s6507_s1 + $0xc] sm:$0xf]  ;;  %vm314_vm1 = vcmask 1044480  }
   0xe   : > { %704 = vmatpush.bf16.msra.mxu1 %v5169_v5  ;;  %s5087_s27 = smul.u32 196, %s6598_s16  ;;  %927 = vmatpush.bf16.msra.mxu2 %v5177_v7  ;;  %v5185_v9 = vsel %vm397_vm0, %v1074_v8, 0  ;;  %v2126_v10 = vld [vmem:[%s6507_s1 + $0x18] sm:$0xf]  ;;  %v2515_v12 = vld [vmem:[%s6507_s1 + $0x1c] sm:$0xf]  ;;  %s193_s7 = scalar_lea.vmem %s6510_s4, %s6598_s16 }
   0xf   : > { %1368 = vmatpush.bf16.msra.mxu3 %v5185_v9  ;;  %v5192_v11 = vsel %vm397_vm0, %v2126_v10, 0  ;;  %v1704_v13 = vld [vmem:[%s6507_s1 + $0x14] sm:$0xf]  ;;  %v5207_v14 = vsel %vm397_vm0, %v2515_v12, 0  ;;  %vm348_vm2 = vcmask 64512   ;;  %vm2519_vm6 = vcmask 1046528  }
  0x10   : > { %s5203_s10 = scalar_lea.vmem %s6506_s0, %s5087_s27  ;;  %v5210_v15 = vsel %vm397_vm0, %v1704_v13, 0  ;;  %vm791_vm3 = vsmask.f32 4352  ;;  %vm493_vm4 = vsmask.f32 5376 }
  0x11   : > { %1557 = vmatpush.bf16.msrb.mxu0 %v5166_v4  ;;  %v196_v16 = vld [vmem:[%s5203_s10 + $0x8] sm:$0xf]  ;;  %v5214_v17 = vld [vmem:[%s5203_s10 + $0xc] sm:$0xff]  ;;  %v229_v18 = vld [vmem:[%s5203_s10 + $0x4] sm:$0x8] }
  0x12   : > { %2400 = vmatpush.bf16.msrb.mxu2 %v5192_v11  ;;  %1979 = vmatpush.bf16.msrb.mxu1 %v5210_v15  ;;  %v264_v19 = vunpack.c.l.b16 %v229_v18  ;;  %v265_v20 = vunpack.c.l.b16 %v196_v16  ;;  %v195_v21 = vld [vmem:[%s5203_s10 + $0x4] sm:$0xc]  ;;  %v4953_v22 = vld [vmem:[%s5203_s10 + $0xc] sm:$0x8]  ;;  %v5050_v23 = vld [vmem:[%s5203_s10 + $0xc] sm:$0xf0]  }
  0x13   : > { %2611 = vmatpush.bf16.msrb.mxu3 %v5207_v14  ;;  %v491_v24 = vunpack.c.l.b16 %v195_v21  ;;  %v503_v25 = vshrl.u32 %v5214_v17, 16  ;;  %v506_v26 = vshll.u32 %v5214_v17, 16  ;;  %v316_v28 = vrot.slane %v5214_v17, 3  ;;  %v5052_v38 = vld [vmem:[%s5203_s10 + $0x14] sm:$0xff]   ;;  %v5054_v2 = vld [vmem:[%s5203_s10 + $0x1c] sm:$0xff]  }
  0x14   : > { %v297_v27 = vpack.c.b16 %v265_v20, %v264_v19  ;;  %v4954_v29 = vor.u32 %v5050_v23, %v4953_v22  ;;  %v1167_v52 = vshrl.u32 %v5052_v38, 16  ;;  %v1170_v53 = vshll.u32 %v5052_v38, 16  ;;  %v4779_v54 = vld [vmem:[%s5203_s10 + $0x14] sm:$0xff]  ;;  %v4780_v23 = vld [vmem:[%s5203_s10 + $0x1c] sm:$0xff] }
  0x15   : > { %v492_v30 = vpack.c.b16 %v265_v20, %v491_v24  ;;  %v505_v31 = vrot.slane %v503_v25, 2  ;;  %v508_v32 = vrot.slane %v506_v26, 3  ;;  %v800_v33 = vrot.slane %v503_v25, 3 }
  0x16   : > { %v315_v34 = vrot.slane %v297_v27, 3  ;;  %v793_v35 = vshrl.u32 %v297_v27, 16  ;;  %v796_v36 = vshll.u32 %v297_v27, 16  ;;  %v801_v37 = vrot.slane %v506_v26, 4  ;;  %v5056_v27 = vld [vmem:[%s5203_s10 + $0x24] sm:$0xff]  }
  0x17   : > { %v495_v39 = vshrl.u32 %v492_v30, 16  ;;  %v498_v40 = vshll.u32 %v492_v30, 16  ;;  %v509_v41 = vor.u32 %v508_v32, %v505_v31  ;;  %v1159_v42 = vshrl.u32 %v4954_v29, 16 }
  0x18   : > { %v317_v43 = vsel %vm314_vm1, %v315_v34, %v316_v28  ;;  %v795_v44 = vrot.slane %v793_v35, 3  ;;  %v798_v45 = vrot.slane %v796_v36, 4  ;;  %v802_v46 = vor.u32 %v801_v37, %v800_v33 }
  0x19   : > { %4419 = vmatmul.msk.bf16.vlgmr.msra.gmra.mxu0 %vm348_vm2, %v317_v43  ;;  %v497_v47 = vrot.slane %v495_v39, 2  ;;  %v500_v48 = vrot.slane %v498_v40, 3  ;;  %v1161_v49 = vrot.slane %v1159_v42, 3  ;;  %v1162_v50 = vshll.u32 %v4954_v29, 16  ;;  %v4781_v42 = vld [vmem:[%s5203_s10 + $0x24] sm:$0xff] }
  0x1a   : > { %v799_v51 = vor.u32 %v798_v45, %v795_v44  ;;  %v1169_v58 = vrot.slane %v1167_v52, 3  ;;  %v1172_v59 = vrot.slane %v1170_v53, 4  ;;  %v512_v63 = vshrl.u32 %v4779_v54, 16 }
  0x1b   : > { %v501_v55 = vor.u32 %v500_v48, %v497_v47  ;;  %v1164_v56 = vrot.slane %v1162_v50, 4  ;;  %v515_v0 = vshll.u32 %v4779_v54, 16  ;;  %v318_v6 = vrot.slane %v4779_v54, 3  ;;  %v5058_v47 = vld [vmem:[%s5203_s10 + $0x2c] sm:$0xff]  }
  0x1c   : > { %v803_v57 = vsel %vm791_vm3, %v799_v51, %v802_v46  ;;  %v1173_v62 = vor.u32 %v1172_v59, %v1169_v58  ;;  %v804_v8 = vrot.slane %v512_v63, 3  ;;  %v1176_v12 = vshrl.u32 %v5054_v2, 16 }
  0x1d   : > { %v510_v60 = vsel %vm493_vm4, %v501_v55, %v509_v41  ;;  %4451 = vmatmul.msk.bf16.vlgmr.msra.gmra.mxu2 %vm348_vm2, %v803_v57  ;;  %v1165_v61 = vor.u32 %v1164_v56, %v1161_v49  ;;  %v805_v10 = vrot.slane %v515_v0, 4  ;;  %v1179_v13 = vshll.u32 %v5054_v2, 16 }
  0x1e   : > { %4435 = vmatmul.msk.bf16.vlgmr.msra.gmra.mxu1 %vm348_vm2, %v510_v60  ;;  %3472 = vmatpush.bf16.msra.mxu2 %v5169_v5  ;;  %v514_v16 = vrot.slane %v512_v63, 2  ;;  %v517_v17 = vrot.slane %v515_v0, 3  ;;  %v319_v18 = vsel %vm314_vm1, %v316_v28, %v318_v6  ;;  %v1178_v19 = vrot.slane %v1176_v12, 3 }
  0x1f   : > { %3377 = vmatpush.bf16.msra.mxu1 %v5154_v1  ;;  %v1174_v3 = vsel %vm791_vm3, %v1165_v61, %v1173_v62  ;;  %v806_v5 = vor.u32 %v805_v10, %v804_v8  ;;  %v1181_v1 = vrot.slane %v1179_v13, 4  ;;  %v521_v25 = vshrl.u32 %v4780_v23, 16 }
  0x20   : > { %4467 = vmatmul.msk.bf16.vlgmr.msra.gmra.mxu3 %vm348_vm2, %v1174_v3  ;;  %v518_v20 = vor.u32 %v517_v17, %v514_v16  ;;  %v524_v26 = vshll.u32 %v4780_v23, 16  ;;  %v320_v28 = vrot.slane %v4780_v23, 3  ;;  %v1185_v31 = vshrl.u32 %v5056_v27, 16 }
  0x21   : > { %3553 = vmatpush.bf16.msra.mxu3 %v5177_v7  ;;  %v807_v21 = vsel %vm791_vm3, %v802_v46, %v806_v5  ;;  %v1182_v22 = vor.u32 %v1181_v1, %v1178_v19  ;;  %v808_v29 = vrot.slane %v521_v25, 3  ;;  %v1188_v32 = vshll.u32 %v5056_v27, 16 }
  0x22   : > { %v519_v24 = vsel %vm493_vm4, %v509_v41, %v518_v20  ;;  %v809_v30 = vrot.slane %v524_v26, 4  ;;  %v523_v33 = vrot.slane %v521_v25, 2  ;;  %v526_v34 = vrot.slane %v524_v26, 3 }
  0x23   : > { %v1183_v7 = vsel %vm791_vm3, %v1173_v62, %v1182_v22  ;;  %v321_v35 = vsel %vm314_vm1, %v318_v6, %v320_v28  ;;  %v1187_v37 = vrot.slane %v1185_v31, 3  ;;  %v1190_v38 = vrot.slane %v1188_v32, 4  ;;  %v4782_v62 = vld [vmem:[%s5203_s10 + $0x2c] sm:$0xff]  ;;  %v5060_v6 = vld [vmem:[%s5203_s10 + $0x34] sm:$0xff]  }
  0x24   : > { %v810_v36 = vor.u32 %v809_v30, %v808_v29  ;;  %v527_v39 = vor.u32 %v526_v34, %v523_v33  ;;  %v530_v45 = vshrl.u32 %v4781_v42, 16  ;;  %v533_v46 = vshll.u32 %v4781_v42, 16 }
  0x25   : > { %v1191_v41 = vor.u32 %v1190_v38, %v1187_v37  ;;  %v322_v48 = vrot.slane %v4781_v42, 3  ;;  %v1194_v51 = vshrl.u32 %v5058_v47, 16  ;;  %v1197_v52 = vshll.u32 %v5058_v47, 16 }
  0x26   : > { %v811_v40 = vsel %vm791_vm3, %v806_v5, %v810_v36  ;;  %v528_v43 = vsel %vm493_vm4, %v518_v20, %v527_v39  ;;  %v812_v49 = vrot.slane %v530_v45, 3  ;;  %v813_v50 = vrot.slane %v533_v46, 4 }
  0x27   : > { %v1192_v44 = vsel %vm791_vm3, %v1182_v22, %v1191_v41  ;;  %v532_v53 = vrot.slane %v530_v45, 2  ;;  %v535_v54 = vrot.slane %v533_v46, 3  ;;  %v323_v55 = vsel %vm314_vm1, %v320_v28, %v322_v48  ;;  %v5062_v28 = vld [vmem:[%s5203_s10 + $0x3c] sm:$0xff]  }
  0x28   : > { %v814_v56 = vor.u32 %v813_v50, %v812_v49  ;;  %v1196_v57 = vrot.slane %v1194_v51, 3  ;;  %v1199_v58 = vrot.slane %v1197_v52, 4  ;;  %v539_v2 = vshrl.u32 %v4782_v62, 16 }
  0x29   : > { %4420 = vmatmul.msk.bf16.gmra.mxu0 %vm348_vm2, %v319_v18  ;;  %v536_v59 = vor.u32 %v535_v54, %v532_v53  ;;  %v542_v3 = vshll.u32 %v4782_v62, 16  ;;  %v324_v8 = vrot.slane %v4782_v62, 3  ;;  %v1203_v13 = vshrl.u32 %v5060_v6, 16 }
  0x2a   : > { %v815_v60 = vsel %vm791_vm3, %v810_v36, %v814_v56  ;;  %v1200_v61 = vor.u32 %v1199_v58, %v1196_v57  ;;  %v816_v10 = vrot.slane %v539_v2, 3  ;;  %v1206_v16 = vshll.u32 %v5060_v6, 16 }
  0x2b   : > { %v537_v63 = vsel %vm493_vm4, %v527_v39, %v536_v59  ;;  %v817_v12 = vrot.slane %v542_v3, 4  ;;  %v541_v17 = vrot.slane %v539_v2, 2  ;;  %v544_v18 = vrot.slane %v542_v3, 3 }
  0x2c   : > { %v1201_v0 = vsel %vm791_vm3, %v1191_v41, %v1200_v61  ;;  %v325_v5 = vsel %vm314_vm1, %v322_v48, %v324_v8  ;;  %v1205_v1 = vrot.slane %v1203_v13, 3  ;;  %v1208_v20 = vrot.slane %v1206_v16, 4  ;;  %v5064_v48 = vld [vmem:[%s5203_s10 + $0x44] sm:$0xff]  }
  0x2d   : > { %4452 = vmatmul.msk.bf16.gmra.mxu2 %vm348_vm2, %v807_v21  ;;  %v818_v19 = vor.u32 %v817_v12, %v816_v10  ;;  %v545_v21 = vor.u32 %v544_v18, %v541_v17  ;;  %v1212_v32 = vshrl.u32 %v5062_v28, 16  ;;  %v1215_v33 = vshll.u32 %v5062_v28, 16 }
  0x2e   : > { %4436 = vmatmul.msk.bf16.gmra.mxu1 %vm348_vm2, %v519_v24  ;;  %v1209_v23 = vor.u32 %v1208_v20, %v1205_v1  ;;  %v4783_v24 = vld [vmem:[%s5203_s10 + $0x34] sm:$0xff]  ;;  %v1221_v52 = vshrl.u32 %v5064_v48, 16  ;;  %v1224_v53 = vshll.u32 %v5064_v48, 16  ;;  %vm1788_vm5 = vsmask.f32 7424 }
  0x2f   : > { %v819_v22 = vsel %vm791_vm3, %v814_v56, %v818_v19  ;;  %v548_v26 = vshrl.u32 %v4783_v24, 16  ;;  %v551_v27 = vshll.u32 %v4783_v24, 16  ;;  %v326_v29 = vrot.slane %v4783_v24, 3 }
  0x30   : > { %4468 = vmatmul.msk.bf16.gmra.mxu3 %vm348_vm2, %v1183_v7  ;;  %v546_v7 = vsel %vm493_vm4, %v536_v59, %v545_v21  ;;  %v1210_v25 = vsel %vm791_vm3, %v1200_v61, %v1209_v23  ;;  %v1214_v38 = vrot.slane %v1212_v32, 3  ;;  %v1217_v39 = vrot.slane %v1215_v33, 4 }
  0x31   : > { %v820_v30 = vrot.slane %v548_v26, 3  ;;  %v821_v31 = vrot.slane %v551_v27, 4  ;;  %v550_v34 = vrot.slane %v548_v26, 2  ;;  %v327_v36 = vsel %vm314_vm1, %v324_v8, %v326_v29  ;;  %v5066_v8 = vld [vmem:[%s5203_s10 + $0x4c] sm:$0xff]  }
  0x32   : > { %v1218_v42 = vor.u32 %v1217_v39, %v1214_v38  ;;  %v1223_v58 = vrot.slane %v1221_v52, 3  ;;  %v1226_v59 = vrot.slane %v1224_v53, 4  ;;  %v1230_v16 = vshrl.u32 %v5066_v8, 16  ;;  %v5070_v53 = vld [vmem:[%s5203_s10 + $0x5c] sm:$0xff]  }
  0x33   : > { %v822_v37 = vor.u32 %v821_v31, %v820_v30  ;;  %v1233_v17 = vshll.u32 %v5066_v8, 16  ;;  %vm2730_vm7 = vsmask.f32 6400 }
  0x34   : > { %v1219_v45 = vsel %vm791_vm3, %v1209_v23, %v1218_v42  ;;  %v1227_v62 = vor.u32 %v1226_v59, %v1223_v58  ;;  %v1232_v20 = vrot.slane %v1230_v16, 3  ;;  %v1248_v59 = vshrl.u32 %v5070_v53, 16 }
  0x35   : > { %v823_v41 = vsel %vm791_vm3, %v818_v19, %v822_v37 }
  0x36   : > { %v1228_v2 = vsel %vm791_vm3, %v1218_v42, %v1227_v62 }
  0x39   : > { %4421 = vmatmul.msk.bf16.gmra.mxu0 %vm348_vm2, %v321_v35  ;;  %v553_v35 = vrot.slane %v551_v27, 3 }
  0x3d   : > { %4453 = vmatmul.msk.bf16.gmra.mxu2 %vm348_vm2, %v811_v40  ;;  %v554_v40 = vor.u32 %v553_v35, %v550_v34 }
  0x3e   : > { %4437 = vmatmul.msk.bf16.gmra.mxu1 %vm348_vm2, %v528_v43  ;;  %v4784_v43 = vld [vmem:[%s5203_s10 + $0x3c] sm:$0xff] }
  0x3f   : > { %v557_v46 = vshrl.u32 %v4784_v43, 16  ;;  %v560_v47 = vshll.u32 %v4784_v43, 16  ;;  %v328_v49 = vrot.slane %v4784_v43, 3 }
  0x40   : > { %4469 = vmatmul.msk.bf16.gmra.mxu3 %vm348_vm2, %v1192_v44  ;;  %v555_v44 = vsel %vm493_vm4, %v545_v21, %v554_v40  ;;  %v1235_v21 = vrot.slane %v1233_v17, 4 }
  0x41   : > { %v824_v50 = vrot.slane %v557_v46, 3  ;;  %v825_v51 = vrot.slane %v560_v47, 4  ;;  %v559_v54 = vrot.slane %v557_v46, 2  ;;  %v329_v56 = vsel %vm314_vm1, %v326_v29, %v328_v49  ;;  %v5068_v29 = vld [vmem:[%s5203_s10 + $0x54] sm:$0xff]  }
  0x42   : > { %v1236_v24 = vor.u32 %v1235_v21, %v1232_v20  ;;  %v1239_v33 = vshrl.u32 %v5068_v29, 16  ;;  %v1242_v34 = vshll.u32 %v5068_v29, 16 }
  0x43   : > { %v826_v57 = vor.u32 %v825_v51, %v824_v50 }
  0x44   : > { %v1237_v26 = vsel %vm791_vm3, %v1227_v62, %v1236_v24 }
  0x45   : > { %v827_v61 = vsel %vm791_vm3, %v822_v37, %v826_v57 }
  0x49   : > { %4422 = vmatmul.msk.bf16.gmra.mxu0 %vm348_vm2, %v323_v55  ;;  %v562_v55 = vrot.slane %v560_v47, 3 }
  0x4d   : > { %4454 = vmatmul.msk.bf16.gmra.mxu2 %vm348_vm2, %v815_v60  ;;  %v563_v60 = vor.u32 %v562_v55, %v559_v54 }
  0x4e   : > { %4438 = vmatmul.msk.bf16.gmra.mxu1 %vm348_vm2, %v537_v63  ;;  %v4785_v63 = vld [vmem:[%s5203_s10 + $0x44] sm:$0xff] }
  0x4f   : > { %v566_v3 = vshrl.u32 %v4785_v63, 16  ;;  %v569_v6 = vshll.u32 %v4785_v63, 16  ;;  %v330_v10 = vrot.slane %v4785_v63, 3 }
  0x50   : > { %4470 = vmatmul.msk.bf16.gmra.mxu3 %vm348_vm2, %v1201_v0  ;;  %v564_v0 = vsel %vm493_vm4, %v554_v40, %v563_v60  ;;  %v1241_v40 = vrot.slane %v1239_v33, 3 }
  0x51   : > { %v828_v12 = vrot.slane %v566_v3, 3  ;;  %v829_v13 = vrot.slane %v569_v6, 4  ;;  %v568_v18 = vrot.slane %v566_v3, 2  ;;  %v331_v19 = vsel %vm314_vm1, %v328_v49, %v330_v10 }
  0x53   : > { %v830_v1 = vor.u32 %v829_v13, %v828_v12  ;;  %v1250_v12 = vrot.slane %v1248_v59, 3 }
  0x55   : > { %v831_v23 = vsel %vm791_vm3, %v826_v57, %v830_v1 }
  0x59   : > { %4423 = vmatmul.msk.bf16.gmra.mxu0 %vm348_vm2, %v325_v5  ;;  %v571_v5 = vrot.slane %v569_v6, 3 }
  0x5d   : > { %4455 = vmatmul.msk.bf16.gmra.mxu2 %vm348_vm2, %v819_v22  ;;  %v572_v22 = vor.u32 %v571_v5, %v568_v18 }
  0x5e   : > { %4439 = vmatmul.msk.bf16.gmra.mxu1 %vm348_vm2, %v546_v7  ;;  %v4786_v7 = vld [vmem:[%s5203_s10 + $0x4c] sm:$0xff] }
  0x5f   : > { %v575_v27 = vshrl.u32 %v4786_v7, 16  ;;  %v578_v28 = vshll.u32 %v4786_v7, 16  ;;  %v332_v30 = vrot.slane %v4786_v7, 3 }
  0x60   : > { %4471 = vmatmul.msk.bf16.gmra.mxu3 %vm348_vm2, %v1210_v25  ;;  %v573_v25 = vsel %vm493_vm4, %v563_v60, %v572_v22  ;;  %v1251_v60 = vshll.u32 %v5070_v53, 16 }
  0x61   : > { %v832_v31 = vrot.slane %v575_v27, 3  ;;  %v833_v32 = vrot.slane %v578_v28, 4  ;;  %v577_v35 = vrot.slane %v575_v27, 2  ;;  %v333_v38 = vsel %vm314_vm1, %v330_v10, %v332_v30 }
  0x62   : > { %v1253_v13 = vrot.slane %v1251_v60, 4 }
  0x63   : > { %v834_v39 = vor.u32 %v833_v32, %v832_v31 }
  0x65   : > { %v835_v43 = vsel %vm791_vm3, %v830_v1, %v834_v39  ;;  %v5330_v1 = vld [vmem:[%s5203_s10 + $0x5c] sm:$0xff] }
  0x66   : > { %v596_v27 = vshll.u32 %v5330_v1, 16  ;;  %v336_v31 = vrot.slane %v5330_v1, 3 }
  0x68   : > { %v841_v33 = vrot.slane %v596_v27, 4 }
  0x69   : > { %4424 = vmatmul.msk.bf16.gmra.mxu0 %vm348_vm2, %v327_v36  ;;  %v580_v36 = vrot.slane %v578_v28, 3  ;;  %v5072_v28 = vld [vmem:[%s5203_s10 + $0x64] sm:$0xff]  }
  0x6b   : > { %v581_v42 = vor.u32 %v580_v36, %v577_v35  ;;  %v1260_v35 = vshll.u32 %v5072_v28, 16 }
  0x6d   : > { %4456 = vmatmul.msk.bf16.gmra.mxu2 %vm348_vm2, %v823_v41  ;;  %v1244_v41 = vrot.slane %v1242_v34, 4  ;;  %v582_v47 = vsel %vm493_vm4, %v572_v22, %v581_v42  ;;  %v1257_v34 = vshrl.u32 %v5072_v28, 16 }
  0x6e   : > { %4440 = vmatmul.msk.bf16.gmra.mxu1 %vm348_vm2, %v555_v44 }
  0x6f   : > { %v1245_v44 = vor.u32 %v1244_v41, %v1241_v40 }
  0x70   : > { %4472 = vmatmul.msk.bf16.gmra.mxu3 %vm348_vm2, %v1219_v45  ;;  %v5313_v45 = vld [vmem:[%s5203_s10 + $0x54] sm:$0xff] }
  0x71   : > { %v1246_v50 = vsel %vm791_vm3, %v1236_v24, %v1245_v44  ;;  %v584_v51 = vshrl.u32 %v5313_v45, 16  ;;  %v587_v52 = vshll.u32 %v5313_v45, 16 }
  0x73   : > { %v836_v57 = vrot.slane %v584_v51, 3  ;;  %v837_v58 = vrot.slane %v587_v52, 4  ;;  %v586_v62 = vrot.slane %v584_v51, 2  ;;  %v589_v63 = vrot.slane %v587_v52, 3  ;;  %v5349_v52 = vld [vmem:[%s5203_s10 + $0x64] sm:$0xff] }
  0x74   : > { %v602_v60 = vshrl.u32 %v5349_v52, 16 }
  0x75   : > { %v838_v10 = vor.u32 %v837_v58, %v836_v57  ;;  %v590_v16 = vor.u32 %v589_v63, %v586_v62  ;;  %v5074_v62 = vld [vmem:[%s5203_s10 + $0x6c] sm:$0xff]  }
  0x77   : > { %v839_v5 = vsel %vm791_vm3, %v834_v39, %v838_v10  ;;  %v591_v21 = vsel %vm493_vm4, %v581_v42, %v590_v16 }
  0x79   : > { %4425 = vmatmul.msk.bf16.gmra.mxu0 %vm348_vm2, %v329_v56  ;;  %v334_v56 = vrot.slane %v5313_v45, 3  ;;  %v1259_v45 = vrot.slane %v1257_v34, 3 }
  0x7b   : > { %v335_v8 = vsel %vm314_vm1, %v332_v30, %v334_v56 }
  0x7d   : > { %4457 = vmatmul.msk.bf16.gmra.mxu2 %vm348_vm2, %v827_v61 }
  0x7e   : > { %4441 = vmatmul.msk.bf16.gmra.mxu1 %vm348_vm2, %v564_v0 }
  0x80   : > { %4473 = vmatmul.msk.bf16.gmra.mxu3 %vm348_vm2, %v1228_v2 }
  0x89   : > { %4426 = vmatmul.msk.bf16.gmra.mxu0 %vm348_vm2, %v331_v19  ;;  %v1254_v19 = vor.u32 %v1253_v13, %v1250_v12  ;;  %v1269_v12 = vshll.u32 %v5074_v62, 16 }
  0x8d   : > { %4458 = vmatmul.msk.bf16.gmra.mxu2 %vm348_vm2, %v831_v23 }
  0x8e   : > { %4442 = vmatmul.msk.bf16.gmra.mxu1 %vm348_vm2, %v573_v25  ;;  %v1255_v25 = vsel %vm791_vm3, %v1245_v44, %v1254_v19 }
  0x90   : > { %4474 = vmatmul.msk.bf16.gmra.mxu3 %vm348_vm2, %v1237_v26  ;;  %v593_v26 = vshrl.u32 %v5330_v1, 16 }
  0x92   : > { %v840_v32 = vrot.slane %v593_v26, 3 }
  0x94   : > { %v842_v44 = vor.u32 %v841_v33, %v840_v32 }
  0x96   : > { %v410_v37 = vpop.f32.mrf.mxu0 }
  0x99   : > { %4427 = vmatmul.msk.bf16.gmra.mxu0 %vm348_vm2, %v333_v38  ;;  %v598_v38 = vrot.slane %v596_v27, 3 }
  0x9b   : > { %v706_v46 = vpop.f32.mrf.mxu1 }
  0x9c   : > { %v707_v48 = vadd.f32 %v706_v46, %v410_v37  ;;  %v595_v37 = vrot.slane %v593_v26, 2  ;;  %v1262_v46 = vrot.slane %v1260_v35, 4 }
  0x9d   : > { %4459 = vmatmul.msk.bf16.gmra.mxu2 %vm348_vm2, %v835_v43  ;;  %v337_v43 = vsel %vm314_vm1, %v334_v56, %v336_v31 }
  0x9e   : > { %4443 = vmatmul.msk.bf16.gmra.mxu1 %vm348_vm2, %v582_v47  ;;  %v412_v49 = vpop.f32.mrf.mxu0  ;;  %v599_v47 = vor.u32 %v598_v38, %v595_v37  ;;  %v1263_v51 = vor.u32 %v1262_v46, %v1259_v45 }
  0xa0   : > { %v929_v54 = vpop.f32.mrf.mxu2  ;;  %4475 = vmatmul.msk.bf16.gmra.mxu3 %vm348_vm2, %v1246_v50  ;;  %v843_v50 = vsel %vm791_vm3, %v838_v10, %v842_v44  ;;  %v1264_v59 = vsel %vm791_vm3, %v1254_v19, %v1263_v51  ;;  %v1266_v10 = vshrl.u32 %v5074_v62, 16 }
  0xa1   : > { %v1009_v55 = vadd.f32 %v929_v54, %v707_v48  ;;  %v600_v54 = vsel %vm493_vm4, %v590_v16, %v599_v47  ;;  %v604_v16 = vrot.slane %v602_v60, 2 }
  0xa3   : > { %v708_v61 = vpop.f32.mrf.mxu1  ;;  %v1370_v2 = vpop.f32.mrf.mxu3 }
  0xa4   : > { %v709_v0 = vadd.f32 %v708_v61, %v412_v49  ;;  %v5324_v3 = vadd.f32 %v1370_v2, %v1009_v55  ;;  %v605_v61 = vshll.u32 %v5349_v52, 16  ;;  %v338_v2 = vrot.slane %v5349_v52, 3 }
  0xa6   : > { %v415_v6 = vpop.f32.mrf.mxu0 }
  0xa8   : > { %v931_v17 = vpop.f32.mrf.mxu2 }
  0xa9   : > { %v1010_v18 = vadd.f32 %v931_v17, %v709_v0  ;;  %4428 = vmatmul.msk.bf16.gmra.mxu0 %vm348_vm2, %v335_v8  ;;  %v845_v8 = vrot.slane %v605_v61, 4  ;;  %v607_v17 = vrot.slane %v605_v61, 3 }
  0xab   : > { %v711_v20 = vpop.f32.mrf.mxu1  ;;  %v1372_v23 = vpop.f32.mrf.mxu3 }
  0xac   : > { %v712_v22 = vadd.f32 %v711_v20, %v415_v6  ;;  %v5333_v24 = vadd.f32 %v1372_v23, %v1010_v18  ;;  %v844_v6 = vrot.slane %v602_v60, 3  ;;  %v339_v20 = vsel %vm314_vm1, %v336_v31, %v338_v2 }
  0xad   : > { %4460 = vmatmul.msk.bf16.gmra.mxu2 %vm348_vm2, %v839_v5  ;;  %v1271_v23 = vrot.slane %v1269_v12, 4 }
  0xae   : > { %4444 = vmatmul.msk.bf16.gmra.mxu1 %vm348_vm2, %v591_v21  ;;  %v417_v7 = vpop.f32.mrf.mxu0  ;;  %v846_v21 = vor.u32 %v845_v8, %v844_v6  ;;  %v5387_v6 = vld [vmem:[%s5203_s10 + $0x74] sm:$0xff] }
  0xb0   : > { %v934_v29 = vpop.f32.mrf.mxu2  ;;  %4476 = vmatmul.msk.bf16.gmra.mxu3 %vm348_vm2, %v1255_v25  ;;  %v847_v27 = vsel %vm791_vm3, %v842_v44, %v846_v21 }
  0xb1   : > { %v1011_v30 = vadd.f32 %v934_v29, %v712_v22  ;;  %v1268_v22 = vrot.slane %v1266_v10, 3  ;;  %v5368_v29 = vld [vmem:[%s5203_s10 + $0x6c] sm:$0xff] }
  0xb2   : > { %v611_v37 = vshrl.u32 %v5368_v29, 16  ;;  %v614_v38 = vshll.u32 %v5368_v29, 16 }
  0xb3   : > { %v713_v36 = vpop.f32.mrf.mxu1  ;;  %v1375_v40 = vpop.f32.mrf.mxu3  ;;  %v1272_v28 = vor.u32 %v1271_v23, %v1268_v22  ;;  %v342_v22 = vrot.slane %v5387_v6, 3 }
  0xb4   : > { %v714_v39 = vadd.f32 %v713_v36, %v417_v7  ;;  %v5343_v41 = vadd.f32 %v1375_v40, %v1011_v30  ;;  %v608_v7 = vor.u32 %v607_v17, %v604_v16  ;;  %v848_v44 = vrot.slane %v611_v37, 3 }
  0xb5   : > { %v1273_v36 = vsel %vm791_vm3, %v1263_v51, %v1272_v28  ;;  %v849_v45 = vrot.slane %v614_v38, 4 }
  0xb6   : > { %v420_v42 = vpop.f32.mrf.mxu0  ;;  %v609_v32 = vsel %vm493_vm4, %v599_v47, %v608_v7 }
  0xb8   : > { %v936_v48 = vpop.f32.mrf.mxu2 }
  0xb9   : > { %v1012_v49 = vadd.f32 %v936_v48, %v714_v39  ;;  %4429 = vmatmul.msk.bf16.gmra.mxu0 %vm348_vm2, %v337_v43  ;;  %v5076_v39 = vld [vmem:[%s5203_s10 + $0x74] sm:$0xff]   ;;  %v340_v43 = vrot.slane %v5368_v29, 3 }
  0xba   : > { %v1275_v46 = vshrl.u32 %v5076_v39, 16  ;;  %v1278_v47 = vshll.u32 %v5076_v39, 16 }
  0xbb   : > { %v716_v53 = vpop.f32.mrf.mxu1  ;;  %v1377_v57 = vpop.f32.mrf.mxu3 }
  0xbc   : > { %v717_v55 = vadd.f32 %v716_v53, %v420_v42  ;;  %v5352_v56 = vadd.f32 %v1377_v57, %v1012_v49  ;;  %v613_v49 = vrot.slane %v611_v37, 2  ;;  %v850_v57 = vor.u32 %v849_v45, %v848_v44  ;;  %v5405_v44 = vld [vmem:[%s5203_s10 + $0x7c] sm:$0xff] }
  0xbd   : > { %4461 = vmatmul.msk.bf16.gmra.mxu2 %vm348_vm2, %v843_v50  ;;  %v616_v50 = vrot.slane %v614_v38, 3 }
  0xbe   : > { %4445 = vmatmul.msk.bf16.gmra.mxu1 %vm348_vm2, %v600_v54  ;;  %v422_v58 = vpop.f32.mrf.mxu0 }
  0xbf   : > { %v617_v60 = vor.u32 %v616_v50, %v613_v49 }
  0xc0   : > { %v939_v63 = vpop.f32.mrf.mxu2  ;;  %4477 = vmatmul.msk.bf16.gmra.mxu3 %vm348_vm2, %v1264_v59  ;;  %v1280_v59 = vrot.slane %v1278_v47, 4 }
  0xc1   : > { %v1013_v0 = vadd.f32 %v939_v63, %v717_v55  ;;  %v341_v55 = vsel %vm314_vm1, %v338_v2, %v340_v43  ;;  %v851_v63 = vsel %vm791_vm3, %v846_v21, %v850_v57  ;;  %v618_v10 = vsel %vm493_vm4, %v608_v7, %v617_v60 }
  0xc3   : > { %v718_v13 = vpop.f32.mrf.mxu1  ;;  %v1380_v5 = vpop.f32.mrf.mxu3 }
  0xc4   : > { %v719_v18 = vadd.f32 %v718_v13, %v422_v58  ;;  %v5362_v19 = vadd.f32 %v1380_v5, %v1013_v0  ;;  %v1277_v58 = vrot.slane %v1275_v46, 3  ;;  %v623_v5 = vshll.u32 %v5387_v6, 16 }
  0xc6   : > { %v425_v1 = vpop.f32.mrf.mxu0  ;;  %v1281_v0 = vor.u32 %v1280_v59, %v1277_v58  ;;  %v853_v7 = vrot.slane %v623_v5, 4 }
  0xc8   : > { %v941_v25 = vpop.f32.mrf.mxu2  ;;  %v1282_v17 = vsel %vm791_vm3, %v1272_v28, %v1281_v0 }
  0xc9   : > { %v1014_v26 = vadd.f32 %v941_v25, %v719_v18  ;;  %4430 = vmatmul.msk.bf16.gmra.mxu0 %vm348_vm2, %v339_v20  ;;  %v620_v18 = vshrl.u32 %v5387_v6, 16 }
  0xcb   : > { %v721_v30 = vpop.f32.mrf.mxu1  ;;  %v1382_v34 = vpop.f32.mrf.mxu3  ;;  %v852_v23 = vrot.slane %v620_v18, 3  ;;  %v622_v29 = vrot.slane %v620_v18, 2 }
  0xcc   : > { %v722_v33 = vadd.f32 %v721_v30, %v425_v1  ;;  %v5371_v31 = vadd.f32 %v1382_v34, %v1014_v26  ;;  %v5078_v1 = vld [vmem:[%s5203_s10 + $0x7c] sm:$0xff]   ;;  %v625_v30 = vrot.slane %v623_v5, 3 }
  0xcd   : > { %4462 = vmatmul.msk.bf16.gmra.mxu2 %vm348_vm2, %v847_v27  ;;  %v1284_v25 = vshrl.u32 %v5078_v1, 16  ;;  %v1287_v26 = vshll.u32 %v5078_v1, 16 }
  0xce   : > { %4446 = vmatmul.msk.bf16.gmra.mxu1 %vm348_vm2, %v609_v32  ;;  %v427_v35 = vpop.f32.mrf.mxu0  ;;  %v626_v39 = vor.u32 %v625_v30, %v622_v29 }
  0xcf   : > { %v1286_v37 = vrot.slane %v1284_v25, 3  ;;  %v1289_v38 = vrot.slane %v1287_v26, 4 }
  0xd0   : > { %v944_v40 = vpop.f32.mrf.mxu2  ;;  %4478 = vmatmul.msk.bf16.gmra.mxu3 %vm348_vm2, %v1273_v36  ;;  %v854_v36 = vor.u32 %v853_v7, %v852_v23 }
  0xd1   : > { %v1015_v42 = vadd.f32 %v944_v40, %v722_v33  ;;  %v1290_v46 = vor.u32 %v1289_v38, %v1286_v37 }
  0xd2   : > { %v855_v45 = vsel %vm791_vm3, %v850_v57, %v854_v36  ;;  %v5079_v57 = vld [vmem:[%s5203_s10 + $0x84] sm:$0xff]  }
  0xd3   : > { %v723_v48 = vpop.f32.mrf.mxu1  ;;  %v1385_v52 = vpop.f32.mrf.mxu3  ;;  %v1296_v6 = vshll.u32 %v5079_v57, 16 }
  0xd4   : > { %v724_v51 = vadd.f32 %v723_v48, %v427_v35  ;;  %v5381_v53 = vadd.f32 %v1385_v52, %v1015_v42  ;;  %v343_v35 = vsel %vm314_vm1, %v340_v43, %v342_v22  ;;  %v627_v48 = vsel %vm493_vm4, %v617_v60, %v626_v39 }
  0xd5   : > { %v632_v52 = vshll.u32 %v5405_v44, 16  ;;  %v1298_v23 = vrot.slane %v1296_v6, 4 }
  0xd6   : > { %v430_v54 = vpop.f32.mrf.mxu0 }
  0xd8   : > { %v946_v61 = vpop.f32.mrf.mxu2 }
  0xd9   : > { %v1016_v62 = vadd.f32 %v946_v61, %v724_v51  ;;  %4431 = vmatmul.msk.bf16.gmra.mxu0 %vm348_vm2, %v341_v55  ;;  %v629_v51 = vshrl.u32 %v5405_v44, 16  ;;  %v1291_v55 = vsel %vm791_vm3, %v1281_v0, %v1290_v46  ;;  %v857_v61 = vrot.slane %v632_v52, 4  ;;  %v227_v0 = vld [vmem:[%s5203_s10 + $0x84] sm:$0x7] }
  0xda   : > { %v296_v26 = vunpack.c.l.b16 %v227_v0 }
  0xdb   : > { %v726_v8 = vpop.f32.mrf.mxu1  ;;  %v1387_v13 = vpop.f32.mrf.mxu3  ;;  %v856_v60 = vrot.slane %v629_v51, 3 }
  0xdc   : > { %v727_v12 = vadd.f32 %v726_v8, %v430_v54  ;;  %v5390_v2 = vadd.f32 %v1387_v13, %v1016_v62  ;;  %v344_v62 = vrot.slane %v5405_v44, 3  ;;  %v786_v13 = vld [vmem:[%s5203_s10 + $0x84] sm:$0xf] }
  0xdd   : > { %4463 = vmatmul.msk.bf16.gmra.mxu2 %vm348_vm2, %v851_v63  ;;  %v1293_v63 = vshrl.u32 %v5079_v57, 16  ;;  %v858_v5 = vor.u32 %v857_v61, %v856_v60  ;;  %v789_v7 = vunpack.c.l.b16 %v786_v13 }
  0xde   : > { %4447 = vmatmul.msk.bf16.gmra.mxu1 %vm348_vm2, %v618_v10  ;;  %v432_v16 = vpop.f32.mrf.mxu0  ;;  %v631_v10 = vrot.slane %v629_v51, 2 }
  0xe0   : > { %v949_v20 = vpop.f32.mrf.mxu2  ;;  %4479 = vmatmul.msk.bf16.gmra.mxu3 %vm348_vm2, %v1282_v17 }
  0xe1   : > { %v1017_v21 = vadd.f32 %v949_v20, %v727_v12  ;;  %v634_v12 = vrot.slane %v632_v52, 3  ;;  %v345_v20 = vsel %vm314_vm1, %v342_v22, %v344_v62 }
  0xe3   : > { %v728_v27 = vpop.f32.mrf.mxu1  ;;  %v1390_v32 = vpop.f32.mrf.mxu3  ;;  %v635_v25 = vor.u32 %v634_v12, %v631_v10 }
  0xe4   : > { %v729_v28 = vadd.f32 %v728_v27, %v432_v16  ;;  %v5400_v33 = vadd.f32 %v1390_v32, %v1017_v21  ;;  %v1295_v21 = vrot.slane %v1293_v63, 3  ;;  %v4938_v27 = vld [vmem:[%s5203_s10 + $0x88] sm:$0xff]   ;;  %v2726_v32 = vld [vmem:[%s6507_s1 + $0x20] sm:$0xf] }
  0xe5   : > { %v4898_v37 = vunpack.c.h.b16 %v4938_v27  ;;  %v5431_v22 = vsel %vm397_vm0, %v2726_v32, 0 }
  0xe6   : > { %v435_v34 = vpop.f32.mrf.mxu0  ;;  %2866 = vmatpush.bf16.msra.mxu0 %v5431_v22 }
  0xe7   : > { %v1157_v51 = vpack.c.b16 %v4898_v37, %v4898_v37 }
  0xe8   : > { %v951_v40 = vpop.f32.mrf.mxu2 }
  0xe9   : > { %v1018_v42 = vadd.f32 %v951_v40, %v729_v28  ;;  %4432 = vmatmul.msk.bf16.gmra.mxu0 %vm348_vm2, %v343_v35  ;;  %v859_v28 = vsel %vm791_vm3, %v854_v36, %v858_v5  ;;  %v790_v35 = vpack.c.b16 %v789_v7, %v789_v7  ;;  %v636_v40 = vsel %vm493_vm4, %v626_v39, %v635_v25 }
  0xea   : > { %v1302_v60 = vshrl.u32 %v1157_v51, 16  ;;  %v1305_v61 = vshll.u32 %v1157_v51, 16 }
  0xeb   : > { %v731_v47 = vpop.f32.mrf.mxu1  ;;  %v1392_v50 = vpop.f32.mrf.mxu3 }
  0xec   : > { %v732_v49 = vadd.f32 %v731_v47, %v435_v34  ;;  %v5409_v43 = vadd.f32 %v1392_v50, %v1018_v42  ;;  %v1299_v34 = vor.u32 %v1298_v23, %v1295_v21  ;;  %v313_v42 = vpack.c.b16 %v296_v26, %v296_v26 }
  0xed   : > { %4464 = vmatmul.msk.bf16.gmra.mxu2 %vm348_vm2, %v855_v45  ;;  %v864_v50 = vshll.u32 %v790_v35, 16  ;;  %v1304_v0 = vrot.slane %v1302_v60, 3  ;;  %v4923_v60 = vld [vmem:[%s5203_s10 + $0x10] sm:$0xff]  }
  0xee   : > { %4448 = vmatmul.msk.bf16.gmra.mxu1 %vm348_vm2, %v627_v48  ;;  %v437_v54 = vpop.f32.mrf.mxu0  ;;  %v1300_v48 = vsel %vm791_vm3, %v1290_v46, %v1299_v34  ;;  %v638_v52 = vshrl.u32 %v313_v42, 16  ;;  %v346_v57 = vrot.slane %v313_v42, 3 }
  0xf0   : > { %v954_v58 = vpop.f32.mrf.mxu2  ;;  %4480 = vmatmul.msk.bf16.gmra.mxu3 %vm348_vm2, %v1291_v55  ;;  %v640_v6 = vrot.slane %v638_v52, 2 }
  0xf1   : > { %v1019_v59 = vadd.f32 %v954_v58, %v732_v49  ;;  %v861_v49 = vshrl.u32 %v790_v35, 16 }
  0xf3   : > { %v733_v8 = vpop.f32.mrf.mxu1  ;;  %v1395_v17 = vpop.f32.mrf.mxu3  ;;  %v863_v58 = vrot.slane %v861_v49, 3 }
  0xf4   : > { %v734_v16 = vadd.f32 %v733_v8, %v437_v54  ;;  %v5421_v18 = vadd.f32 %v1395_v17, %v1019_v59  ;;  %v641_v54 = vshll.u32 %v313_v42, 16  ;;  %v866_v59 = vrot.slane %v864_v50, 4 }
  0xf6   : > { %v440_v1 = vpop.f32.mrf.mxu0  ;;  %v643_v8 = vrot.slane %v641_v54, 3  ;;  %v867_v17 = vor.u32 %v866_v59, %v863_v58  ;;  %v4940_v54 = vld [vmem:[%s5203_s10 + $0x18] sm:$0xf0] }
  0xf8   : > { %v956_v29 = vpop.f32.mrf.mxu2  ;;  %v868_v7 = vsel %vm791_vm3, %v858_v5, %v867_v17  ;;  %v5457_v5 = vld [vmem:[%s5203_s10 + $0x20] sm:$0xff] }
  0xf9   : > { %v1020_v30 = vadd.f32 %v956_v29, %v734_v16  ;;  %4433 = vmatmul.msk.bf16.gmra.mxu0 %vm348_vm2, %v345_v20  ;;  %v347_v16 = vsel %vm314_vm1, %v344_v62, %v346_v57  ;;  %v644_v20 = vor.u32 %v643_v8, %v640_v6  ;;  %v6525_v50 = vshll.u32 %v5457_v5, 16 }
  0xfb   : > { %v736_v38 = vpop.f32.mrf.mxu1  ;;  %v1397_v45 = vpop.f32.mrf.mxu3  ;;  %v645_v29 = vsel %vm493_vm4, %v635_v25, %v644_v20 }
  0xfc   : > { %v737_v44 = vadd.f32 %v736_v38, %v440_v1  ;;  %v5435_v47 = vadd.f32 %v1397_v45, %v1020_v30  ;;  %v1307_v1 = vrot.slane %v1305_v61, 4  ;;  %v4793_v30 = vld [vmem:[%s5203_s10 + $0x10] sm:$0xff] }
  0xfd   : > { %4465 = vmatmul.msk.bf16.gmra.mxu2 %vm348_vm2, %v859_v28  ;;  %v5449_v28 = vld [vmem:[%s5203_s10 + $0x18] sm:$0xff]   ;;  %v1792_v42 = vshll.u32 %v4793_v30, 16 }
  0xfe   : > { %4449 = vmatmul.msk.bf16.gmra.mxu1 %vm348_vm2, %v636_v40  ;;  %v442_v36 = vpop.f32.mrf.mxu0  ;;  %v1308_v26 = vor.u32 %v1307_v1, %v1304_v0  ;;  %v2213_v25 = vshll.u32 %v5449_v28, 16  ;;  %v4794_v40 = vld [vmem:[%s5203_s10 + $0x18] sm:$0xff]  ;;  %v2521_v0 = vrot.slane %v5457_v5, 1 }
  0xff   : > { %v1797_v52 = vshll.u32 %v4794_v40, 16 }
 0x100   : > { %v959_v39 = vpop.f32.mrf.mxu2  ;;  %4481 = vmatmul.msk.bf16.gmra.mxu3 %vm348_vm2, %v1300_v48  ;;  %v1309_v38 = vsel %vm791_vm3, %v1299_v34, %v1308_v26  ;;  %v2211_v48 = vshrl.u32 %v5449_v28, 16  ;;  %v2215_v49 = vrot.slane %v2213_v25, 1  ;;  %v1794_v34 = vrot.slane %v1792_v42, 1 }
 0x101   : > { %v1021_v55 = vadd.f32 %v959_v39, %v737_v44  ;;  %v4941_v39 = vld [vmem:[%s5203_s10 + $0x18] sm:$0xe]  ;;  %v1801_v42 = vshrl.u32 %v4794_v40, 16 }
 0x102   : > { %v2216_v61 = vor.u32 %v2215_v49, %v2211_v48  ;;  %v5471_v6 = vor.u32 %v4941_v39, %v4940_v54 }
 0x103   : > { %v738_v63 = vpop.f32.mrf.mxu1  ;;  %v1400_v46 = vpop.f32.mrf.mxu3 }
 0x104   : > { %v739_v10 = vadd.f32 %v738_v63, %v442_v36  ;;  %v5441_v12 = vadd.f32 %v1400_v46, %v1021_v55  ;;  %v1790_v36 = vshrl.u32 %v4793_v30, 16  ;;  %v2220_v63 = vrot.slane %v6525_v50, 1  ;;  %v4795_v30 = vld [vmem:[%s5203_s10 + $0x20] sm:$0xff] }
 0x105   : > { %v2520_v17 = vrot.slane %v5471_v6, 1 }
 0x106   : > { %v445_v13 = vpop.f32.mrf.mxu0  ;;  %v1795_v8 = vor.u32 %v1794_v34, %v1790_v36 }
 0x108   : > { %v961_v21 = vpop.f32.mrf.mxu2 }
 0x109   : > { %v1022_v23 = vadd.f32 %v961_v21, %v739_v10  ;;  %4434 = vmatmul.msk.bf16.gmra.mxu0 %vm348_vm2, %v347_v16  ;;  %v1799_v10 = vrot.slane %v1797_v52, 1  ;;  %v2221_v16 = vsel %vm1788_vm5, %v2216_v61, %v2220_v63 }
 0x10b   : > { %v741_v27 = vpop.f32.mrf.mxu1  ;;  %v1402_v32 = vpop.f32.mrf.mxu3  ;;  %v1800_v20 = vsel %vm1788_vm5, %v1795_v8, %v1799_v10  ;;  %v4796_v8 = vld [vmem:[%s5203_s10 + $0x28] sm:$0xff] }
 0x10c   : > { %v742_v62 = vadd.f32 %v741_v27, %v445_v13  ;;  %v5451_v35 = vadd.f32 %v1402_v32, %v1022_v23  ;;  %v2522_v27 = vsel %vm2519_vm6, %v2520_v17, %v2521_v0 }
 0x10d   : > { %4466 = vmatmul.msk.bf16.gmra.mxu2 %vm348_vm2, %v868_v7 }
 0x10e   : > { %4450 = vmatmul.msk.bf16.gmra.mxu1 %vm348_vm2, %v645_v29  ;;  %v447_v37 = vpop.f32.mrf.mxu0  ;;  %v5484_v29 = vld [vmem:[%s5203_s10 + $0x28] sm:$0xff] }
 0x10f   : > { %v2523_v54 = vrot.slane %v5484_v29, 1 }
 0x110   : > { %v964_v44 = vpop.f32.mrf.mxu2  ;;  %4482 = vmatmul.msk.bf16.gmra.mxu3 %vm348_vm2, %v1309_v38  ;;  %v6520_v38 = vshll.u32 %v5484_v29, 16 }
 0x111   : > { %v1023_v45 = vadd.f32 %v964_v44, %v742_v62  ;;  %v1805_v44 = vshll.u32 %v4795_v30, 16 }
 0x112   : > { %v2228_v49 = vrot.slane %v6520_v38, 1 }
 0x113   : > { %v743_v51 = vpop.f32.mrf.mxu1  ;;  %v1405_v57 = vpop.f32.mrf.mxu3  ;;  %v1807_v34 = vrot.slane %v1805_v44, 1 }
 0x114   : > { %v744_v55 = vadd.f32 %v743_v51, %v447_v37  ;;  %v5466_v58 = vadd.f32 %v1405_v57, %v1023_v45  ;;  %v6522_v37 = vshrl.u32 %v5457_v5, 16  ;;  %v1803_v51 = vor.u32 %v1801_v42, %v1799_v10 }
 0x116   : > { %v450_v59 = vpop.f32.mrf.mxu0 }
 0x118   : > { %v966_v46 = vpop.f32.mrf.mxu2 }
 0x119   : > { %v1024_v13 = vadd.f32 %v966_v46, %v744_v55  ;;  %4483 = vmatmul.msk.bf16.vlgmr.msrb.gmra.mxu0 %vm348_vm2, %v4923_v60  ;;  %v1808_v55 = vsel %vm1788_vm5, %v1803_v51, %v1807_v34 }
 0x11b   : > { %v746_v1 = vpop.f32.mrf.mxu1  ;;  %v1407_v23 = vpop.f32.mrf.mxu3 }
 0x11c   : > { %v747_v21 = vadd.f32 %v746_v1, %v450_v59  ;;  %v5478_v7 = vadd.f32 %v1407_v23, %v1024_v13  ;;  %v6521_v13 = vshrl.u32 %v5484_v29, 16  ;;  %v1809_v1 = vshrl.u32 %v4795_v30, 16 }
 0x11d   : > { %4639 = vmatmul.msk.bf16.vlgmr.msrb.gmra.mxu2 %vm348_vm2, %v2221_v16 }
 0x11e   : > { %4563 = vmatmul.msk.bf16.vlgmr.msrb.gmra.mxu1 %vm348_vm2, %v1800_v20  ;;  %v452_v26 = vpop.f32.mrf.mxu0  ;;  %3751 = vmatpush.bf16.msrb.mxu2 %v5166_v4  ;;  %v1813_v20 = vshll.u32 %v4796_v8, 16 }
 0x11f   : > { %3689 = vmatpush.bf16.msrb.mxu1 %v5185_v9  ;;  %v2224_v9 = vor.u32 %v6522_v37, %v2220_v63  ;;  %v2524_v63 = vsel %vm2519_vm6, %v2521_v0, %v2523_v54  ;;  %v4925_v0 = vld [vmem:[%s5203_s10 + $0x20] sm:$0xff]  }
 0x120   : > { %v969_v62 = vpop.f32.mrf.mxu2  ;;  %4655 = vmatmul.msk.bf16.vlgmr.msrb.gmra.mxu3 %vm348_vm2, %v2522_v27  ;;  %v1815_v42 = vrot.slane %v1813_v20, 1 }
 0x121   : > { %v1025_v32 = vadd.f32 %v969_v62, %v747_v21  ;;  %3882 = vmatpush.bf16.msrb.mxu3 %v5210_v15  ;;  %v2229_v40 = vsel %vm1788_vm5, %v2224_v9, %v2228_v49  ;;  %v2232_v62 = vor.u32 %v6521_v13, %v2228_v49 }
 0x123   : > { %v748_v25 = vpop.f32.mrf.mxu1  ;;  %v1410_v36 = vpop.f32.mrf.mxu3 }
 0x124   : > { %v749_v45 = vadd.f32 %v748_v25, %v452_v26  ;;  %v5493_v48 = vadd.f32 %v1410_v36, %v1025_v32  ;;  %v1811_v25 = vor.u32 %v1809_v1, %v1807_v34 }
 0x126   : > { %v455_v4 = vpop.f32.mrf.mxu0  ;;  %v1816_v9 = vsel %vm1788_vm5, %v1811_v25, %v1815_v42 }
 0x128   : > { %v971_v52 = vpop.f32.mrf.mxu2 }
 0x129   : > { %v1026_v15 = vadd.f32 %v971_v52, %v749_v45  ;;  %4484 = vmatmul.msk.bf16.gmra.mxu0 %vm348_vm2, %v5449_v28  ;;  %v5510_v28 = vld [vmem:[%s5203_s10 + $0x30] sm:$0xff] }
 0x12a   : > { %v6516_v16 = vshll.u32 %v5510_v28, 16  ;;  %v2525_v36 = vrot.slane %v5510_v28, 1 }
 0x12b   : > { %v751_v39 = vpop.f32.mrf.mxu1  ;;  %v1412_v59 = vpop.f32.mrf.mxu3 }
 0x12c   : > { %v752_v57 = vadd.f32 %v751_v39, %v455_v4  ;;  %v5504_v60 = vadd.f32 %v1412_v59, %v1026_v15  ;;  %v2236_v32 = vrot.slane %v6516_v16, 1  ;;  %v2526_v15 = vsel %vm2519_vm6, %v2523_v54, %v2525_v36  ;;  %v4797_v39 = vld [vmem:[%s5203_s10 + $0x30] sm:$0xff]  ;;  %v4926_v54 = vld [vmem:[%s5203_s10 + $0x28] sm:$0xff]  }
 0x12d   : > { %4640 = vmatmul.msk.bf16.gmra.mxu2 %vm348_vm2, %v2229_v40  ;;  %v5533_v40 = vld [vmem:[%s5203_s10 + $0x38] sm:$0xff]  ;;  %v6517_v59 = vshrl.u32 %v5510_v28, 16 }
 0x12e   : > { %4564 = vmatmul.msk.bf16.gmra.mxu1 %vm348_vm2, %v1808_v55  ;;  %v457_v61 = vpop.f32.mrf.mxu0  ;;  %v2237_v30 = vsel %vm1788_vm5, %v2232_v62, %v2236_v32 }
 0x130   : > { %v974_v10 = vpop.f32.mrf.mxu2  ;;  %4656 = vmatmul.msk.bf16.gmra.mxu3 %vm348_vm2, %v2524_v63 }
 0x131   : > { %v1027_v46 = vadd.f32 %v974_v10, %v752_v57  ;;  %v1817_v10 = vshrl.u32 %v4796_v8, 16 }
 0x133   : > { %v753_v17 = vpop.f32.mrf.mxu1  ;;  %v1415_v23 = vpop.f32.mrf.mxu3 }
 0x134   : > { %v754_v21 = vadd.f32 %v753_v17, %v457_v61  ;;  %v5516_v26 = vadd.f32 %v1415_v23, %v1027_v46  ;;  %v6512_v61 = vshll.u32 %v5533_v40, 16  ;;  %v1821_v46 = vshll.u32 %v4797_v39, 16 }
 0x135   : > { %v2240_v23 = vor.u32 %v6517_v59, %v2236_v32 }
 0x136   : > { %v460_v27 = vpop.f32.mrf.mxu0  ;;  %v1823_v62 = vrot.slane %v1821_v46, 1 }
 0x138   : > { %v976_v44 = vpop.f32.mrf.mxu2 }
 0x139   : > { %v1028_v45 = vadd.f32 %v976_v44, %v754_v21  ;;  %4485 = vmatmul.msk.bf16.gmra.mxu0 %vm348_vm2, %v4925_v0  ;;  %v1819_v0 = vor.u32 %v1817_v10, %v1815_v42 }
 0x13b   : > { %v756_v4 = vpop.f32.mrf.mxu1  ;;  %v1417_v49 = vpop.f32.mrf.mxu3 }
 0x13c   : > { %v757_v51 = vadd.f32 %v756_v4, %v460_v27  ;;  %v5527_v52 = vadd.f32 %v1417_v49, %v1028_v45  ;;  %v2244_v27 = vrot.slane %v6512_v61, 1  ;;  %v2527_v45 = vrot.slane %v5533_v40, 1 }
 0x13d   : > { %4641 = vmatmul.msk.bf16.gmra.mxu2 %vm348_vm2, %v2237_v30  ;;  %v1824_v4 = vsel %vm1788_vm5, %v1819_v0, %v1823_v62 }
 0x13e   : > { %4565 = vmatmul.msk.bf16.gmra.mxu1 %vm348_vm2, %v1816_v9  ;;  %v462_v34 = vpop.f32.mrf.mxu0  ;;  %v2245_v8 = vsel %vm1788_vm5, %v2240_v23, %v2244_v27  ;;  %v2528_v49 = vsel %vm2519_vm6, %v2525_v36, %v2527_v45  ;;  %v4927_v36 = vld [vmem:[%s5203_s10 + $0x30] sm:$0xff]  }
 0x140   : > { %v979_v55 = vpop.f32.mrf.mxu2  ;;  %4657 = vmatmul.msk.bf16.gmra.mxu3 %vm348_vm2, %v2526_v15  ;;  %v4798_v15 = vld [vmem:[%s5203_s10 + $0x38] sm:$0xff] }
 0x141   : > { %v1029_v57 = vadd.f32 %v979_v55, %v757_v51 }
 0x143   : > { %v758_v63 = vpop.f32.mrf.mxu1  ;;  %v1420_v1 = vpop.f32.mrf.mxu3 }
 0x144   : > { %v759_v17 = vadd.f32 %v758_v63, %v462_v34  ;;  %v5539_v20 = vadd.f32 %v1420_v1, %v1029_v57  ;;  %v5556_v34 = vld [vmem:[%s5203_s10 + $0x40] sm:$0xff]  ;;  %v6515_v63 = vshrl.u32 %v5533_v40, 16  ;;  %v1829_v1 = vshll.u32 %v4798_v15, 16 }
 0x145   : > { %v6511_v10 = vshll.u32 %v5556_v34, 16 }
 0x146   : > { %v465_v21 = vpop.f32.mrf.mxu0 }
 0x148   : > { %v981_v25 = vpop.f32.mrf.mxu2 }
 0x149   : > { %v1030_v44 = vadd.f32 %v981_v25, %v759_v17  ;;  %4486 = vmatmul.msk.bf16.gmra.mxu0 %vm348_vm2, %v4926_v54  ;;  %v1825_v17 = vshrl.u32 %v4797_v39, 16  ;;  %v2248_v25 = vor.u32 %v6515_v63, %v2244_v27 }
 0x14b   : > { %v761_v30 = vpop.f32.mrf.mxu1  ;;  %v1422_v32 = vpop.f32.mrf.mxu3 }
 0x14c   : > { %v762_v9 = vadd.f32 %v761_v30, %v465_v21  ;;  %v5550_v51 = vadd.f32 %v1422_v32, %v1030_v44  ;;  %v2252_v44 = vrot.slane %v6511_v10, 1  ;;  %v1831_v30 = vrot.slane %v1829_v1, 1  ;;  %v4799_v1 = vld [vmem:[%s5203_s10 + $0x40] sm:$0xff] }
 0x14d   : > { %4642 = vmatmul.msk.bf16.gmra.mxu2 %vm348_vm2, %v2245_v8  ;;  %v1827_v8 = vor.u32 %v1825_v17, %v1823_v62  ;;  %v2529_v32 = vrot.slane %v5556_v34, 1  ;;  %v5579_v17 = vld [vmem:[%s5203_s10 + $0x48] sm:$0xff] }
 0x14e   : > { %4566 = vmatmul.msk.bf16.gmra.mxu1 %vm348_vm2, %v1824_v4  ;;  %v467_v42 = vpop.f32.mrf.mxu0  ;;  %v2253_v39 = vsel %vm1788_vm5, %v2248_v25, %v2252_v44 }
 0x150   : > { %v984_v55 = vpop.f32.mrf.mxu2  ;;  %4658 = vmatmul.msk.bf16.gmra.mxu3 %vm348_vm2, %v2528_v49  ;;  %v1832_v49 = vsel %vm1788_vm5, %v1827_v8, %v1831_v30  ;;  %v1833_v8 = vshrl.u32 %v4798_v15, 16 }
 0x151   : > { %v1031_v57 = vadd.f32 %v984_v55, %v762_v9 }
 0x153   : > { %v763_v46 = vpop.f32.mrf.mxu1  ;;  %v1425_v54 = vpop.f32.mrf.mxu3 }
 0x154   : > { %v764_v21 = vadd.f32 %v763_v46, %v467_v42  ;;  %v5562_v23 = vadd.f32 %v1425_v54, %v1031_v57  ;;  %v2530_v46 = vsel %vm2519_vm6, %v2527_v45, %v2529_v32  ;;  %v4928_v45 = vld [vmem:[%s5203_s10 + $0x38] sm:$0xff]  }
 0x156   : > { %v470_v0 = vpop.f32.mrf.mxu0 }
 0x158   : > { %v986_v4 = vpop.f32.mrf.mxu2 }
 0x159   : > { %v1032_v9 = vadd.f32 %v986_v4, %v764_v21  ;;  %4487 = vmatmul.msk.bf16.gmra.mxu0 %vm348_vm2, %v4927_v36  ;;  %v6514_v36 = vshll.u32 %v5579_v17, 16  ;;  %v1837_v4 = vshll.u32 %v4799_v1, 16 }
 0x15b   : > { %v766_v42 = vpop.f32.mrf.mxu1  ;;  %v1427_v27 = vpop.f32.mrf.mxu3 }
 0x15c   : > { %v767_v55 = vadd.f32 %v766_v42, %v470_v0  ;;  %v5573_v57 = vadd.f32 %v1427_v27, %v1032_v9  ;;  %v6513_v0 = vshrl.u32 %v5556_v34, 16 }
 0x15d   : > { %4643 = vmatmul.msk.bf16.gmra.mxu2 %vm348_vm2, %v2253_v39 }
 0x15e   : > { %4567 = vmatmul.msk.bf16.gmra.mxu1 %vm348_vm2, %v1832_v49  ;;  %v472_v62 = vpop.f32.mrf.mxu0  ;;  %v2256_v27 = vor.u32 %v6513_v0, %v2252_v44 }
 0x160   : > { %v989_v21 = vpop.f32.mrf.mxu2  ;;  %4659 = vmatmul.msk.bf16.gmra.mxu3 %vm348_vm2, %v2530_v46  ;;  %v2260_v46 = vrot.slane %v6514_v36, 1 }
 0x161   : > { %v1033_v54 = vadd.f32 %v989_v21, %v767_v55  ;;  %v1835_v55 = vor.u32 %v1833_v8, %v1831_v30  ;;  %v1839_v21 = vrot.slane %v1837_v4, 1  ;;  %v5602_v8 = vld [vmem:[%s5203_s10 + $0x50] sm:$0xff]  ;;  %v4800_v4 = vld [vmem:[%s5203_s10 + $0x48] sm:$0xff] }
 0x162   : > { %v2261_v15 = vsel %vm1788_vm5, %v2256_v27, %v2260_v46 }
 0x163   : > { %v768_v25 = vpop.f32.mrf.mxu1  ;;  %v1430_v39 = vpop.f32.mrf.mxu3 }
 0x164   : > { %v769_v9 = vadd.f32 %v768_v25, %v472_v62  ;;  %v5585_v42 = vadd.f32 %v1430_v39, %v1033_v54  ;;  %v2531_v62 = vrot.slane %v5579_v17, 1  ;;  %v1840_v25 = vsel %vm1788_vm5, %v1835_v55, %v1839_v21 }
 0x165   : > { %v1841_v55 = vshrl.u32 %v4799_v1, 16 }
 0x166   : > { %v475_v49 = vpop.f32.mrf.mxu0 }
 0x168   : > { %v991_v10 = vpop.f32.mrf.mxu2 }
 0x169   : > { %v1034_v61 = vadd.f32 %v991_v10, %v769_v9  ;;  %4488 = vmatmul.msk.bf16.gmra.mxu0 %vm348_vm2, %v4928_v45  ;;  %v2532_v10 = vsel %vm2519_vm6, %v2529_v32, %v2531_v62  ;;  %v4929_v32 = vld [vmem:[%s5203_s10 + $0x40] sm:$0xff]  }
 0x16b   : > { %v771_v54 = vpop.f32.mrf.mxu1  ;;  %v1432_v44 = vpop.f32.mrf.mxu3 }
 0x16c   : > { %v772_v39 = vadd.f32 %v771_v54, %v475_v49  ;;  %v5596_v0 = vadd.f32 %v1432_v44, %v1034_v61  ;;  %v6518_v49 = vshrl.u32 %v5579_v17, 16  ;;  %v6519_v61 = vshll.u32 %v5602_v8, 16 }
 0x16d   : > { %4644 = vmatmul.msk.bf16.gmra.mxu2 %vm348_vm2, %v2261_v15  ;;  %v1845_v15 = vshll.u32 %v4800_v4, 16 }
 0x16e   : > { %4568 = vmatmul.msk.bf16.gmra.mxu1 %vm348_vm2, %v1840_v25  ;;  %v477_v30 = vpop.f32.mrf.mxu0  ;;  %v2264_v63 = vor.u32 %v6518_v49, %v2260_v46 }
 0x170   : > { %v994_v9 = vpop.f32.mrf.mxu2  ;;  %4660 = vmatmul.msk.bf16.gmra.mxu3 %vm348_vm2, %v2532_v10  ;;  %v2268_v10 = vrot.slane %v6519_v61, 1 }
 0x171   : > { %v1035_v45 = vadd.f32 %v994_v9, %v772_v39  ;;  %v1843_v39 = vor.u32 %v1841_v55, %v1839_v21  ;;  %v1847_v9 = vrot.slane %v1845_v15, 1  ;;  %v5625_v55 = vld [vmem:[%s5203_s10 + $0x58] sm:$0xff] }
 0x172   : > { %v2269_v1 = vsel %vm1788_vm5, %v2264_v63, %v2268_v10  ;;  %v4801_v63 = vld [vmem:[%s5203_s10 + $0x50] sm:$0xff] }
 0x173   : > { %v773_v27 = vpop.f32.mrf.mxu1  ;;  %v1435_v25 = vpop.f32.mrf.mxu3 }
 0x174   : > { %v774_v54 = vadd.f32 %v773_v27, %v477_v30  ;;  %v5608_v44 = vadd.f32 %v1435_v25, %v1035_v45  ;;  %v2533_v30 = vrot.slane %v5602_v8, 1  ;;  %v1848_v27 = vsel %vm1788_vm5, %v1843_v39, %v1847_v9 }
 0x175   : > { %v1849_v39 = vshrl.u32 %v4800_v4, 16 }
 0x176   : > { %v480_v36 = vpop.f32.mrf.mxu0 }
 0x178   : > { %v996_v16 = vpop.f32.mrf.mxu2 }
 0x179   : > { %v1036_v59 = vadd.f32 %v996_v16, %v774_v54  ;;  %4489 = vmatmul.msk.bf16.gmra.mxu0 %vm348_vm2, %v4929_v32  ;;  %v2534_v16 = vsel %vm2519_vm6, %v2531_v62, %v2533_v30  ;;  %v4930_v62 = vld [vmem:[%s5203_s10 + $0x48] sm:$0xff]  }
 0x17b   : > { %v776_v45 = vpop.f32.mrf.mxu1  ;;  %v1437_v46 = vpop.f32.mrf.mxu3 }
 0x17c   : > { %v777_v25 = vadd.f32 %v776_v45, %v480_v36  ;;  %v5619_v49 = vadd.f32 %v1437_v46, %v1036_v59  ;;  %v6523_v36 = vshrl.u32 %v5602_v8, 16  ;;  %v6524_v59 = vshll.u32 %v5625_v55, 16 }
 0x17d   : > { %4645 = vmatmul.msk.bf16.gmra.mxu2 %vm348_vm2, %v2269_v1  ;;  %v1853_v1 = vshll.u32 %v4801_v63, 16 }
 0x17e   : > { %4569 = vmatmul.msk.bf16.gmra.mxu1 %vm348_vm2, %v1848_v27  ;;  %v482_v21 = vpop.f32.mrf.mxu0  ;;  %v2272_v38 = vor.u32 %v6523_v36, %v2268_v10 }
 0x180   : > { %v999_v15 = vpop.f32.mrf.mxu2  ;;  %4661 = vmatmul.msk.bf16.gmra.mxu3 %vm348_vm2, %v2534_v16  ;;  %v2276_v16 = vrot.slane %v6524_v59, 1 }
 0x181   : > { %v1037_v54 = vadd.f32 %v999_v15, %v777_v25  ;;  %v1851_v25 = vor.u32 %v1849_v39, %v1847_v9  ;;  %v1855_v15 = vrot.slane %v1853_v1, 1  ;;  %v5648_v39 = vld [vmem:[%s5203_s10 + $0x60] sm:$0xff] }
 0x182   : > { %v2277_v4 = vsel %vm1788_vm5, %v2272_v38, %v2276_v16  ;;  %v4802_v38 = vld [vmem:[%s5203_s10 + $0x58] sm:$0xff] }
 0x183   : > { %v778_v32 = vpop.f32.mrf.mxu1  ;;  %v1440_v27 = vpop.f32.mrf.mxu3 }
 0x184   : > { %v779_v45 = vadd.f32 %v778_v32, %v482_v21  ;;  %v5631_v46 = vadd.f32 %v1440_v27, %v1037_v54  ;;  %v2535_v21 = vrot.slane %v5625_v55, 1  ;;  %v1856_v32 = vsel %vm1788_vm5, %v1851_v25, %v1855_v15 }
 0x185   : > { %v1857_v25 = vshrl.u32 %v4801_v63, 16 }
 0x186   : > { %6542 = vst [vmem:[#allocation2_spill] sm:$0xff] %v5631_v46  ;;  %v485_v61 = vpop.f32.mrf.mxu0 }
 0x188   : > { %v1001_v13 = vpop.f32.mrf.mxu2 }
 0x189   : > { %v1038_v37 = vadd.f32 %v1001_v13, %v779_v45  ;;  %4490 = vmatmul.msk.bf16.gmra.mxu0 %vm348_vm2, %v4930_v62  ;;  %v2536_v13 = vsel %vm2519_vm6, %v2533_v30, %v2535_v21  ;;  %v4931_v30 = vld [vmem:[%s5203_s10 + $0x50] sm:$0xff]  }
 0x18b   : > { %v781_v54 = vpop.f32.mrf.mxu1  ;;  %v1442_v10 = vpop.f32.mrf.mxu3 }
 0x18c   : > { %v782_v27 = vadd.f32 %v781_v54, %v485_v61  ;;  %v5642_v36 = vadd.f32 %v1442_v10, %v1038_v37  ;;  %v6526_v61 = vshrl.u32 %v5625_v55, 16  ;;  %v6527_v37 = vshll.u32 %v5648_v39, 16 }
 0x18d   : > { %4646 = vmatmul.msk.bf16.gmra.mxu2 %vm348_vm2, %v2277_v4  ;;  %v1861_v4 = vshll.u32 %v4802_v38, 16 }
 0x18e   : > { %6543 = vst [vmem:[#allocation3_spill] sm:$0xff] %v5642_v36  ;;  %4570 = vmatmul.msk.bf16.gmra.mxu1 %vm348_vm2, %v1856_v32  ;;  %v487_v9 = vpop.f32.mrf.mxu0  ;;  %v2280_v50 = vor.u32 %v6526_v61, %v2276_v16 }
 0x18f   : > { %v1863_v36 = vrot.slane %v1861_v4, 1 }
 0x190   : > { %v1004_v1 = vpop.f32.mrf.mxu2  ;;  %4662 = vmatmul.msk.bf16.gmra.mxu3 %vm348_vm2, %v2536_v13  ;;  %v2284_v13 = vrot.slane %v6527_v37, 1 }
 0x191   : > { %v1039_v45 = vadd.f32 %v1004_v1, %v782_v27  ;;  %v1859_v1 = vor.u32 %v1857_v25, %v1855_v15  ;;  %v4803_v15 = vld [vmem:[%s5203_s10 + $0x60] sm:$0xff] }
 0x193   : > { %v783_v62 = vpop.f32.mrf.mxu1  ;;  %v1445_v32 = vpop.f32.mrf.mxu3  ;;  %v1864_v16 = vsel %vm1788_vm5, %v1859_v1, %v1863_v36  ;;  %v1865_v1 = vshrl.u32 %v4802_v38, 16 }
 0x194   : > { %v784_v54 = vadd.f32 %v783_v62, %v487_v9  ;;  %v5654_v10 = vadd.f32 %v1445_v32, %v1039_v45  ;;  %v2285_v9 = vsel %vm1788_vm5, %v2280_v50, %v2284_v13  ;;  %v2537_v45 = vrot.slane %v5648_v39, 1 }
 0x196   : > { %v1559_v59 = vpop.f32.mrf.mxu0 }
 0x197   : > { %v1639_v27 = vadd.f32 %v1559_v59, %v5324_v3  ;;  %v2538_v59 = vsel %vm2519_vm6, %v2535_v21, %v2537_v45 }
 0x198   : > { %v1006_v46 = vpop.f32.mrf.mxu2 }
 0x199   : > { %v1040_v63 = vadd.f32 %v1006_v46, %v784_v54  ;;  %4491 = vmatmul.msk.bf16.gmra.mxu0 %vm348_vm2, %v4931_v30  ;;  %v5672_v46 = vld [vmem:[%s5203_s10 + $0x68] sm:$0xff]  ;;  %v6528_v54 = vshrl.u32 %v5648_v39, 16 }
 0x19a   : > { %v6529_v30 = vshll.u32 %v5672_v46, 16 }
 0x19b   : > { %v1981_v62 = vpop.f32.mrf.mxu1  ;;  %v1447_v32 = vpop.f32.mrf.mxu3 }
 0x19c   : > { %v2061_v61 = vadd.f32 %v1981_v62, %v1639_v27  ;;  %v5666_v37 = vadd.f32 %v1447_v32, %v1040_v63  ;;  %v1869_v63 = vshll.u32 %v4803_v15, 16  ;;  %v4932_v32 = vld [vmem:[%s5203_s10 + $0x58] sm:$0xff]  }
 0x19d   : > { %4647 = vmatmul.msk.bf16.gmra.mxu2 %vm348_vm2, %v2285_v9 }
 0x19e   : > { %6544 = vst [vmem:[#allocation4_spill] sm:$0xff] %v5666_v37  ;;  %4571 = vmatmul.msk.bf16.gmra.mxu1 %vm348_vm2, %v1864_v16  ;;  %v1561_v3 = vpop.f32.mrf.mxu0 }
 0x19f   : > { %v1640_v50 = vadd.f32 %v1561_v3, %v5333_v24  ;;  %v2288_v24 = vor.u32 %v6528_v54, %v2284_v13  ;;  %v2292_v3 = vrot.slane %v6529_v30, 1 }
 0x1a0   : > { %v2402_v25 = vpop.f32.mrf.mxu2  ;;  %4663 = vmatmul.msk.bf16.gmra.mxu3 %vm348_vm2, %v2538_v59  ;;  %v1867_v59 = vor.u32 %v1865_v1, %v1863_v36 }
 0x1a1   : > { %v2482_v4 = vadd.f32 %v2402_v25, %v2061_v61  ;;  %v1871_v25 = vrot.slane %v1869_v63, 1  ;;  %v4804_v63 = vld [vmem:[%s5203_s10 + $0x68] sm:$0xff] }
 0x1a3   : > { %v1983_v27 = vpop.f32.mrf.mxu1  ;;  %v2613_v62 = vpop.f32.mrf.mxu3  ;;  %v1872_v13 = vsel %vm1788_vm5, %v1867_v59, %v1871_v25  ;;  %v1877_v59 = vshll.u32 %v4804_v63, 16 }
 0x1a4   : > { %v2062_v9 = vadd.f32 %v1983_v27, %v1640_v50  ;;  %v5679_v21 = vadd.f32 %v2613_v62, %v2482_v4  ;;  %v2293_v50 = vsel %vm1788_vm5, %v2288_v24, %v2292_v3  ;;  %v2539_v4 = vrot.slane %v5672_v46, 1 }
 0x1a6   : > { %v1564_v16 = vpop.f32.mrf.mxu0  ;;  %v2540_v36 = vsel %vm2519_vm6, %v2537_v45, %v2539_v4 }
 0x1a7   : > { %v1641_v61 = vadd.f32 %v1564_v16, %v5343_v41 }
 0x1a8   : > { %v2404_v37 = vpop.f32.mrf.mxu2 }
 0x1a9   : > { %v2483_v38 = vadd.f32 %v2404_v37, %v2062_v9  ;;  %4492 = vmatmul.msk.bf16.gmra.mxu0 %vm348_vm2, %v4932_v32  ;;  %v5697_v37 = vld [vmem:[%s5203_s10 + $0x70] sm:$0xff] }
 0x1aa   : > { %v6531_v32 = vshll.u32 %v5697_v37, 16 }
 0x1ab   : > { %v1986_v27 = vpop.f32.mrf.mxu1  ;;  %v2615_v54 = vpop.f32.mrf.mxu3 }
 0x1ac   : > { %v2063_v62 = vadd.f32 %v1986_v27, %v1641_v61  ;;  %v5691_v30 = vadd.f32 %v2615_v54, %v2483_v38  ;;  %v6530_v54 = vshrl.u32 %v5672_v46, 16  ;;  %v1873_v61 = vshrl.u32 %v4803_v15, 16 }
 0x1ad   : > { %4648 = vmatmul.msk.bf16.gmra.mxu2 %vm348_vm2, %v2293_v50 }
 0x1ae   : > { %6545 = vst [vmem:[#allocation5_spill] sm:$0xff] %v5691_v30  ;;  %4572 = vmatmul.msk.bf16.gmra.mxu1 %vm348_vm2, %v1872_v13  ;;  %v1566_v41 = vpop.f32.mrf.mxu0  ;;  %v4933_v13 = vld [vmem:[%s5203_s10 + $0x60] sm:$0xff]  }
 0x1af   : > { %v1642_v1 = vadd.f32 %v1566_v41, %v5352_v56  ;;  %v2296_v56 = vor.u32 %v6530_v54, %v2292_v3  ;;  %v2300_v41 = vrot.slane %v6531_v32, 1 }
 0x1b0   : > { %v2407_v9 = vpop.f32.mrf.mxu2  ;;  %4664 = vmatmul.msk.bf16.gmra.mxu3 %vm348_vm2, %v2540_v36  ;;  %v1875_v36 = vor.u32 %v1873_v61, %v1871_v25  ;;  %v5722_v25 = vld [vmem:[%s5203_s10 + $0x78] sm:$0xff] }
 0x1b1   : > { %v2484_v16 = vadd.f32 %v2407_v9, %v2063_v62  ;;  %v1879_v9 = vrot.slane %v1877_v59, 1  ;;  %v4805_v59 = vld [vmem:[%s5203_s10 + $0x70] sm:$0xff] }
 0x1b3   : > { %v1988_v24 = vpop.f32.mrf.mxu1  ;;  %v2618_v50 = vpop.f32.mrf.mxu3  ;;  %v1880_v3 = vsel %vm1788_vm5, %v1875_v36, %v1879_v9  ;;  %v1885_v36 = vshll.u32 %v4805_v59, 16 }
 0x1b4   : > { %v2064_v38 = vadd.f32 %v1988_v24, %v1642_v1  ;;  %v5704_v45 = vadd.f32 %v2618_v50, %v2484_v16  ;;  %v2301_v1 = vsel %vm1788_vm5, %v2296_v56, %v2300_v41  ;;  %v2541_v16 = vrot.slane %v5697_v37, 1 }
 0x1b6   : > { %v1569_v27 = vpop.f32.mrf.mxu0 }
 0x1b7   : > { %v1643_v62 = vadd.f32 %v1569_v27, %v5362_v19 }
 0x1b8   : > { %v2409_v30 = vpop.f32.mrf.mxu2 }
 0x1b9   : > { %v2485_v15 = vadd.f32 %v2409_v30, %v2064_v38  ;;  %4493 = vmatmul.msk.bf16.gmra.mxu0 %vm348_vm2, %v4933_v13  ;;  %v2542_v30 = vsel %vm2519_vm6, %v2539_v4, %v2541_v16  ;;  %v6533_v13 = vshll.u32 %v5722_v25, 16 }
 0x1bb   : > { %v1991_v24 = vpop.f32.mrf.mxu1  ;;  %v2620_v54 = vpop.f32.mrf.mxu3 }
 0x1bc   : > { %v2065_v50 = vadd.f32 %v1991_v24, %v1643_v62  ;;  %v5716_v32 = vadd.f32 %v2620_v54, %v2485_v15  ;;  %v6532_v54 = vshrl.u32 %v5697_v37, 16  ;;  %v1881_v62 = vshrl.u32 %v4804_v63, 16 }
 0x1bd   : > { %4649 = vmatmul.msk.bf16.gmra.mxu2 %vm348_vm2, %v2301_v1 }
 0x1be   : > { %6546 = vst [vmem:[#allocation6_spill] sm:$0xff] %v5716_v32  ;;  %4573 = vmatmul.msk.bf16.gmra.mxu1 %vm348_vm2, %v1880_v3  ;;  %v1571_v19 = vpop.f32.mrf.mxu0  ;;  %v4934_v3 = vld [vmem:[%s5203_s10 + $0x68] sm:$0xff]  }
 0x1bf   : > { %v1644_v61 = vadd.f32 %v1571_v19, %v5371_v31  ;;  %v2304_v31 = vor.u32 %v6532_v54, %v2300_v41  ;;  %v2308_v19 = vrot.slane %v6533_v13, 1 }
 0x1c0   : > { %v2412_v38 = vpop.f32.mrf.mxu2  ;;  %4665 = vmatmul.msk.bf16.gmra.mxu3 %vm348_vm2, %v2542_v30  ;;  %v1883_v30 = vor.u32 %v1881_v62, %v1879_v9  ;;  %v5747_v9 = vld [vmem:[%s5203_s10 + $0x80] sm:$0xff] }
 0x1c1   : > { %v2486_v27 = vadd.f32 %v2412_v38, %v2065_v50  ;;  %v1887_v38 = vrot.slane %v1885_v36, 1  ;;  %6548 = vst [vmem:[#allocation8_spill] sm:$0xff] %v5747_v9  ;;  %v4806_v36 = vld [vmem:[%s5203_s10 + $0x78] sm:$0xff] }
 0x1c3   : > { %v1993_v56 = vpop.f32.mrf.mxu1  ;;  %v2623_v1 = vpop.f32.mrf.mxu3  ;;  %v1888_v41 = vsel %vm1788_vm5, %v1883_v30, %v1887_v38  ;;  %v1893_v30 = vshll.u32 %v4806_v36, 16 }
 0x1c4   : > { %v2066_v15 = vadd.f32 %v1993_v56, %v1644_v61  ;;  %v5729_v4 = vadd.f32 %v2623_v1, %v2486_v27  ;;  %v2309_v61 = vsel %vm1788_vm5, %v2304_v31, %v2308_v19  ;;  %v2543_v27 = vrot.slane %v5722_v25, 1 }
 0x1c6   : > { %v1574_v24 = vpop.f32.mrf.mxu0 }
 0x1c7   : > { %v1645_v50 = vadd.f32 %v1574_v24, %v5381_v53 }
 0x1c8   : > { %v2414_v32 = vpop.f32.mrf.mxu2 }
 0x1c9   : > { %v2487_v63 = vadd.f32 %v2414_v32, %v2066_v15  ;;  %4494 = vmatmul.msk.bf16.gmra.mxu0 %vm348_vm2, %v4934_v3  ;;  %v2544_v32 = vsel %vm2519_vm6, %v2541_v16, %v2543_v27  ;;  %v6535_v3 = vshll.u32 %v5747_v9, 16 }
 0x1cb   : > { %v1996_v56 = vpop.f32.mrf.mxu1  ;;  %v2625_v54 = vpop.f32.mrf.mxu3 }
 0x1cc   : > { %v2067_v1 = vadd.f32 %v1996_v56, %v1645_v50  ;;  %v5741_v13 = vadd.f32 %v2625_v54, %v2487_v63  ;;  %v6534_v54 = vshrl.u32 %v5722_v25, 16  ;;  %v1889_v50 = vshrl.u32 %v4805_v59, 16 }
 0x1cd   : > { %4650 = vmatmul.msk.bf16.gmra.mxu2 %vm348_vm2, %v2309_v61 }
 0x1ce   : > { %6547 = vst [vmem:[#allocation7_spill] sm:$0xff] %v5741_v13  ;;  %4574 = vmatmul.msk.bf16.gmra.mxu1 %vm348_vm2, %v1888_v41  ;;  %v1576_v53 = vpop.f32.mrf.mxu0  ;;  %v4935_v41 = vld [vmem:[%s5203_s10 + $0x70] sm:$0xff]  }
 0x1cf   : > { %v1646_v62 = vadd.f32 %v1576_v53, %v5390_v2  ;;  %v2312_v2 = vor.u32 %v6534_v54, %v2308_v19  ;;  %v2316_v53 = vrot.slane %v6535_v3, 1 }
 0x1d0   : > { %v2417_v15 = vpop.f32.mrf.mxu2  ;;  %4666 = vmatmul.msk.bf16.gmra.mxu3 %vm348_vm2, %v2544_v32  ;;  %v1891_v32 = vor.u32 %v1889_v50, %v1887_v38  ;;  %v5772_v38 = vld [vmem:[%s5203_s10 + $0x88] sm:$0xff] }
 0x1d1   : > { %v2488_v24 = vadd.f32 %v2417_v15, %v2067_v1  ;;  %v1895_v15 = vrot.slane %v1893_v30, 1  ;;  %v4807_v30 = vld [vmem:[%s5203_s10 + $0x80] sm:$0xff] }
 0x1d3   : > { %v1998_v31 = vpop.f32.mrf.mxu1  ;;  %v2628_v61 = vpop.f32.mrf.mxu3  ;;  %v1896_v19 = vsel %vm1788_vm5, %v1891_v32, %v1895_v15  ;;  %v1901_v32 = vshll.u32 %v4807_v30, 16 }
 0x1d4   : > { %v2068_v63 = vadd.f32 %v1998_v31, %v1646_v62  ;;  %v5754_v16 = vadd.f32 %v2628_v61, %v2488_v24  ;;  %v2317_v62 = vsel %vm1788_vm5, %v2312_v2, %v2316_v53  ;;  %v2545_v24 = vrot.slane %v5747_v9, 1 }
 0x1d6   : > { %6549 = vst [vmem:[#allocation9_spill] sm:$0xff] %v5754_v16  ;;  %v1579_v56 = vpop.f32.mrf.mxu0 }
 0x1d7   : > { %v1647_v1 = vadd.f32 %v1579_v56, %v5400_v33 }
 0x1d8   : > { %v2419_v13 = vpop.f32.mrf.mxu2 }
 0x1d9   : > { %v2489_v59 = vadd.f32 %v2419_v13, %v2068_v63  ;;  %4495 = vmatmul.msk.bf16.gmra.mxu0 %vm348_vm2, %v4935_v41  ;;  %v2546_v13 = vsel %vm2519_vm6, %v2543_v27, %v2545_v24  ;;  %v6537_v41 = vshll.u32 %v5772_v38, 16 }
 0x1db   : > { %v2001_v31 = vpop.f32.mrf.mxu1  ;;  %v2630_v54 = vpop.f32.mrf.mxu3 }
 0x1dc   : > { %v2069_v61 = vadd.f32 %v2001_v31, %v1647_v1  ;;  %v5766_v3 = vadd.f32 %v2630_v54, %v2489_v59  ;;  %v6536_v54 = vshrl.u32 %v5747_v9, 16  ;;  %v1897_v1 = vshrl.u32 %v4806_v36, 16 }
 0x1dd   : > { %4651 = vmatmul.msk.bf16.gmra.mxu2 %vm348_vm2, %v2317_v62 }
 0x1de   : > { %6550 = vst [vmem:[#allocation10_spill] sm:$0xff] %v5766_v3  ;;  %4575 = vmatmul.msk.bf16.gmra.mxu1 %vm348_vm2, %v1896_v19  ;;  %v1581_v33 = vpop.f32.mrf.mxu0  ;;  %v4936_v19 = vld [vmem:[%s5203_s10 + $0x78] sm:$0xff]  }
 0x1df   : > { %v1648_v50 = vadd.f32 %v1581_v33, %v5409_v43  ;;  %v2320_v43 = vor.u32 %v6536_v54, %v2316_v53  ;;  %v2324_v33 = vrot.slane %v6537_v41, 1 }
 0x1e0   : > { %v2422_v63 = vpop.f32.mrf.mxu2  ;;  %4667 = vmatmul.msk.bf16.gmra.mxu3 %vm348_vm2, %v2546_v13  ;;  %v1899_v13 = vor.u32 %v1897_v1, %v1895_v15  ;;  %v5797_v15 = vld [vmem:[%s5203_s10 + $0x90] sm:$0xff] }
 0x1e1   : > { %v2490_v56 = vadd.f32 %v2422_v63, %v2069_v61  ;;  %v1903_v63 = vrot.slane %v1901_v32, 1  ;;  %v5801_v32 = vld [vmem:[%s5203_s10 + $0x88] sm:$0xff] }
 0x1e3   : > { %v2003_v2 = vpop.f32.mrf.mxu1  ;;  %v2633_v62 = vpop.f32.mrf.mxu3  ;;  %v1904_v53 = vsel %vm1788_vm5, %v1899_v13, %v1903_v63  ;;  %v6553_v13 = vshll.u32 %v5457_v5, 16 }
 0x1e4   : > { %v2070_v59 = vadd.f32 %v2003_v2, %v1648_v50  ;;  %v5779_v27 = vadd.f32 %v2633_v62, %v2490_v56  ;;  %v2325_v50 = vsel %vm1788_vm5, %v2320_v43, %v2324_v33  ;;  %v2547_v56 = vrot.slane %v5772_v38, 1 }
 0x1e6   : > { %6551 = vst [vmem:[#allocation11_spill] sm:$0xff] %v5779_v27  ;;  %v1584_v31 = vpop.f32.mrf.mxu0 }
 0x1e7   : > { %v1649_v61 = vadd.f32 %v1584_v31, %v5421_v18 }
 0x1e8   : > { %v2424_v3 = vpop.f32.mrf.mxu2 }
 0x1e9   : > { %v2491_v36 = vadd.f32 %v2424_v3, %v2070_v59  ;;  %4496 = vmatmul.msk.bf16.gmra.mxu0 %vm348_vm2, %v4936_v19  ;;  %v2548_v3 = vsel %vm2519_vm6, %v2545_v24, %v2547_v56  ;;  %v6540_v19 = vshll.u32 %v5797_v15, 16  ;;  %v1909_v24 = vshll.u32 %v5801_v32, 16 }
 0x1eb   : > { %v2006_v2 = vpop.f32.mrf.mxu1  ;;  %v2635_v54 = vpop.f32.mrf.mxu3  ;;  %v1911_v9 = vrot.slane %v1909_v24, 1 }
 0x1ec   : > { %v2071_v62 = vadd.f32 %v2006_v2, %v1649_v61  ;;  %v5791_v41 = vadd.f32 %v2635_v54, %v2491_v36  ;;  %v6541_v54 = vshrl.u32 %v5772_v38, 16  ;;  %v1905_v61 = vshrl.u32 %v4807_v30, 16 }
 0x1ed   : > { %4652 = vmatmul.msk.bf16.gmra.mxu2 %vm348_vm2, %v2325_v50  ;;  %v6554_v36 = vshrl.u32 %v5457_v5, 16  ;;  %v2332_v30 = vrot.slane %v6540_v19, 1  ;;  %v1703_v5 = vld [vmem:[%s5203_s10 + $0x90] sm:$0x1] }
 0x1ee   : > { %6552 = vst [vmem:[#allocation12_spill] sm:$0xff] %v5791_v41  ;;  %4576 = vmatmul.msk.bf16.gmra.mxu1 %vm348_vm2, %v1904_v53  ;;  %v1586_v18 = vpop.f32.mrf.mxu0  ;;  %v1907_v27 = vor.u32 %v1905_v61, %v1903_v63 }
 0x1ef   : > { %v1650_v1 = vadd.f32 %v1586_v18, %v5435_v47  ;;  %v2740_v47 = vrot.slane %v6553_v13, 2  ;;  %v2739_v50 = vrot.slane %v6554_v36, 1  ;;  %v2125_v13 = vld [vmem:[%s5203_s10 + $0x98] sm:$0x1] }
 0x1f0   : > { %v2427_v59 = vpop.f32.mrf.mxu2  ;;  %4668 = vmatmul.msk.bf16.gmra.mxu3 %vm348_vm2, %v2548_v3  ;;  %v4937_v3 = vld [vmem:[%s5203_s10 + $0x80] sm:$0xff]   ;;  %v1912_v19 = vsel %vm1788_vm5, %v1907_v27, %v1911_v9 }
 0x1f1   : > { %v2492_v31 = vadd.f32 %v2427_v59, %v2071_v62  ;;  %v2328_v59 = vor.u32 %v6541_v54, %v2324_v33  ;;  %v5821_v36 = vor.u32 %v2740_v47, %v2739_v50  ;;  %v2192_v33 = vunpack.c.l.b16 %v2125_v13 }
 0x1f2   : > { %v1770_v54 = vunpack.c.l.b16 %v1703_v5  ;;  %v1913_v13 = vshrl.u32 %v5801_v32, 16 }
 0x1f3   : > { %v2008_v43 = vpop.f32.mrf.mxu1  ;;  %v2638_v53 = vpop.f32.mrf.mxu3  ;;  %v2209_v47 = vpack.c.b16 %v2192_v33, %v2192_v33 }
 0x1f4   : > { %v2072_v2 = vadd.f32 %v2008_v43, %v1650_v1  ;;  %v5811_v18 = vadd.f32 %v2638_v53, %v2492_v31  ;;  %v2333_v31 = vsel %vm1788_vm5, %v2328_v59, %v2332_v30  ;;  %v2549_v43 = vrot.slane %v5797_v15, 1 }
 0x1f5   : > { %v1915_v32 = vor.u32 %v1913_v13, %v1911_v9  ;;  %v5116_v13 = vmov 0  }
 0x1f6   : > { %6555 = vst [vmem:[#allocation13_spill] sm:$0xff] %v5811_v18  ;;  %v1589_v62 = vpop.f32.mrf.mxu0  ;;  %v2550_v24 = vsel %vm2519_vm6, %v2547_v56, %v2549_v43  ;;  %v5101_v18 = vld [vmem:[%s5203_s10 + $0x88] sm:$0xff]   ;;  %5097 = vset.pattern.permute.xlu0 %v5116_v13  ;;  %5098 = vset.pattern.permute.xlu1 %v5116_v13 }
 0x1f7   : > { %v1651_v41 = vadd.f32 %v1589_v62, %v5441_v12  ;;  %v2334_v62 = vshrl.u32 %v5797_v15, 16  ;;  %5099 = vset.pattern.permute.xlu2 %v5116_v13 }
 0x1f8   : > { %v2429_v16 = vpop.f32.mrf.mxu2 }
 0x1f9   : > { %v2493_v1 = vadd.f32 %v2429_v16, %v2072_v2  ;;  %4497 = vmatmul.msk.bf16.gmra.mxu0 %vm348_vm2, %v4937_v3  ;;  %v1787_v2 = vpack.c.b16 %v1770_v54, %v1770_v54  ;;  %v2338_v3 = vshll.u32 %v2209_v47, 16 }
 0x1fb   : > { %v2011_v53 = vpop.f32.mrf.mxu1  ;;  %v2640_v63 = vpop.f32.mrf.mxu3  ;;  %v1917_v5 = vshll.u32 %v1787_v2, 16 }
 0x1fc   : > { %v2073_v12 = vadd.f32 %v2011_v53, %v1651_v41  ;;  %v5827_v61 = vadd.f32 %v2640_v63, %v2493_v1  ;;  %v3310_v1 = vld [vmem:[%s5203_s10 + $0x84] sm:$0xc]  ;;  %v2336_v53 = vor.u32 %v2334_v62, %v2332_v30 }
 0x1fd   : > { %4653 = vmatmul.msk.bf16.gmra.mxu2 %vm348_vm2, %v2333_v31  ;;  %v1919_v2 = vrot.slane %v1917_v5, 1  ;;  %v3048_v30 = vld [vmem:[%s6509_s3] sm:$0xff] }
 0x1fe   : > { %6556 = vst [vmem:[#allocation14_spill] sm:$0xff] %v5827_v61  ;;  %4577 = vmatmul.msk.bf16.gmra.mxu1 %vm348_vm2, %v1912_v19  ;;  %v1591_v16 = vpop.f32.mrf.mxu0  ;;  %v3311_v19 = vld [vmem:[%s5203_s10 + $0x88] sm:$0xf]  ;;  %v2551_v61 = vrot.slane %v2209_v47, 1  ;;  %3082 = vperm.xlu0 %5097, %v3048_v30  }
 0x1ff   : > { %v1652_v50 = vadd.f32 %v1591_v16, %v5451_v35  ;;  %v3320_v35 = vld [vmem:[%s5203_s10 + $0x84] sm:$0x8]  ;;  %v3332_v63 = vunpack.c.l.b16 %v3311_v19  ;;  %v3404_v16 = vunpack.c.l.b16 %v3310_v1  ;;  %v1920_v5 = vsel %vm1788_vm5, %v1915_v32, %v1919_v2 }
 0x200   : > { %v2432_v27 = vpop.f32.mrf.mxu2  ;;  %4669 = vmatmul.msk.bf16.gmra.mxu3 %vm348_vm2, %v2550_v24 }
 0x201   : > { %v2494_v41 = vadd.f32 %v2432_v27, %v2073_v12  ;;  %v2340_v12 = vrot.slane %v2338_v3, 1  ;;  %v3405_v9 = vpack.c.b16 %v3332_v63, %v3404_v16 }
 0x203   : > { %v2013_v59 = vpop.f32.mrf.mxu1  ;;  %v2643_v56 = vpop.f32.mrf.mxu3  ;;  %v2341_v3 = vsel %vm1788_vm5, %v2336_v53, %v2340_v12  ;;  %v3407_v12 = vshrl.u32 %v3405_v9, 16  ;;  %v3410_v16 = vshll.u32 %v3405_v9, 16 }
 0x204   : > { %v2074_v31 = vadd.f32 %v2013_v59, %v1652_v50  ;;  %v5838_v33 = vadd.f32 %v2643_v56, %v2494_v41  ;;  %v3331_v50 = vunpack.c.l.b16 %v3320_v35  ;;  %v2732_v41 = vshrl.u32 %v5471_v6, 16 }
 0x205   : > { %v2735_v56 = vshll.u32 %v5471_v6, 16 }
 0x206   : > { %v1594_v54 = vpop.f32.mrf.mxu0  ;;  %v3341_v6 = vpack.c.b16 %v3332_v63, %v3331_v50  ;;  %v2734_v35 = vrot.slane %v2732_v41, 1  ;;  %v3409_v41 = vrot.slane %v3407_v12, 2 }
 0x207   : > { %v1653_v24 = vadd.f32 %v1594_v54, %v5466_v58  ;;  %v5853_v58 = vld [vmem:[%s5203_s10 + $0x8c] sm:$0xff]  ;;  %v2737_v54 = vrot.slane %v2735_v56, 2  ;;  %v3412_v56 = vrot.slane %v3410_v16, 3 }
 0x208   : > { %v2434_v27 = vpop.f32.mrf.mxu2  ;;  %v3415_v32 = vshrl.u32 %v5853_v58, 16  ;;  %v3418_v2 = vshll.u32 %v5853_v58, 16 }
 0x209   : > { %v2495_v59 = vadd.f32 %v2434_v27, %v2074_v31  ;;  %4498 = vmatmul.msk.bf16.gmra.mxu0 %vm348_vm2, %v5101_v18  ;;  %v2552_v31 = vsel %vm2519_vm6, %v2549_v43, %v2551_v61  ;;  %v3503_v27 = vshrl.u32 %v3341_v6, 16  ;;  %v3506_v43 = vshll.u32 %v3341_v6, 16  ;;  %v3049_v61 = vld [vmem:[%s6509_s3 + $0x8] sm:$0xff] }
 0x20a   : > { %v3417_v30 = vrot.slane %v3415_v32, 2  ;;  %3087 = vperm.xlu0 %5097, %v3049_v61   ;;  %v3347_v61 = vrot.slane %v5853_v58, 3 }
 0x20b   : > { %v2016_v47 = vpop.f32.mrf.mxu1  ;;  %v2645_v19 = vpop.f32.mrf.mxu3 }
 0x20c   : > { %v2075_v18 = vadd.f32 %v2016_v47, %v1653_v24  ;;  %v5856_v1 = vadd.f32 %v2645_v19, %v2495_v59  ;;  %v2738_v59 = vor.u32 %v2737_v54, %v2734_v35  ;;  %v3505_v47 = vrot.slane %v3503_v27, 3 }
 0x20d   : > { %4654 = vmatmul.msk.bf16.gmra.mxu2 %vm348_vm2, %v2341_v3  ;;  %v3420_v3 = vrot.slane %v3418_v2, 3  ;;  %v3508_v19 = vrot.slane %v3506_v43, 4 }
 0x20e   : > { %4578 = vmatmul.msk.bf16.gmra.mxu1 %vm348_vm2, %v1920_v5  ;;  %v1596_v53 = vpop.f32.mrf.mxu0  ;;  %v2742_v54 = vsel %vm2730_vm7, %v2738_v59, %v5821_v36  ;;  %v5880_v59 = vld [vmem:[%s5203_s10 + $0x94] sm:$0xff] }
 0x20f   : > { %v1654_v24 = vadd.f32 %v1596_v53, %v5478_v7  ;;  %v3413_v53 = vor.u32 %v3412_v56, %v3409_v41  ;;  %v3421_v12 = vor.u32 %v3420_v3, %v3417_v30  ;;  %v3509_v27 = vor.u32 %v3508_v19, %v3505_v47 }
 0x210   : > { %v2437_v63 = vpop.f32.mrf.mxu2  ;;  %4670 = vmatmul.msk.bf16.gmra.mxu3 %vm348_vm2, %v2552_v31  ;;  %v3511_v31 = vrot.slane %v3418_v2, 4  ;;  %v6557_v3 = vshrl.u32 %v5484_v29, 16  ;;  %v3424_v19 = vshrl.u32 %v5880_v59, 16 }
 0x211   : > { %v2496_v50 = vadd.f32 %v2437_v63, %v2075_v18  ;;  %v3510_v18 = vrot.slane %v3415_v32, 3  ;;  %v3346_v63 = vrot.slane %v3341_v6, 3  ;;  %v3050_v32 = vld [vmem:[%s6509_s3 + $0x10] sm:$0xff]  ;;  %v3422_v2 = vsel %vm493_vm4, %v3413_v53, %v3421_v12  ;;  %v3051_v53 = vld [vmem:[%s6509_s3 + $0x18] sm:$0xff] }
 0x212   : > { %3092 = vperm.xlu1 %5098, %v3050_v32  }
 0x213   : > { %v2018_v9 = vpop.f32.mrf.mxu1  ;;  %v2648_v7 = vpop.f32.mrf.mxu3 }
 0x214   : > { %v2076_v13 = vadd.f32 %v2018_v9, %v1654_v24  ;;  %v5868_v5 = vadd.f32 %v2648_v7, %v2496_v50  ;;  %v3512_v50 = vor.u32 %v3511_v31, %v3510_v18  ;;  %v6558_v7 = vshll.u32 %v5484_v29, 16 }
 0x215   : > { %v3427_v18 = vshll.u32 %v5880_v59, 16 }
 0x216   : > { %v1599_v35 = vpop.f32.mrf.mxu0  ;;  %v3513_v56 = vsel %vm791_vm3, %v3509_v27, %v3512_v50  ;;  %v2744_v47 = vrot.slane %v6558_v7, 2 }
 0x217   : > { %v1655_v16 = vadd.f32 %v1599_v35, %v5493_v48  ;;  %v3348_v48 = vsel %vm314_vm1, %v3346_v63, %v3347_v61  ;;  %v3429_v63 = vrot.slane %v3427_v18, 3 }
 0x218   : > { %v2439_v24 = vpop.f32.mrf.mxu2 }
 0x219   : > { %v2497_v9 = vadd.f32 %v2439_v24, %v2076_v13  ;;  %4671 = vmatmul.msk.bf16.vlgmr.msra.gmra.mxu0 %vm348_vm2, %v2742_v54  ;;  %v2743_v13 = vrot.slane %v6557_v3, 1 }
 0x21a   : > { %3097 = vperm.xlu1 %5098, %v3051_v53  }
 0x21b   : > { %v2021_v43 = vpop.f32.mrf.mxu1  ;;  %v2650_v58 = vpop.f32.mrf.mxu3  ;;  %v2745_v29 = vor.u32 %v2744_v47, %v2743_v13 }
 0x21c   : > { %v2077_v6 = vadd.f32 %v2021_v43, %v1655_v16  ;;  %v5883_v41 = vadd.f32 %v2650_v58, %v2497_v9  ;;  %v3426_v16 = vrot.slane %v3424_v19, 2  ;;  %v3515_v43 = vrot.slane %v3427_v18, 4 }
 0x21d   : > { %4704 = vmatmul.msk.bf16.vlgmr.msra.gmra.mxu2 %vm348_vm2, %v3422_v2  ;;  %v2746_v27 = vsel %vm2730_vm7, %v5821_v36, %v2745_v29  ;;  %v3514_v2 = vrot.slane %v3424_v19, 3  ;;  %v6559_v19 = vshrl.u32 %v5510_v28, 16 }
 0x21e   : > { %4699 = vmatmul.msk.bf16.vlgmr.msra.gmra.mxu1 %vm348_vm2, %v3348_v48  ;;  %v1601_v30 = vpop.f32.mrf.mxu0  ;;  %4083 = vmatpush.bf16.msra.mxu2 %v5207_v14  ;;  %v3430_v32 = vor.u32 %v3429_v63, %v3426_v16 }
 0x21f   : > { %v1656_v31 = vadd.f32 %v1601_v30, %v5504_v60  ;;  %4013 = vmatpush.bf16.msra.mxu1 %v5192_v11  ;;  %v3516_v3 = vor.u32 %v3515_v43, %v3514_v2  ;;  %v2747_v18 = vrot.slane %v6559_v19, 1  ;;  %v5111_v2 = vld [vmem:[%s5203_s10 + $0xa4] sm:$0x70] }
 0x220   : > { %v2442_v35 = vpop.f32.mrf.mxu2  ;;  %4709 = vmatmul.msk.bf16.vlgmr.msra.gmra.mxu3 %vm348_vm2, %v3513_v56  ;;  %v3431_v30 = vsel %vm493_vm4, %v3421_v12, %v3430_v32 }
 0x221   : > { %v2498_v54 = vadd.f32 %v2442_v35, %v2077_v6  ;;  %4173 = vmatpush.bf16.msra.mxu3 %v5431_v22  ;;  %v3349_v6 = vrot.slane %v5880_v59, 3  ;;  %v5910_v22 = vld [vmem:[%s5203_s10 + $0x9c] sm:$0xff]  ;;  %v6560_v59 = vshll.u32 %v5510_v28, 16 }
 0x222   : > { %v3433_v12 = vshrl.u32 %v5910_v22, 16  ;;  %v3436_v35 = vshll.u32 %v5910_v22, 16 }
 0x223   : > { %v2023_v14 = vpop.f32.mrf.mxu1  ;;  %v2653_v60 = vpop.f32.mrf.mxu3  ;;  %v3350_v7 = vsel %vm314_vm1, %v3347_v61, %v3349_v6 }
 0x224   : > { %v2078_v24 = vadd.f32 %v2023_v14, %v1656_v31  ;;  %v5902_v9 = vadd.f32 %v2653_v60, %v2498_v54  ;;  %v2748_v31 = vrot.slane %v6560_v59, 2  ;;  %v3517_v54 = vsel %vm791_vm3, %v3512_v50, %v3516_v3 }
 0x225   : > { %v3435_v28 = vrot.slane %v3433_v12, 2 }
 0x226   : > { %v1604_v11 = vpop.f32.mrf.mxu0  ;;  %v2749_v14 = vor.u32 %v2748_v31, %v2747_v18  ;;  %v3054_v18 = vld [vmem:[%s6509_s3 + $0x30] sm:$0xff] }
 0x227   : > { %v1657_v48 = vadd.f32 %v1604_v11, %v5516_v26  ;;  %v3318_v11 = vld [vmem:[%s5203_s10 + $0xa4] sm:$0xff]   ;;  %3112 = vperm.xlu0 %5097, %v3054_v18  }
 0x228   : > { %v2444_v58 = vpop.f32.mrf.mxu2 }
 0x229   : > { %v2499_v56 = vadd.f32 %v2444_v58, %v2078_v24  ;;  %4672 = vmatmul.msk.bf16.gmra.mxu0 %vm348_vm2, %v2746_v27  ;;  %v3438_v24 = vrot.slane %v3436_v35, 3  ;;  %v5109_v27 = vld [vmem:[%s5203_s10 + $0xa4] sm:$0xf]  }
 0x22b   : > { %v2026_v13 = vpop.f32.mrf.mxu1  ;;  %v2655_v47 = vpop.f32.mrf.mxu3  ;;  %v3439_v50 = vor.u32 %v3438_v24, %v3435_v28 }
 0x22c   : > { %v2079_v36 = vadd.f32 %v2026_v13, %v1657_v48  ;;  %v5916_v26 = vadd.f32 %v2655_v47, %v2499_v56  ;;  %v2750_v56 = vsel %vm2730_vm7, %v2745_v29, %v2749_v14  ;;  %v3519_v13 = vrot.slane %v3436_v35, 4 }
 0x22d   : > { %4705 = vmatmul.msk.bf16.gmra.mxu2 %vm348_vm2, %v3431_v30  ;;  %v3440_v59 = vsel %vm493_vm4, %v3430_v32, %v3439_v50  ;;  %v5940_v29 = vor.u32 %v5111_v2, %v5109_v27 }
 0x22e   : > { %4700 = vmatmul.msk.bf16.gmra.mxu1 %vm348_vm2, %v3350_v7  ;;  %v1606_v61 = vpop.f32.mrf.mxu0 }
 0x22f   : > { %v1658_v53 = vadd.f32 %v1606_v61, %v5527_v52  ;;  %v3518_v52 = vrot.slane %v3433_v12, 3  ;;  %v3442_v24 = vshrl.u32 %v5940_v29, 16 }
 0x230   : > { %v2447_v16 = vpop.f32.mrf.mxu2  ;;  %4710 = vmatmul.msk.bf16.gmra.mxu3 %vm348_vm2, %v3517_v54  ;;  %v6561_v54 = vshrl.u32 %v5533_v40, 16 }
 0x231   : > { %v2500_v63 = vadd.f32 %v2447_v16, %v2079_v36  ;;  %v3351_v36 = vrot.slane %v5910_v22, 3  ;;  %v3520_v31 = vor.u32 %v3519_v13, %v3518_v52  ;;  %v6562_v16 = vshll.u32 %v5533_v40, 16  ;;  %v3052_v40 = vld [vmem:[%s6509_s3 + $0x20] sm:$0xff] }
 0x232   : > { %v3526_v52 = vshll.u32 %v3318_v11, 16  ;;  %3102 = vperm.xlu2 %5099, %v3052_v40   ;;  %v6564_v40 = vshll.u32 %v5556_v34, 16 }
 0x233   : > { %v2028_v60 = vpop.f32.mrf.mxu1  ;;  %v2658_v48 = vpop.f32.mrf.mxu3  ;;  %v3352_v35 = vsel %vm314_vm1, %v3349_v6, %v3351_v36  ;;  %v3521_v28 = vsel %vm791_vm3, %v3516_v3, %v3520_v31  ;;  %v3445_v6 = vshll.u32 %v5940_v29, 16  ;;  %v3444_v3 = vrot.slane %v3442_v24, 2 }
 0x234   : > { %v2080_v43 = vadd.f32 %v2028_v60, %v1658_v53  ;;  %v5930_v58 = vadd.f32 %v2658_v48, %v2500_v63  ;;  %v2751_v53 = vrot.slane %v6561_v54, 1  ;;  %v2752_v63 = vrot.slane %v6562_v16, 2  ;;  %v3055_v48 = vld [vmem:[%s6509_s3 + $0x38] sm:$0xff]  ;;  %v3058_v16 = vld [vmem:[%s6509_s3 + $0x50] sm:$0xff] }
 0x235   : > { %3117 = vperm.xlu1 %5098, %v3055_v48   ;;  %v2756_v48 = vrot.slane %v6564_v40, 2 }
 0x236   : > { %v1609_v30 = vpop.f32.mrf.mxu0 }
 0x237   : > { %v1659_v7 = vadd.f32 %v1609_v30, %v5539_v20  ;;  %v3523_v30 = vshrl.u32 %v3318_v11, 16  ;;  %v3053_v11 = vld [vmem:[%s6509_s3 + $0x28] sm:$0xff] }
 0x238   : > { %v2449_v47 = vpop.f32.mrf.mxu2 }
 0x239   : > { %v2501_v19 = vadd.f32 %v2449_v47, %v2080_v43  ;;  %4673 = vmatmul.msk.bf16.gmra.mxu0 %vm348_vm2, %v2750_v56  ;;  %v2753_v43 = vor.u32 %v2752_v63, %v2751_v53  ;;  %v3447_v56 = vrot.slane %v3445_v6, 3 }
 0x23a   : > { %3107 = vperm.xlu2 %5099, %v3053_v11   ;;  %v3063_v11 = vld [vmem:[%s6509_s3 + $0x78] sm:$0xff] }
 0x23b   : > { %v2031_v12 = vpop.f32.mrf.mxu1  ;;  %v2660_v61 = vpop.f32.mrf.mxu3  ;;  %v2754_v18 = vsel %vm2730_vm7, %v2749_v14, %v2753_v43  ;;  %v3057_v14 = vld [vmem:[%s6509_s3 + $0x48] sm:$0xff] }
 0x23c   : > { %v2081_v20 = vadd.f32 %v2031_v12, %v1659_v7  ;;  %v5943_v22 = vadd.f32 %v2660_v61, %v2501_v19  ;;  %v3525_v12 = vrot.slane %v3523_v30, 3  ;;  %v3353_v61 = vrot.slane %v5940_v29, 3  ;;  %3127 = vperm.xlu0 %5097, %v3057_v14   ;;  %v3061_v30 = vld [vmem:[%s6509_s3 + $0x68] sm:$0xff]  ;;  %v5083_v14 = vld [vmem:[%s5203_s10 + $0x94] sm:$0xff]  }
 0x23d   : > { %4706 = vmatmul.msk.bf16.gmra.mxu2 %vm348_vm2, %v3440_v59  ;;  %v3448_v59 = vor.u32 %v3447_v56, %v3444_v3  ;;  %3132 = vperm.xlu1 %5098, %v3058_v16  }
 0x23e   : > { %4701 = vmatmul.msk.bf16.gmra.mxu1 %vm348_vm2, %v3352_v35  ;;  %v1611_v32 = vpop.f32.mrf.mxu0  ;;  %v3528_v35 = vrot.slane %v3526_v52, 4 }
 0x23f   : > { %v1660_v60 = vadd.f32 %v1611_v32, %v5550_v51  ;;  %v3354_v32 = vsel %vm314_vm1, %v3351_v36, %v3353_v61 }
 0x240   : > { %v2452_v27 = vpop.f32.mrf.mxu2  ;;  %4711 = vmatmul.msk.bf16.gmra.mxu3 %vm348_vm2, %v3521_v28  ;;  %v3529_v63 = vor.u32 %v3528_v35, %v3525_v12  ;;  %v5032_v12 = vld [vmem:[%s5203_s10 + $0x8c] sm:$0x8]  ;;  %v5081_v35 = vld [vmem:[%s5203_s10 + $0x8c] sm:$0xf0]  }
 0x241   : > { %v2502_v2 = vadd.f32 %v2452_v27, %v2081_v20  ;;  %v5033_v16 = vor.u32 %v5081_v35, %v5032_v12 }
 0x242   : > { %v3530_v27 = vsel %vm791_vm3, %v3520_v31, %v3529_v63  ;;  %v3060_v31 = vld [vmem:[%s6509_s3 + $0x60] sm:$0xff] }
 0x243   : > { %v2033_v51 = vpop.f32.mrf.mxu1  ;;  %v2663_v7 = vpop.f32.mrf.mxu3 }
 0x244   : > { %v2082_v13 = vadd.f32 %v2033_v51, %v1660_v60  ;;  %v5962_v47 = vadd.f32 %v2663_v7, %v2502_v2  ;;  %3142 = vperm.xlu0 %5097, %v3060_v31   ;;  %v6033_v31 = vld [vmem:[%s5203_s10 + $0x98] sm:$0xff] }
 0x245   : > { %3147 = vperm.xlu1 %5098, %v3061_v30   ;;  %v3066_v30 = vld [vmem:[%s6509_s3 + $0x90] sm:$0xff] }
 0x246   : > { %v1614_v19 = vpop.f32.mrf.mxu0 }
 0x247   : > { %v1661_v20 = vadd.f32 %v1614_v19, %v5562_v23  ;;  %v3449_v23 = vsel %vm493_vm4, %v3439_v50, %v3448_v59  ;;  %v6563_v50 = vshrl.u32 %v5556_v34, 16 }
 0x248   : > { %v2454_v54 = vpop.f32.mrf.mxu2 }
 0x249   : > { %v2503_v53 = vadd.f32 %v2454_v54, %v2082_v13  ;;  %4674 = vmatmul.msk.bf16.gmra.mxu0 %vm348_vm2, %v2754_v18  ;;  %v2755_v2 = vrot.slane %v6563_v50, 1  ;;  %v3624_v50 = vshrl.u32 %v5033_v16, 16 }
 0x24b   : > { %v2036_v29 = vpop.f32.mrf.mxu1  ;;  %v2665_v24 = vpop.f32.mrf.mxu3  ;;  %v2757_v52 = vor.u32 %v2756_v48, %v2755_v2  ;;  %v4827_v2 = vld [vmem:[%s5203_s10 + $0x90] sm:$0xff]  ;;  %v3627_v48 = vshll.u32 %v5033_v16, 16  ;;  %v3829_v16 = vshll.u32 %v6033_v31, 16 }
 0x24c   : > { %v2083_v28 = vadd.f32 %v2036_v29, %v1661_v20  ;;  %v5979_v6 = vadd.f32 %v2665_v24, %v2503_v53  ;;  %v3064_v53 = vld [vmem:[%s6509_s3 + $0x80] sm:$0xff]  ;;  %3157 = vperm.xlu0 %5097, %v3063_v11  }
 0x24d   : > { %4707 = vmatmul.msk.bf16.gmra.mxu2 %vm348_vm2, %v3449_v23  ;;  %v2758_v19 = vsel %vm2730_vm7, %v2753_v43, %v2757_v52  ;;  %3162 = vperm.xlu1 %5098, %v3064_v53   ;;  %v3822_v53 = vshrl.u32 %v4827_v2, 16 }
 0x24e   : > { %4702 = vmatmul.msk.bf16.gmra.mxu1 %vm348_vm2, %v3354_v32  ;;  %v1616_v60 = vpop.f32.mrf.mxu0 }
 0x24f   : > { %v1662_v36 = vadd.f32 %v1616_v60, %v5573_v57  ;;  %v6566_v60 = vshll.u32 %v5579_v17, 16 }
 0x250   : > { %v2457_v3 = vpop.f32.mrf.mxu2  ;;  %4712 = vmatmul.msk.bf16.gmra.mxu3 %vm348_vm2, %v3530_v27 }
 0x251   : > { %v2504_v56 = vadd.f32 %v2457_v3, %v2083_v28  ;;  %v6565_v28 = vshrl.u32 %v5579_v17, 16  ;;  %v2760_v27 = vrot.slane %v6566_v60, 2  ;;  %v3635_v3 = vshll.u32 %v5083_v14, 16  ;;  %v3067_v17 = vld [vmem:[%s6509_s3 + $0x98] sm:$0xff] }
 0x253   : > { %v2038_v34 = vpop.f32.mrf.mxu1  ;;  %v2668_v57 = vpop.f32.mrf.mxu3  ;;  %v2759_v24 = vrot.slane %v6565_v28, 1  ;;  %v3070_v28 = vld [vmem:[%s6509_s3 + $0xb0] sm:$0xff] }
 0x254   : > { %v2084_v51 = vadd.f32 %v2038_v34, %v1662_v36  ;;  %v5996_v13 = vadd.f32 %v2668_v57, %v2504_v56  ;;  %v3632_v36 = vshrl.u32 %v5083_v14, 16  ;;  %v3824_v34 = vshll.u32 %v4827_v2, 16  ;;  %3172 = vperm.xlu0 %5097, %v3066_v30   ;;  %v5085_v2 = vld [vmem:[%s5203_s10 + $0x9c] sm:$0xff]  }
 0x255   : > { %3177 = vperm.xlu1 %5098, %v3067_v17   ;;  %v3629_v57 = vrot.slane %v3627_v48, 4  ;;  %v6568_v17 = vshll.u32 %v5602_v8, 16 }
 0x256   : > { %v1619_v7 = vpop.f32.mrf.mxu0  ;;  %v3826_v11 = vrot.slane %v3824_v34, 1 }
 0x257   : > { %v1663_v18 = vadd.f32 %v1619_v7, %v5585_v42  ;;  %v3634_v7 = vrot.slane %v3632_v36, 3  ;;  %v2764_v30 = vrot.slane %v6568_v17, 2 }
 0x258   : > { %v2459_v20 = vpop.f32.mrf.mxu2  ;;  %v3827_v60 = vor.u32 %v3826_v11, %v3822_v53 }
 0x259   : > { %v2505_v54 = vadd.f32 %v2459_v20, %v2084_v51  ;;  %4675 = vmatmul.msk.bf16.gmra.mxu0 %vm348_vm2, %v2758_v19  ;;  %v3626_v51 = vrot.slane %v3624_v50, 3  ;;  %v3637_v19 = vrot.slane %v3635_v3, 4 }
 0x25b   : > { %v2041_v43 = vpop.f32.mrf.mxu1  ;;  %v2670_v23 = vpop.f32.mrf.mxu3  ;;  %v3630_v14 = vor.u32 %v3629_v57, %v3626_v51  ;;  %v3644_v51 = vshll.u32 %v5085_v2, 16 }
 0x25c   : > { %v2085_v42 = vadd.f32 %v2041_v43, %v1663_v18  ;;  %v6010_v29 = vadd.f32 %v2670_v23, %v2505_v54 }
 0x25d   : > { %4708 = vmatmul.msk.bf16.gmra.mxu2 %vm348_vm2, %v3448_v59  ;;  %3192 = vperm.xlu1 %5098, %v3070_v28   ;;  %v3646_v53 = vrot.slane %v3644_v51, 4  ;;  %v6570_v51 = vshrl.u32 %v5625_v55, 16 }
 0x25e   : > { %4703 = vmatmul.msk.bf16.gmra.mxu1 %vm348_vm2, %v3353_v61  ;;  %v1621_v32 = vpop.f32.mrf.mxu0  ;;  %v3056_v61 = vld [vmem:[%s6509_s3 + $0x40] sm:$0xff] }
 0x25f   : > { %v1664_v40 = vadd.f32 %v1621_v32, %v5596_v0  ;;  %v6030_v0 = vor.u32 %v2760_v27, %v2759_v24  ;;  %3122 = vperm.xlu2 %5099, %v3056_v61   ;;  %v4943_v24 = vld [vmem:[%s5203_s10 + $0x90] sm:$0xff]   ;;  %v3831_v27 = vrot.slane %v3829_v16, 1 }
 0x260   : > { %v2462_v56 = vpop.f32.mrf.mxu2  ;;  %4713 = vmatmul.msk.bf16.gmra.mxu3 %vm348_vm2, %v3529_v63 }
 0x261   : > { %v2506_v59 = vadd.f32 %v2462_v56, %v2085_v42  ;;  %v2762_v54 = vsel %vm2730_vm7, %v2757_v52, %v6030_v0  ;;  %v3638_v42 = vor.u32 %v3637_v19, %v3634_v7  ;;  %v3069_v52 = vld [vmem:[%s6509_s3 + $0xa8] sm:$0xff]  ;;  %v3832_v56 = vsel %vm1788_vm5, %v3827_v60, %v3831_v27  ;;  %v3059_v19 = vld [vmem:[%s6509_s3 + $0x58] sm:$0xff] }
 0x262   : > { %3187 = vperm.xlu0 %5097, %v3069_v52   ;;  %v6569_v52 = vld [vmem:[#allocation2_spill] sm:$0xff] }
 0x263   : > { %v2043_v63 = vpop.f32.mrf.mxu1  ;;  %v2673_v12 = vpop.f32.mrf.mxu3 }
 0x264   : > { %v2086_v18 = vadd.f32 %v2043_v63, %v1664_v40  ;;  %v6035_v35 = vadd.f32 %v2673_v12, %v2506_v59  ;;  %v6567_v59 = vshrl.u32 %v5602_v8, 16  ;;  %v3641_v63 = vshrl.u32 %v5085_v2, 16  ;;  %v3072_v8 = vld [vmem:[%s6509_s3 + $0xc0] sm:$0xff]  ;;  %v3062_v2 = vld [vmem:[%s6509_s3 + $0x70] sm:$0xff] }
 0x266   : > { %v1624_v20 = vpop.f32.mrf.mxu0  ;;  %v2763_v61 = vrot.slane %v6567_v59, 1 }
 0x267   : > { %v1665_v43 = vadd.f32 %v1624_v20, %v5608_v44  ;;  %v3639_v44 = vsel %vm791_vm3, %v3630_v14, %v3638_v42  ;;  %3137 = vperm.xlu2 %5099, %v3059_v19   ;;  %v6572_v19 = vld [vmem:[#allocation3_spill] sm:$0xff] }
 0x268   : > { %v2464_v23 = vpop.f32.mrf.mxu2  ;;  %v6071_v12 = vor.u32 %v2764_v30, %v2763_v61  ;;  %v5086_v61 = vld [vmem:[%s5203_s10 + $0xa4] sm:$0xff]  }
 0x269   : > { %v2507_v32 = vadd.f32 %v2464_v23, %v2086_v18  ;;  %4676 = vmatmul.msk.bf16.gmra.mxu0 %vm348_vm2, %v2762_v54  ;;  %v3073_v18 = vld [vmem:[%s6509_s3 + $0xc8] sm:$0xff]  ;;  %v3643_v54 = vrot.slane %v3641_v63, 3 }
 0x26a   : > { %3207 = vperm.xlu1 %5098, %v3073_v18   ;;  %3202 = vperm.xlu0 %5097, %v3072_v8   ;;  %v2766_v23 = vsel %vm2730_vm7, %v6030_v0, %v6071_v12  ;;  %v3076_v0 = vld [vmem:[%s6509_s3 + $0xe0] sm:$0xff]  ;;  %v3650_v8 = vshrl.u32 %v5086_v61, 16 }
 0x26b   : > { %v2046_v50 = vpop.f32.mrf.mxu1  ;;  %v2675_v48 = vpop.f32.mrf.mxu3  ;;  %v6084_v60 = vor.u32 %v3646_v53, %v3643_v54 }
 0x26c   : > { %v2087_v40 = vadd.f32 %v2046_v50, %v1665_v43  ;;  %v6051_v36 = vadd.f32 %v2675_v48, %v2507_v32  ;;  %v3833_v32 = vshrl.u32 %v6033_v31, 16  ;;  %v3075_v31 = vld [vmem:[%s6509_s3 + $0xd8] sm:$0xff] }
 0x26d   : > { %4719 = vmatmul.msk.bf16.vlgmr.msrb.gmra.mxu2 %vm348_vm2, %v4943_v24  ;;  %v3648_v59 = vsel %vm791_vm3, %v3638_v42, %v6084_v60  ;;  %v6571_v42 = vshll.u32 %v5625_v55, 16  ;;  %v4227_v55 = vld [vmem:[%s6509_s3 + $0x108] sm:$0xff] }
 0x26e   : > { %4714 = vmatmul.msk.bf16.vlgmr.msrb.gmra.mxu1 %vm348_vm2, %v3639_v44  ;;  %v1626_v3 = vpop.f32.mrf.mxu0  ;;  %v3835_v48 = vor.u32 %v3833_v32, %v3831_v27 }
 0x26f   : > { %v1666_v34 = vadd.f32 %v1626_v3, %v5619_v49  ;;  %v6074_v49 = vld [vmem:[%s5203_s10 + $0xa0] sm:$0xff]  ;;  %3152 = vperm.xlu2 %5099, %v3062_v2   ;;  %v3597_v2 = vld [vmem:[%s5203_s10 + $0xb0] sm:$0xf] }
 0x270   : > { %v2467_v57 = vpop.f32.mrf.mxu2  ;;  %4744 = vmatmul.msk.bf16.vlgmr.msrb.gmra.mxu3 %vm348_vm2, %v3832_v56  ;;  %v3837_v28 = vshll.u32 %v6074_v49, 16 }
 0x271   : > { %v2508_v7 = vadd.f32 %v2467_v57, %v2087_v40  ;;  %v6097_v40 = vld [vmem:[%s5203_s10 + $0x98] sm:$0xff]   ;;  %v2767_v57 = vrot.slane %v6570_v51, 1 }
 0x272   : > { %v3839_v3 = vrot.slane %v3837_v28, 1  ;;  %3222 = vperm.xlu1 %5098, %v3076_v0   ;;  %3217 = vperm.xlu0 %5097, %v3075_v31   ;;  %v3652_v28 = vrot.slane %v3650_v8, 3 }
 0x273   : > { %v2048_v20 = vpop.f32.mrf.mxu1  ;;  %v2678_v16 = vpop.f32.mrf.mxu3 }
 0x274   : > { %v2088_v11 = vadd.f32 %v2048_v20, %v1666_v34  ;;  %v6076_v43 = vadd.f32 %v2678_v16, %v2508_v7  ;;  %v3840_v63 = vsel %vm1788_vm5, %v3835_v48, %v3839_v3  ;;  %v2768_v7 = vrot.slane %v6571_v42, 2  ;;  %v4228_v16 = vld [vmem:[%s6509_s3 + $0x110] sm:$0xff] }
 0x275   : > { %v3653_v20 = vshll.u32 %v5086_v61, 16 }
 0x276   : > { %v1629_v14 = vpop.f32.mrf.mxu0 }
 0x277   : > { %v1667_v24 = vadd.f32 %v1629_v14, %v6569_v52  ;;  %v6123_v14 = vor.u32 %v2768_v7, %v2767_v57  ;;  %v3655_v52 = vrot.slane %v3653_v20, 4  ;;  %v4945_v57 = vld [vmem:[%s5203_s10 + $0xa0] sm:$0xff]  }
 0x278   : > { %v2469_v50 = vpop.f32.mrf.mxu2 }
 0x279   : > { %v2509_v44 = vadd.f32 %v2469_v50, %v2088_v11  ;;  %4677 = vmatmul.msk.bf16.gmra.mxu0 %vm348_vm2, %v2766_v23  ;;  %v3065_v11 = vld [vmem:[%s6509_s3 + $0x88] sm:$0xff]  ;;  %v2770_v48 = vsel %vm2730_vm7, %v6071_v12, %v6123_v14  ;;  %v3068_v12 = vld [vmem:[%s6509_s3 + $0xa0] sm:$0xff] }
 0x27a   : > { %v6126_v23 = vld [vmem:[%s5203_s10 + $0xa8] sm:$0xff]  ;;  %3167 = vperm.xlu2 %5099, %v3065_v11   ;;  %4247 = vperm.xlu1 %5098, %v4228_v16   ;;  %v6573_v16 = vshrl.u32 %v5648_v39, 16 }
 0x27b   : > { %v2051_v56 = vpop.f32.mrf.mxu1  ;;  %v2680_v30 = vpop.f32.mrf.mxu3  ;;  %4242 = vperm.xlu0 %5097, %v4227_v55  }
 0x27c   : > { %v2089_v17 = vadd.f32 %v2051_v56, %v1667_v24  ;;  %v6102_v34 = vadd.f32 %v2680_v30, %v2509_v44  ;;  %v6129_v44 = vld [vmem:[%s5203_s10 + $0xa8] sm:$0xff]   ;;  %v3841_v56 = vshrl.u32 %v6074_v49, 16  ;;  %v2771_v55 = vrot.slane %v6573_v16, 1 }
 0x27d   : > { %4720 = vmatmul.msk.bf16.gmra.mxu2 %vm348_vm2, %v6097_v40  ;;  %v4918_v30 = vunpack.c.h.b16 %v6129_v44  ;;  %v4231_v49 = vld [vmem:[%s6509_s3 + $0x128] sm:$0xff] }
 0x27e   : > { %4715 = vmatmul.msk.bf16.gmra.mxu1 %vm348_vm2, %v3648_v59  ;;  %v1631_v27 = vpop.f32.mrf.mxu0  ;;  %v3845_v59 = vshll.u32 %v6126_v23, 16  ;;  %v3843_v42 = vor.u32 %v3841_v56, %v3839_v3 }
 0x27f   : > { %v1668_v18 = vadd.f32 %v1631_v27, %v6572_v19  ;;  %v6143_v27 = vunpack.c.l.b16 %v3597_v2  ;;  %v4742_v2 = vld [vmem:[%s5203_s10 + $0xb0] sm:$0xf] }
 0x280   : > { %v2472_v54 = vpop.f32.mrf.mxu2  ;;  %4745 = vmatmul.msk.bf16.gmra.mxu3 %vm348_vm2, %v3840_v63  ;;  %v3847_v7 = vrot.slane %v3845_v59, 1  ;;  %v3071_v59 = vld [vmem:[%s6509_s3 + $0xb8] sm:$0xff] }
 0x281   : > { %v2510_v53 = vadd.f32 %v2472_v54, %v2089_v17  ;;  %v6140_v17 = vor.u32 %v3655_v52, %v3652_v28  ;;  %v3622_v8 = vpack.c.b16 %v6143_v27, %v4918_v30  ;;  %v6575_v28 = vld [vmem:[#allocation4_spill] sm:$0xff] }
 0x282   : > { %3182 = vperm.xlu2 %5099, %v3068_v12   ;;  %4262 = vperm.xlu1 %5098, %v4231_v49   ;;  %v3848_v11 = vsel %vm1788_vm5, %v3843_v42, %v3847_v7 }
 0x283   : > { %v2053_v32 = vpop.f32.mrf.mxu1  ;;  %v2683_v50 = vpop.f32.mrf.mxu3 }
 0x284   : > { %v2090_v24 = vadd.f32 %v2053_v32, %v1668_v18  ;;  %v6132_v0 = vadd.f32 %v2683_v50, %v2510_v53  ;;  %v3657_v18 = vsel %vm791_vm3, %v6084_v60, %v6140_v17  ;;  %v6574_v60 = vshll.u32 %v5648_v39, 16  ;;  %v4232_v39 = vld [vmem:[%s6509_s3 + $0x130] sm:$0xff] }
 0x285   : > { %v3662_v50 = vshll.u32 %v3622_v8, 16 }
 0x286   : > { %v1634_v31 = vpop.f32.mrf.mxu0  ;;  %v2772_v32 = vrot.slane %v6574_v60, 2 }
 0x287   : > { %v1669_v61 = vadd.f32 %v1634_v31, %v5654_v10  ;;  %v4230_v10 = vld [vmem:[%s6509_s3 + $0x120] sm:$0xff]  ;;  %v4831_v31 = vld [vmem:[%s5203_s10 + $0xb0] sm:$0x10]  ;;  %v3664_v49 = vrot.slane %v3662_v50, 4 }
 0x288   : > { %v2474_v63 = vpop.f32.mrf.mxu2  ;;  %4257 = vperm.xlu0 %5097, %v4230_v10   ;;  %v2773_v30 = vor.u32 %v2772_v32, %v2771_v55  ;;  %v3083_v55 = vpop.permute.xlu0 %3082 }
 0x289   : > { %v2511_v51 = vadd.f32 %v2474_v63, %v2090_v24  ;;  %4678 = vmatmul.msk.bf16.gmra.mxu0 %vm348_vm2, %v2770_v48  ;;  %v3659_v24 = vshrl.u32 %v3622_v8, 16  ;;  %v6182_v63 = vor.u32 %v4831_v31, %v4742_v2  ;;  %v3849_v8 = vshrl.u32 %v6126_v23, 16  ;;  %v3079_v23 = vld [vmem:[%s6509_s3 + $0xf8] sm:$0xff] }
 0x28a   : > { %3197 = vperm.xlu2 %5099, %v3071_v59  }
 0x28b   : > { %v2056_v19 = vpop.f32.mrf.mxu1  ;;  %v2685_v54 = vpop.f32.mrf.mxu3  ;;  %v3661_v12 = vrot.slane %v3659_v24, 3  ;;  %v3851_v32 = vor.u32 %v3849_v8, %v3847_v7 }
 0x28c   : > { %v2091_v20 = vadd.f32 %v2056_v19, %v1669_v61  ;;  %v6160_v53 = vadd.f32 %v2685_v54, %v2511_v51  ;;  %v3078_v61 = vld [vmem:[%s6509_s3 + $0xf0] sm:$0xff] }
 0x28d   : > { %4721 = vmatmul.msk.bf16.gmra.mxu2 %vm348_vm2, %v4945_v57  ;;  %3232 = vperm.xlu1 %5098, %v3078_v61   ;;  %v6577_v61 = vshll.u32 %v5672_v46, 16 }
 0x28e   : > { %4716 = vmatmul.msk.bf16.gmra.mxu1 %vm348_vm2, %v3657_v18  ;;  %v1636_v3 = vpop.f32.mrf.mxu0  ;;  %v2774_v18 = vsel %vm2730_vm7, %v6123_v14, %v2773_v30  ;;  %v3074_v14 = vld [vmem:[%s6509_s3 + $0xd0] sm:$0xff] }
 0x28f   : > { %v1670_v52 = vadd.f32 %v1636_v3, %v6575_v28  ;;  %v6191_v3 = vor.u32 %v3664_v49, %v3661_v12 }
 0x290   : > { %v2477_v48 = vpop.f32.mrf.mxu2  ;;  %4746 = vmatmul.msk.bf16.gmra.mxu3 %vm348_vm2, %v3848_v11  ;;  %4267 = vperm.xlu0 %5097, %v4232_v39   ;;  %v6196_v11 = vld [vmem:[%s6508_s2] ss:$0 sm:$0xff]  ;;  %v6578_v39 = vld [vmem:[#allocation5_spill] sm:$0xff] }
 0x291   : > { %v2512_v56 = vadd.f32 %v2477_v48, %v2091_v20  ;;  %v3853_v20 = vshll.u32 %v6182_v63, 16  ;;  %v3666_v24 = vsel %vm791_vm3, %v6140_v17, %v6191_v3  ;;  %v2776_v17 = vrot.slane %v6577_v61, 2 }
 0x292   : > { %3212 = vperm.xlu2 %5099, %v3074_v14  }
 0x293   : > { %v2058_v51 = vpop.f32.mrf.mxu1  ;;  %v2688_v57 = vpop.f32.mrf.mxu3  ;;  %v3855_v28 = vrot.slane %v3853_v20, 1 }
 0x294   : > { %v2092_v10 = vadd.f32 %v2058_v51, %v1670_v52  ;;  %v6184_v42 = vadd.f32 %v2688_v57, %v2512_v56  ;;  %v6576_v56 = vshrl.u32 %v5672_v46, 16  ;;  %v4226_v57 = vld [vmem:[%s6509_s3 + $0x100] sm:$0xff] }
 0x295   : > { %v3856_v48 = vsel %vm1788_vm5, %v3851_v32, %v3855_v28 }
 0x296   : > { %v2868_v19 = vpop.f32.mrf.mxu0  ;;  %v2775_v59 = vrot.slane %v6576_v56, 1  ;;  %v4948_v56 = vld [vmem:[%s5203_s10 + $0x98] sm:$0xf0] }
 0x297   : > { %v2948_v54 = vadd.f32 %v2868_v19, %v5679_v21  ;;  %v4234_v21 = vld [vmem:[%s6509_s3 + $0x140] sm:$0xff]  ;;  %v3088_v19 = vpop.permute.xlu0 %3087 }
 0x298   : > { %v2479_v16 = vpop.f32.mrf.mxu2  ;;  %4277 = vperm.xlu1 %5098, %v4234_v21   ;;  %3237 = vperm.xlu0 %5097, %v3079_v23  }
 0x299   : > { %v2513_v60 = vadd.f32 %v2479_v16, %v2092_v10  ;;  %4679 = vmatmul.msk.bf16.gmra.mxu0 %vm348_vm2, %v2774_v18  ;;  %v2984_v2 = vadd.f32 %v6196_v11, %v2948_v54  ;;  %v2777_v18 = vor.u32 %v2776_v17, %v2775_v59  ;;  %v4949_v59 = vld [vmem:[%s5203_s10 + $0x98] sm:$0xe]  ;;  %v6579_v17 = vshrl.u32 %v5697_v37, 16 }
 0x29a   : > { %4237 = vperm.xlu2 %5099, %v4226_v57   ;;  %v4950_v57 = vor.u32 %v4949_v59, %v4948_v56 }
 0x29b   : > { %v3379_v52 = vpop.f32.mrf.mxu1  ;;  %v2690_v50 = vpop.f32.mrf.mxu3  ;;  %v3016_v49 = vmax.f32 %v2984_v2, 0.0  ;;  %v2778_v21 = vsel %vm2730_vm7, %v2773_v30, %v2777_v18  ;;  %v4229_v30 = vld [vmem:[%s6509_s3 + $0x118] sm:$0xff] }
 0x29c   : > { %v6212_v31 = vadd.f32 %v2690_v50, %v2513_v60  ;;  %v4052_v56 = vrot.slane %v4950_v57, 1 }
 0x29d   : > { %4722 = vmatmul.msk.bf16.gmra.mxu2 %vm348_vm2, %v6129_v44  ;;  %v3240_v54 = vmul.f32 %v3083_v55, %v3016_v49  ;;  %v3728_v55 = vpack.c.b16 %v6143_v27, %v6143_v27 }
 0x29e   : > { %4717 = vmatmul.msk.bf16.gmra.mxu1 %vm348_vm2, %v3666_v24  ;;  %v2870_v7 = vpop.f32.mrf.mxu0  ;;  %v3093_v24 = vpop.permute.xlu1 %3092 }
 0x29f   : > { %v2949_v51 = vadd.f32 %v2870_v7, %v6578_v39  ;;  %v3857_v7 = vshrl.u32 %v6182_v63, 16  ;;  %v2779_v39 = vrot.slane %v6579_v17, 1 }
 0x2a0   : > { %v3474_v12 = vpop.f32.mrf.mxu2  ;;  %4747 = vmatmul.msk.bf16.gmra.mxu3 %vm348_vm2, %v3856_v48 }
 0x2a1   : > { %v3475_v10 = vadd.f32 %v3474_v12, %v3379_v52  ;;  %v2985_v44 = vadd.f32 %v6196_v11, %v2949_v51  ;;  %v6580_v51 = vshll.u32 %v5697_v37, 16  ;;  %v3859_v49 = vor.u32 %v3857_v7, %v3855_v28 }
 0x2a2   : > { %4252 = vperm.xlu2 %5099, %v4229_v30  }
 0x2a3   : > { %v3381_v8 = vpop.f32.mrf.mxu1  ;;  %v3017_v20 = vmax.f32 %v2985_v44, 0.0  ;;  %v3555_v46 = vpop.f32.mrf.mxu3  ;;  %v2780_v12 = vrot.slane %v6580_v51, 2  ;;  %v6252_v44 = vld [vmem:[%s5203_s10 + $0xa0] sm:$0xff] }
 0x2a4   : > { %v6228_v16 = vadd.f32 %v3555_v46, %v3475_v10  ;;  %v3955_v46 = vshll.u32 %v6097_v40, 16  ;;  %v4053_v59 = vrot.slane %v6252_v44, 1 }
 0x2a5   : > { %v3241_v60 = vmul.f32 %v3088_v19, %v3017_v20 }
 0x2a6   : > { %v2873_v14 = vpop.f32.mrf.mxu0 }
 0x2a7   : > { %v3272_v23 = vadd.f32 %v3241_v60, %v3240_v54  ;;  %v2950_v32 = vadd.f32 %v2873_v14, %v5704_v45  ;;  %v6256_v54 = vor.u32 %v2780_v12, %v2779_v39  ;;  %v3098_v14 = vpop.permute.xlu1 %3097 }
 0x2a8   : > { %v3476_v52 = vpop.f32.mrf.mxu2 }
 0x2a9   : > { %v2986_v50 = vadd.f32 %v6196_v11, %v2950_v32  ;;  %v3477_v2 = vadd.f32 %v3476_v52, %v3381_v8  ;;  %4680 = vmatmul.msk.bf16.gmra.mxu0 %vm348_vm2, %v2778_v21  ;;  %v6581_v8 = vld [vmem:[#allocation6_spill] sm:$0xff]  ;;  %v3960_v21 = vshll.u32 %v6252_v44, 16  ;;  %v4123_v32 = vshrl.u32 %v4950_v57, 16 }
 0x2aa   : > { %v4126_v52 = vshll.u32 %v4950_v57, 16  ;;  %v2782_v30 = vsel %vm2730_vm7, %v2777_v18, %v6256_v54  ;;  %v3103_v18 = vpop.permute.xlu2 %3102  ;;  %v4233_v57 = vld [vmem:[%s6509_s3 + $0x138] sm:$0xff] }
 0x2ab   : > { %v3384_v48 = vpop.f32.mrf.mxu1  ;;  %v3018_v45 = vmax.f32 %v2986_v50, 0.0  ;;  %v3557_v61 = vpop.f32.mrf.mxu3  ;;  %v4125_v17 = vrot.slane %v4123_v32, 1  ;;  %v4131_v12 = vrot.slane %v3960_v21, 2 }
 0x2ac   : > { %v6246_v27 = vadd.f32 %v3557_v61, %v3477_v2  ;;  %v3953_v2 = vshrl.u32 %v6097_v40, 16  ;;  %v4128_v39 = vrot.slane %v4126_v52, 2 }
 0x2ad   : > { %v3242_v63 = vmul.f32 %v3093_v24, %v3018_v45  ;;  %4723 = vmatmul.msk.bf16.gmra.mxu2 %vm348_vm2, %v3728_v55  ;;  %v3957_v55 = vrot.slane %v3955_v46, 1 }
 0x2ae   : > { %4718 = vmatmul.msk.bf16.gmra.mxu1 %vm348_vm2, %v6191_v3  ;;  %v2875_v10 = vpop.f32.mrf.mxu0  ;;  %v3077_v3 = vld [vmem:[%s6509_s3 + $0xe8] sm:$0xff] }
 0x2af   : > { %v3273_v19 = vadd.f32 %v3272_v23, %v3242_v63  ;;  %v2951_v20 = vadd.f32 %v2875_v10, %v6581_v8  ;;  %v3964_v23 = vshrl.u32 %v6252_v44, 16  ;;  %3227 = vperm.xlu2 %5099, %v3077_v3   ;;  %v3962_v10 = vrot.slane %v3960_v21, 1 }
 0x2b0   : > { %v3479_v37 = vpop.f32.mrf.mxu2  ;;  %4748 = vmatmul.msk.bf16.gmra.mxu3 %vm348_vm2, %v3859_v49  ;;  %v3958_v49 = vor.u32 %v3957_v55, %v3953_v2  ;;  %v6583_v55 = vshll.u32 %v5722_v25, 16 }
 0x2b1   : > { %v3480_v60 = vadd.f32 %v3479_v37, %v3384_v48  ;;  %v2987_v28 = vadd.f32 %v6196_v11, %v2951_v20  ;;  %v4130_v51 = vrot.slane %v3964_v23, 1  ;;  %v4054_v37 = vsel %vm2519_vm6, %v4052_v56, %v4053_v59  ;;  %v6584_v56 = vld [vmem:[#allocation7_spill] sm:$0xff] }
 0x2b2   : > { %v3963_v3 = vsel %vm1788_vm5, %v3958_v49, %v3962_v10 }
 0x2b3   : > { %v3386_v24 = vpop.f32.mrf.mxu1  ;;  %v3019_v50 = vmax.f32 %v2987_v28, 0.0  ;;  %v3560_v7 = vpop.f32.mrf.mxu3 }
 0x2b4   : > { %v6268_v48 = vadd.f32 %v3560_v7, %v3480_v60  ;;  %v2784_v7 = vrot.slane %v6583_v55, 2 }
 0x2b5   : > { %v3243_v45 = vmul.f32 %v3098_v14, %v3019_v50  ;;  %v6582_v50 = vshrl.u32 %v5722_v25, 16 }
 0x2b6   : > { %v2878_v61 = vpop.f32.mrf.mxu0 }
 0x2b7   : > { %v3274_v63 = vadd.f32 %v3273_v19, %v3243_v45  ;;  %v2952_v40 = vadd.f32 %v2878_v61, %v5729_v4  ;;  %v4129_v19 = vor.u32 %v4128_v39, %v4125_v17  ;;  %v4132_v4 = vor.u32 %v4131_v12, %v4130_v51  ;;  %4272 = vperm.xlu2 %5099, %v4233_v57   ;;  %v3108_v12 = vpop.permute.xlu2 %3107 }
 0x2b8   : > { %v3481_v8 = vpop.f32.mrf.mxu2  ;;  %v2783_v2 = vrot.slane %v6582_v50, 1 }
 0x2b9   : > { %v2988_v20 = vadd.f32 %v6196_v11, %v2952_v40  ;;  %v3482_v46 = vadd.f32 %v3481_v8, %v3386_v24  ;;  %4681 = vmatmul.msk.bf16.gmra.mxu0 %vm348_vm2, %v2782_v30  ;;  %v4133_v24 = vsel %vm2730_vm7, %v4129_v19, %v4132_v4  ;;  %v6293_v30 = vld [vmem:[%s5203_s10 + $0xa8] sm:$0xff] }
 0x2ba   : > { %v2785_v40 = vor.u32 %v2784_v7, %v2783_v2  ;;  %v3968_v49 = vshll.u32 %v6293_v30, 16  ;;  %v3972_v8 = vshrl.u32 %v6293_v30, 16  ;;  %v4055_v19 = vrot.slane %v6293_v30, 1  ;;  %v3113_v7 = vpop.permute.xlu0 %3112 }
 0x2bb   : > { %v3389_v60 = vpop.f32.mrf.mxu1  ;;  %v3020_v28 = vmax.f32 %v2988_v20, 0.0  ;;  %v3562_v14 = vpop.f32.mrf.mxu3 }
 0x2bc   : > { %v6283_v21 = vadd.f32 %v3562_v14, %v3482_v46  ;;  %v6585_v14 = vld [vmem:[#allocation9_spill] sm:$0xff] }
 0x2bd   : > { %v3244_v32 = vmul.f32 %v3103_v18, %v3020_v28  ;;  %4766 = vmatmul.msk.bf16.vlgmr.msra.gmra.mxu2 %vm348_vm2, %v4054_v37  ;;  %v2786_v37 = vsel %vm2730_vm7, %v6256_v54, %v2785_v40  ;;  %v4135_v28 = vrot.slane %v3968_v49, 2  ;;  %v4056_v54 = vsel %vm2519_vm6, %v4053_v59, %v4055_v19 }
 0x2be   : > { %4761 = vmatmul.msk.bf16.vlgmr.msra.gmra.mxu1 %vm348_vm2, %v3963_v3  ;;  %v2880_v52 = vpop.f32.mrf.mxu0 }
 0x2bf   : > { %v3275_v45 = vadd.f32 %v3274_v63, %v3244_v32  ;;  %v2953_v61 = vadd.f32 %v2880_v52, %v6584_v56  ;;  %v3966_v52 = vor.u32 %v3964_v23, %v3962_v10 }
 0x2c0   : > { %v3484_v17 = vpop.f32.mrf.mxu2  ;;  %4771 = vmatmul.msk.bf16.vlgmr.msra.gmra.mxu3 %vm348_vm2, %v4133_v24  ;;  %v3970_v24 = vrot.slane %v3968_v49, 1 }
 0x2c1   : > { %v3485_v39 = vadd.f32 %v3484_v17, %v3389_v60  ;;  %v2989_v51 = vadd.f32 %v6196_v11, %v2953_v61  ;;  %v4134_v60 = vrot.slane %v3972_v8, 1 }
 0x2c2   : > { %v3971_v61 = vsel %vm1788_vm5, %v3966_v52, %v3970_v24 }
 0x2c3   : > { %v3391_v18 = vpop.f32.mrf.mxu1  ;;  %v3021_v25 = vmax.f32 %v2989_v51, 0.0  ;;  %v3565_v20 = vpop.f32.mrf.mxu3  ;;  %v4136_v30 = vor.u32 %v4135_v28, %v4134_v60 }
 0x2c4   : > { %v6300_v46 = vadd.f32 %v3565_v20, %v3485_v39 }
 0x2c5   : > { %v3245_v63 = vmul.f32 %v3108_v12, %v3021_v25  ;;  %v4137_v51 = vsel %vm2730_vm7, %v4132_v4, %v4136_v30  ;;  %v6586_v12 = vld [vmem:[#allocation8_spill] sm:$0xff] }
 0x2c6   : > { %v2883_v57 = vpop.f32.mrf.mxu0  ;;  %v6587_v44 = vshrl.u32 %v6586_v12, 16  ;;  %v6588_v59 = vshll.u32 %v6586_v12, 16  ;;  %v6324_v25 = vld [vmem:[%s5203_s10 + $0xb0] sm:$0xff]  ;;  %v3974_v12 = vor.u32 %v3972_v8, %v3970_v24 }
 0x2c7   : > { %v3276_v3 = vadd.f32 %v3275_v45, %v3245_v63  ;;  %v2954_v32 = vadd.f32 %v2883_v57, %v6585_v14  ;;  %v6589_v63 = vld [vmem:[#allocation10_spill] sm:$0xff]  ;;  %v3118_v14 = vpop.permute.xlu1 %3117  ;;  %v3976_v4 = vshll.u32 %v6324_v25, 16  ;;  %v3980_v52 = vshrl.u32 %v6324_v25, 16 }
 0x2c8   : > { %v3486_v50 = vpop.f32.mrf.mxu2  ;;  %v2787_v49 = vrot.slane %v6587_v44, 1 }
 0x2c9   : > { %v2990_v2 = vadd.f32 %v6196_v11, %v2954_v32  ;;  %v3487_v55 = vadd.f32 %v3486_v50, %v3391_v18  ;;  %4682 = vmatmul.msk.bf16.gmra.mxu0 %vm348_vm2, %v2786_v37  ;;  %v2788_v18 = vrot.slane %v6588_v59, 2  ;;  %v3978_v44 = vrot.slane %v3976_v4, 1  ;;  %v4118_v59 = vld [vmem:[%s5203_s10 + $0xbc] sm:$0x3] }
 0x2cb   : > { %v3394_v45 = vpop.f32.mrf.mxu1  ;;  %v3022_v56 = vmax.f32 %v2990_v2, 0.0  ;;  %v3567_v17 = vpop.f32.mrf.mxu3  ;;  %v2789_v32 = vor.u32 %v2788_v18, %v2787_v49  ;;  %v3925_v49 = vld [vmem:[%s5203_s10 + $0xb8] sm:$0xf]  ;;  %v3979_v24 = vsel %vm1788_vm5, %v3974_v12, %v3978_v44 }
 0x2cc   : > { %v6314_v23 = vadd.f32 %v3567_v17, %v3487_v55  ;;  %v4139_v17 = vrot.slane %v3976_v4, 2 }
 0x2cd   : > { %v3246_v10 = vmul.f32 %v3113_v7, %v3022_v56  ;;  %4767 = vmatmul.msk.bf16.gmra.mxu2 %vm348_vm2, %v4056_v54  ;;  %v4057_v56 = vrot.slane %v6324_v25, 1 }
 0x2ce   : > { %4762 = vmatmul.msk.bf16.gmra.mxu1 %vm348_vm2, %v3971_v61  ;;  %v2885_v39 = vpop.f32.mrf.mxu0  ;;  %v4138_v61 = vrot.slane %v3980_v52, 1 }
 0x2cf   : > { %v3277_v20 = vadd.f32 %v3276_v3, %v3246_v10  ;;  %v2955_v57 = vadd.f32 %v2885_v39, %v6589_v63  ;;  %v6590_v39 = vld [vmem:[#allocation11_spill] sm:$0xff]  ;;  %v3926_v63 = vld [vmem:[%s5203_s10 + $0xbc] sm:$0x1] }
 0x2d0   : > { %v3489_v37 = vpop.f32.mrf.mxu2  ;;  %4772 = vmatmul.msk.bf16.gmra.mxu3 %vm348_vm2, %v4137_v51  ;;  %v3946_v4 = vunpack.c.l.b16 %v3926_v63 }
 0x2d1   : > { %v3490_v60 = vadd.f32 %v3489_v37, %v3394_v45  ;;  %v2991_v28 = vadd.f32 %v6196_v11, %v2955_v57  ;;  %v2790_v45 = vsel %vm2730_vm7, %v2785_v40, %v2789_v32  ;;  %v3123_v40 = vpop.permute.xlu2 %3122 }
 0x2d3   : > { %v3396_v50 = vpop.f32.mrf.mxu1  ;;  %v3023_v2 = vmax.f32 %v2991_v28, 0.0  ;;  %v3570_v3 = vpop.f32.mrf.mxu3  ;;  %v4140_v28 = vor.u32 %v4139_v17, %v4138_v61  ;;  %v6592_v17 = vshll.u32 %v5772_v38, 16 }
 0x2d4   : > { %v6331_v55 = vadd.f32 %v3570_v3, %v3490_v60  ;;  %v4058_v60 = vsel %vm2519_vm6, %v4055_v19, %v4057_v56  ;;  %v6591_v19 = vshrl.u32 %v5772_v38, 16 }
 0x2d5   : > { %v3247_v7 = vmul.f32 %v3118_v14, %v3023_v2  ;;  %v4120_v14 = vunpack.c.l.b16 %v4118_v59 }
 0x2d6   : > { %v2888_v54 = vpop.f32.mrf.mxu0  ;;  %v2791_v61 = vrot.slane %v6591_v19, 1 }
 0x2d7   : > { %v3278_v10 = vadd.f32 %v3277_v20, %v3247_v7  ;;  %v2956_v51 = vadd.f32 %v2888_v54, %v6590_v39  ;;  %v3945_v20 = vunpack.c.l.b16 %v3925_v49  ;;  %v2792_v39 = vrot.slane %v6592_v17, 2  ;;  %v6593_v49 = vld [vmem:[#allocation12_spill] sm:$0xff] }
 0x2d8   : > { %v3491_v18 = vpop.f32.mrf.mxu2 }
 0x2d9   : > { %v2992_v57 = vadd.f32 %v6196_v11, %v2956_v51  ;;  %v3492_v37 = vadd.f32 %v3491_v18, %v3396_v50  ;;  %4683 = vmatmul.msk.bf16.gmra.mxu0 %vm348_vm2, %v2790_v45  ;;  %v4141_v45 = vsel %vm2730_vm7, %v4136_v30, %v4140_v28  ;;  %v4121_v51 = vpack.c.b16 %v4120_v14, %v3945_v20 }
 0x2da   : > { %v6357_v18 = vpack.c.b16 %v3946_v4, %v3945_v20 }
 0x2db   : > { %v3399_v2 = vpop.f32.mrf.mxu1  ;;  %v3024_v8 = vmax.f32 %v2992_v57, 0.0  ;;  %v3572_v3 = vpop.f32.mrf.mxu3  ;;  %v4143_v30 = vshrl.u32 %v4121_v51, 16 }
 0x2dc   : > { %v6347_v7 = vadd.f32 %v3572_v3, %v3492_v37  ;;  %v3984_v38 = vshll.u32 %v6357_v18, 16  ;;  %v3128_v3 = vpop.permute.xlu0 %3127 }
 0x2dd   : > { %v3248_v54 = vmul.f32 %v3123_v40, %v3024_v8  ;;  %4768 = vmatmul.msk.bf16.gmra.mxu2 %vm348_vm2, %v4058_v60  ;;  %v2793_v40 = vor.u32 %v2792_v39, %v2791_v61  ;;  %v4146_v60 = vshll.u32 %v4121_v51, 16  ;;  %v4145_v19 = vrot.slane %v4143_v30, 1  ;;  %v6594_v61 = vld [vmem:[#allocation13_spill] sm:$0xff]  ;;  %v3133_v30 = vpop.permute.xlu1 %3132 }
 0x2de   : > { %4763 = vmatmul.msk.bf16.gmra.mxu1 %vm348_vm2, %v3979_v24  ;;  %v2890_v50 = vpop.f32.mrf.mxu0  ;;  %v3982_v39 = vor.u32 %v3980_v52, %v3978_v44  ;;  %v3986_v51 = vrot.slane %v3984_v38, 1 }
 0x2df   : > { %v3279_v12 = vadd.f32 %v3278_v10, %v3248_v54  ;;  %v2957_v59 = vadd.f32 %v2890_v50, %v6593_v49  ;;  %v2794_v4 = vsel %vm2730_vm7, %v2789_v32, %v2793_v40  ;;  %v4059_v50 = vrot.slane %v6357_v18, 1 }
 0x2e0   : > { %v3494_v63 = vpop.f32.mrf.mxu2  ;;  %4773 = vmatmul.msk.bf16.gmra.mxu3 %vm348_vm2, %v4141_v45  ;;  %v4148_v45 = vrot.slane %v4146_v60, 2 }
 0x2e1   : > { %v2993_v57 = vadd.f32 %v6196_v11, %v2957_v59  ;;  %v3495_v37 = vadd.f32 %v3494_v63, %v3399_v2  ;;  %v4060_v32 = vsel %vm2519_vm6, %v4057_v56, %v4059_v50  ;;  %v2795_v56 = vrot.slane %v2334_v62, 1 }
 0x2e2   : > { %v4149_v63 = vor.u32 %v4148_v45, %v4145_v19 }
 0x2e3   : > { %v3025_v8 = vmax.f32 %v2993_v57, 0.0  ;;  %v3401_v24 = vpop.f32.mrf.mxu1  ;;  %v3575_v14 = vpop.f32.mrf.mxu3 }
 0x2e4   : > { %v6362_v54 = vadd.f32 %v3575_v14, %v3495_v37  ;;  %v4150_v25 = vsel %vm2730_vm7, %v4140_v28, %v4149_v63  ;;  %v6595_v24 = vshll.u32 %v5797_v15, 16  ;;  %v6596_v14 = vld [vmem:[#allocation14_spill] sm:$0xff] }
 0x2e5   : > { %v3249_v10 = vmul.f32 %v3128_v3, %v3025_v8 }
 0x2e6   : > { %v2893_v20 = vpop.f32.mrf.mxu0  ;;  %v2796_v38 = vrot.slane %v6595_v24, 2 }
 0x2e7   : > { %v3280_v2 = vadd.f32 %v3279_v12, %v3249_v10  ;;  %v2958_v17 = vadd.f32 %v2893_v20, %v6594_v61  ;;  %v3987_v12 = vsel %vm1788_vm5, %v3982_v39, %v3986_v51  ;;  %v2725_v20 = vld [vmem:[%s5203_s10 + $0x98] sm:$0x3]  ;;  %v3138_v39 = vpop.permute.xlu2 %3137 }
 0x2e8   : > { %v3496_v49 = vpop.f32.mrf.mxu2  ;;  %v2797_v45 = vor.u32 %v2796_v38, %v2795_v56  ;;  %v2728_v61 = vunpack.c.l.b16 %v2725_v20  ;;  %v3143_v38 = vpop.permute.xlu0 %3142 }
 0x2e9   : > { %v2994_v59 = vadd.f32 %v6196_v11, %v2958_v17  ;;  %4684 = vmatmul.msk.bf16.gmra.mxu0 %vm348_vm2, %v2794_v4 }
 0x2eb   : > { %v3026_v57 = vmax.f32 %v2994_v59, 0.0  ;;  %v3691_v37 = vpop.f32.mrf.mxu1  ;;  %v3577_v60 = vpop.f32.mrf.mxu3 }
 0x2ec   : > { %v3715_v52 = vadd.f32 %v3691_v37, %v6228_v16  ;;  %v2729_v37 = vpack.c.b16 %v2728_v61, %v2728_v61 }
 0x2ed   : > { %v3250_v44 = vmul.f32 %v3133_v30, %v3026_v57  ;;  %4769 = vmatmul.msk.bf16.gmra.mxu2 %vm348_vm2, %v4060_v32  ;;  %v2798_v32 = vsel %vm2730_vm7, %v2793_v40, %v2797_v45  ;;  %v3988_v57 = vshrl.u32 %v6357_v18, 16 }
 0x2ee   : > { %4764 = vmatmul.msk.bf16.gmra.mxu1 %vm348_vm2, %v3987_v12  ;;  %v2895_v8 = vpop.f32.mrf.mxu0 }
 0x2ef   : > { %v3281_v3 = vadd.f32 %v3280_v2, %v3250_v44  ;;  %v2959_v10 = vadd.f32 %v2895_v8, %v6596_v14  ;;  %v2800_v8 = vshrl.u32 %v2729_v37, 16 }
 0x2f0   : > { %v3753_v4 = vpop.f32.mrf.mxu2  ;;  %4774 = vmatmul.msk.bf16.gmra.mxu3 %vm348_vm2, %v4150_v25  ;;  %v2803_v25 = vshll.u32 %v2729_v37, 16 }
 0x2f1   : > { %v2995_v16 = vadd.f32 %v6196_v11, %v2959_v10  ;;  %v3777_v19 = vadd.f32 %v3753_v4, %v3715_v52 }
 0x2f2   : > { %v2805_v20 = vrot.slane %v2803_v25, 2 }
 0x2f3   : > { %v3027_v17 = vmax.f32 %v2995_v16, 0.0  ;;  %v3693_v28 = vpop.f32.mrf.mxu1  ;;  %v3884_v49 = vpop.f32.mrf.mxu3 }
 0x2f4   : > { %v3716_v62 = vadd.f32 %v3693_v28, %v6246_v27  ;;  %v6388_v59 = vadd.f32 %v3884_v49, %v3777_v19  ;;  %v3990_v27 = vor.u32 %v3988_v57, %v3986_v51 }
 0x2f5   : > { %v3251_v15 = vmul.f32 %v3138_v39, %v3027_v17  ;;  %v3148_v39 = vpop.permute.xlu1 %3147 }
 0x2f6   : > { %v2898_v2 = vpop.f32.mrf.mxu0 }
 0x2f7   : > { %v3282_v12 = vadd.f32 %v3281_v3, %v3251_v15  ;;  %v2960_v30 = vadd.f32 %v2898_v2, %v5838_v33  ;;  %v2802_v3 = vrot.slane %v2800_v8, 1 }
 0x2f8   : > { %v3755_v60 = vpop.f32.mrf.mxu2 }
 0x2f9   : > { %v2996_v52 = vadd.f32 %v6196_v11, %v2960_v30  ;;  %v3778_v44 = vadd.f32 %v3755_v60, %v3716_v62  ;;  %4685 = vmatmul.msk.bf16.gmra.mxu0 %vm348_vm2, %v2798_v32  ;;  %v2806_v61 = vor.u32 %v2805_v20, %v2802_v3 }
 0x2fb   : > { %v3028_v56 = vmax.f32 %v2996_v52, 0.0  ;;  %v3696_v24 = vpop.f32.mrf.mxu1  ;;  %v3886_v14 = vpop.f32.mrf.mxu3  ;;  %v2807_v32 = vsel %vm2730_vm7, %v2797_v45, %v2806_v61 }
 0x2fc   : > { %v3717_v40 = vadd.f32 %v3696_v24, %v6268_v48  ;;  %v6396_v10 = vadd.f32 %v3886_v14, %v3778_v44  ;;  %v3153_v52 = vpop.permute.xlu2 %3152 }
 0x2fd   : > { %v3252_v18 = vmul.f32 %v3143_v38, %v3028_v56  ;;  %4770 = vmatmul.msk.bf16.gmra.mxu2 %vm348_vm2, %v4059_v50 }
 0x2fe   : > { %4765 = vmatmul.msk.bf16.gmra.mxu1 %vm348_vm2, %v3990_v27  ;;  %v2900_v33 = vpop.f32.mrf.mxu0 }
 0x2ff   : > { %v3283_v4 = vadd.f32 %v3282_v12, %v3252_v18  ;;  %v2961_v51 = vadd.f32 %v2900_v33, %v5856_v1  ;;  %v3158_v18 = vpop.permute.xlu0 %3157 }
 0x300   : > { %v3758_v16 = vpop.f32.mrf.mxu2  ;;  %4775 = vmatmul.msk.bf16.gmra.mxu3 %vm348_vm2, %v4149_v63 }
 0x301   : > { %v2997_v19 = vadd.f32 %v6196_v11, %v2961_v51  ;;  %v3779_v48 = vadd.f32 %v3758_v16, %v3717_v40 }
 0x303   : > { %v3029_v17 = vmax.f32 %v2997_v19, 0.0  ;;  %v3698_v28 = vpop.f32.mrf.mxu1  ;;  %v3889_v62 = vpop.f32.mrf.mxu3 }
 0x304   : > { %v3718_v50 = vadd.f32 %v3698_v28, %v6283_v21  ;;  %v6404_v15 = vadd.f32 %v3889_v62, %v3779_v48  ;;  %v3163_v28 = vpop.permute.xlu1 %3162 }
 0x305   : > { %v3253_v49 = vmul.f32 %v3148_v39, %v3029_v17 }
 0x306   : > { %v2903_v2 = vpop.f32.mrf.mxu0 }
 0x307   : > { %v3284_v1 = vadd.f32 %v3283_v4, %v3253_v49  ;;  %v2962_v57 = vadd.f32 %v2903_v2, %v5868_v5 }
 0x308   : > { %v3760_v37 = vpop.f32.mrf.mxu2 }
 0x309   : > { %v2998_v63 = vadd.f32 %v6196_v11, %v2962_v57  ;;  %v3780_v12 = vadd.f32 %v3760_v37, %v3718_v50  ;;  %4686 = vmatmul.msk.bf16.gmra.mxu0 %vm348_vm2, %v2807_v32 }
 0x30b   : > { %v3030_v30 = vmax.f32 %v2998_v63, 0.0  ;;  %v3701_v60 = vpop.f32.mrf.mxu1  ;;  %v3891_v44 = vpop.f32.mrf.mxu3 }
 0x30c   : > { %v3719_v21 = vadd.f32 %v3701_v60, %v6300_v46  ;;  %v6411_v8 = vadd.f32 %v3891_v44, %v3780_v12  ;;  %v3168_v12 = vpop.permute.xlu2 %3167 }
 0x30d   : > { %v3254_v27 = vmul.f32 %v3153_v52, %v3030_v30 }
 0x30e   : > { %v2905_v25 = vpop.f32.mrf.mxu0 }
 0x30f   : > { %v3285_v45 = vadd.f32 %v3284_v1, %v3254_v27  ;;  %v2963_v56 = vadd.f32 %v2905_v25, %v5883_v41 }
 0x310   : > { %v3763_v5 = vpop.f32.mrf.mxu2 }
 0x311   : > { %v2999_v24 = vadd.f32 %v6196_v11, %v2963_v56  ;;  %v3781_v38 = vadd.f32 %v3763_v5, %v3719_v21 }
 0x313   : > { %v3031_v40 = vmax.f32 %v2999_v24, 0.0  ;;  %v3703_v14 = vpop.f32.mrf.mxu1  ;;  %v3894_v3 = vpop.f32.mrf.mxu3 }
 0x314   : > { %v3720_v33 = vadd.f32 %v3703_v14, %v6314_v23  ;;  %v6416_v46 = vadd.f32 %v3894_v3, %v3781_v38 }
 0x315   : > { %v3255_v20 = vmul.f32 %v3158_v18, %v3031_v40 }
 0x316   : > { %v2908_v4 = vpop.f32.mrf.mxu0 }
 0x317   : > { %v3286_v51 = vadd.f32 %v3285_v45, %v3255_v20  ;;  %v2964_v16 = vadd.f32 %v2908_v4, %v5902_v9  ;;  %v3173_v45 = vpop.permute.xlu0 %3172 }
 0x318   : > { %v3765_v19 = vpop.f32.mrf.mxu2 }
 0x319   : > { %v3000_v41 = vadd.f32 %v6196_v11, %v2964_v16  ;;  %v3782_v48 = vadd.f32 %v3765_v19, %v3720_v33 }
 0x31b   : > { %v3032_v61 = vmax.f32 %v3000_v41, 0.0  ;;  %v3706_v17 = vpop.f32.mrf.mxu1  ;;  %v3896_v50 = vpop.f32.mrf.mxu3 }
 0x31c   : > { %v3721_v39 = vadd.f32 %v3706_v17, %v6331_v55  ;;  %v6421_v23 = vadd.f32 %v3896_v50, %v3782_v48  ;;  %v3183_v48 = vpop.permute.xlu2 %3182 }
 0x31d   : > { %v3256_v62 = vmul.f32 %v3163_v28, %v3032_v61 }
 0x31e   : > { %v2910_v49 = vpop.f32.mrf.mxu0 }
 0x31f   : > { %v3287_v2 = vadd.f32 %v3286_v51, %v3256_v62  ;;  %v2965_v32 = vadd.f32 %v2910_v49, %v5916_v26  ;;  %v3178_v51 = vpop.permute.xlu1 %3177  ;;  %v3188_v16 = vpop.permute.xlu0 %3187 }
 0x320   : > { %v3768_v1 = vpop.f32.mrf.mxu2 }
 0x321   : > { %v3001_v9 = vadd.f32 %v6196_v11, %v2965_v32  ;;  %v3783_v57 = vadd.f32 %v3768_v1, %v3721_v39 }
 0x323   : > { %v3033_v37 = vmax.f32 %v3001_v9, 0.0  ;;  %v3708_v63 = vpop.f32.mrf.mxu1  ;;  %v3899_v60 = vpop.f32.mrf.mxu3 }
 0x324   : > { %v3722_v30 = vadd.f32 %v3708_v63, %v6347_v7  ;;  %v6426_v55 = vadd.f32 %v3899_v60, %v3783_v57  ;;  %v3198_v63 = vpop.permute.xlu2 %3197 }
 0x325   : > { %v3257_v52 = vmul.f32 %v3168_v12, %v3033_v37 }
 0x326   : > { %v2913_v21 = vpop.f32.mrf.mxu0 }
 0x327   : > { %v3288_v44 = vadd.f32 %v3287_v2, %v3257_v52  ;;  %v2966_v27 = vadd.f32 %v2913_v21, %v5930_v58  ;;  %v3193_v32 = vpop.permute.xlu1 %3192  ;;  %v6440_v57 = vpop.permute.xlu0 %3202 }
 0x328   : > { %v3770_v25 = vpop.f32.mrf.mxu2 }
 0x329   : > { %v3002_v26 = vadd.f32 %v6196_v11, %v2966_v27  ;;  %v3784_v56 = vadd.f32 %v3770_v25, %v3722_v30 }
 0x32b   : > { %v3034_v5 = vmax.f32 %v3002_v26, 0.0  ;;  %v3711_v24 = vpop.f32.mrf.mxu1  ;;  %v3901_v40 = vpop.f32.mrf.mxu3 }
 0x32c   : > { %v3723_v38 = vadd.f32 %v3711_v24, %v6362_v54  ;;  %v6431_v7 = vadd.f32 %v3901_v40, %v3784_v56 }
 0x32d   : > { %v3258_v14 = vmul.f32 %v3173_v45, %v3034_v5 }
 0x32e   : > { %v2915_v18 = vpop.f32.mrf.mxu0 }
 0x32f   : > { %v3289_v33 = vadd.f32 %v3288_v44, %v3258_v14  ;;  %v2967_v3 = vadd.f32 %v2915_v18, %v5943_v22  ;;  %v6444_v26 = vpop.permute.xlu1 %3207  ;;  %v6446_v5 = vpop.permute.xlu0 %3217 }
 0x330   : > { %v3773_v20 = vpop.f32.mrf.mxu2 }
 0x331   : > { %v3003_v58 = vadd.f32 %v6196_v11, %v2967_v3  ;;  %v3785_v4 = vadd.f32 %v3773_v20, %v3723_v38 }
 0x333   : > { %v3035_v19 = vmax.f32 %v3003_v58, 0.0  ;;  %v3713_v41 = vpop.f32.mrf.mxu1  ;;  %v3904_v61 = vpop.f32.mrf.mxu3 }
 0x334   : > { %v6435_v54 = vadd.f32 %v3904_v61, %v3785_v4 }
 0x335   : > { %v3259_v17 = vmul.f32 %v3178_v51, %v3035_v19 }
 0x336   : > { %v2918_v28 = vpop.f32.mrf.mxu0 }
 0x337   : > { %v3290_v39 = vadd.f32 %v3289_v33, %v3259_v17  ;;  %v2968_v50 = vadd.f32 %v2918_v28, %v5962_v47  ;;  %v6457_v17 = vpop.permute.xlu1 %3222 }
 0x338   : > { %v3775_v62 = vpop.f32.mrf.mxu2 }
 0x339   : > { %v3004_v22 = vadd.f32 %v6196_v11, %v2968_v50 }
 0x33b   : > { %v3036_v49 = vmax.f32 %v3004_v22, 0.0  ;;  %v4015_v2 = vpop.f32.mrf.mxu1  ;;  %v3906_v1 = vpop.f32.mrf.mxu3 }
 0x33c   : > { %v4039_v9 = vadd.f32 %v4015_v2, %v6388_v59  ;;  %v4243_v22 = vpop.permute.xlu0 %4242 }
 0x33d   : > { %v3260_v37 = vmul.f32 %v3183_v48, %v3036_v49 }
 0x33e   : > { %v2920_v12 = vpop.f32.mrf.mxu0 }
 0x33f   : > { %v3291_v30 = vadd.f32 %v3290_v39, %v3260_v37  ;;  %v2969_v60 = vadd.f32 %v2920_v12, %v5979_v6  ;;  %v6450_v6 = vpop.permute.xlu2 %3212 }
 0x340   : > { %v4085_v52 = vpop.f32.mrf.mxu2 }
 0x341   : > { %v3005_v47 = vadd.f32 %v6196_v11, %v2969_v60  ;;  %v4109_v21 = vadd.f32 %v4085_v52, %v4039_v9 }
 0x343   : > { %v3037_v44 = vmax.f32 %v3005_v47, 0.0  ;;  %v4017_v27 = vpop.f32.mrf.mxu1  ;;  %v4175_v25 = vpop.f32.mrf.mxu3 }
 0x344   : > { %v4199_v56 = vadd.f32 %v4175_v25, %v4109_v21  ;;  %v4040_v38 = vadd.f32 %v4017_v27, %v6396_v10 }
 0x345   : > { %v3261_v45 = vmul.f32 %v3188_v16, %v3037_v44 }
 0x346   : > { %v2923_v59 = vpop.f32.mrf.mxu0  ;;  %v4208_v3 = vadd.f32 %v6196_v11, %v4199_v56  ;;  %v4248_v56 = vpop.permute.xlu1 %4247 }
 0x347   : > { %v3292_v24 = vadd.f32 %v3291_v30, %v3261_v45  ;;  %v2970_v40 = vadd.f32 %v2923_v59, %v5996_v13  ;;  %v4238_v49 = vpop.permute.xlu2 %4237 }
 0x348   : > { %v4087_v14 = vpop.f32.mrf.mxu2  ;;  %v4217_v19 = vmax.f32 %v4208_v3, 0.0 }
 0x349   : > { %v3006_v18 = vadd.f32 %v6196_v11, %v2970_v40  ;;  %v4110_v33 = vadd.f32 %v4087_v14, %v4040_v38 }
 0x34a   : > { %v4280_v2 = vmul.f32 %v4238_v49, %v4217_v19 }
 0x34b   : > { %v3038_v20 = vmax.f32 %v3006_v18, 0.0  ;;  %v4020_v58 = vpop.f32.mrf.mxu1  ;;  %v4177_v4 = vpop.f32.mrf.mxu3 }
 0x34c   : > { %v4200_v16 = vadd.f32 %v4177_v4, %v4110_v33  ;;  %v4041_v10 = vadd.f32 %v4020_v58, %v6404_v15 }
 0x34d   : > { %v3262_v51 = vmul.f32 %v3193_v32, %v3038_v20 }
 0x34e   : > { %v2925_v41 = vpop.f32.mrf.mxu0  ;;  %v4209_v13 = vadd.f32 %v6196_v11, %v4200_v16 }
 0x34f   : > { %v3293_v48 = vadd.f32 %v3292_v24, %v3262_v51  ;;  %v2971_v61 = vadd.f32 %v2925_v41, %v6010_v29  ;;  %v4253_v19 = vpop.permute.xlu2 %4252 }
 0x350   : > { %v4090_v28 = vpop.f32.mrf.mxu2  ;;  %v4218_v39 = vmax.f32 %v4209_v13, 0.0 }
 0x351   : > { %v3007_v50 = vadd.f32 %v6196_v11, %v2971_v61  ;;  %v4111_v62 = vadd.f32 %v4090_v28, %v4041_v10 }
 0x352   : > { %v4281_v32 = vmul.f32 %v4243_v22, %v4218_v39 }
 0x353   : > { %v3039_v1 = vmax.f32 %v3007_v50, 0.0  ;;  %v4022_v9 = vpop.f32.mrf.mxu1  ;;  %v4180_v37 = vpop.f32.mrf.mxu3 }
 0x354   : > { %v4289_v12 = vadd.f32 %v4281_v32, %v4280_v2  ;;  %v4201_v30 = vadd.f32 %v4180_v37, %v4111_v62  ;;  %v4042_v29 = vadd.f32 %v4022_v9, %v6411_v8 }
 0x355   : > { %v3263_v15 = vmul.f32 %v3198_v63, %v3039_v1  ;;  %v4258_v1 = vpop.permute.xlu0 %4257 }
 0x356   : > { %v2928_v60 = vpop.f32.mrf.mxu0  ;;  %v4210_v47 = vadd.f32 %v6196_v11, %v4201_v30 }
 0x357   : > { %v3294_v52 = vadd.f32 %v3293_v48, %v3263_v15  ;;  %v2972_v21 = vadd.f32 %v2928_v60, %v6035_v35 }
 0x358   : > { %v4092_v44 = vpop.f32.mrf.mxu2  ;;  %v4219_v27 = vmax.f32 %v4210_v47, 0.0 }
 0x359   : > { %v3008_v25 = vadd.f32 %v6196_v11, %v2972_v21  ;;  %v4112_v45 = vadd.f32 %v4092_v44, %v4042_v29 }
 0x35a   : > { %v4282_v59 = vmul.f32 %v4248_v56, %v4219_v27 }
 0x35b   : > { %v3040_v24 = vmax.f32 %v3008_v25, 0.0  ;;  %v4025_v38 = vpop.f32.mrf.mxu1  ;;  %v4182_v40 = vpop.f32.mrf.mxu3 }
 0x35c   : > { %v4290_v63 = vadd.f32 %v4289_v12, %v4282_v59  ;;  %v4202_v18 = vadd.f32 %v4182_v40, %v4112_v45  ;;  %v4043_v3 = vadd.f32 %v4025_v38, %v6416_v46 }
 0x35d   : > { %v3264_v14 = vmul.f32 %v6440_v57, %v3040_v24 }
 0x35e   : > { %v2930_v33 = vpop.f32.mrf.mxu0  ;;  %v4211_v35 = vadd.f32 %v6196_v11, %v4202_v18 }
 0x35f   : > { %v3295_v8 = vadd.f32 %v3294_v52, %v3264_v14  ;;  %v2973_v20 = vadd.f32 %v2930_v33, %v6051_v36 }
 0x360   : > { %v4095_v58 = vpop.f32.mrf.mxu2  ;;  %v4220_v4 = vmax.f32 %v4211_v35, 0.0 }
 0x361   : > { %v3009_v51 = vadd.f32 %v6196_v11, %v2973_v20  ;;  %v4113_v16 = vadd.f32 %v4095_v58, %v4043_v3 }
 0x362   : > { %v4283_v41 = vmul.f32 %v4253_v19, %v4220_v4  ;;  %v4268_v4 = vpop.permute.xlu0 %4267 }
 0x363   : > { %v3041_v48 = vmax.f32 %v3009_v51, 0.0  ;;  %v4027_v10 = vpop.f32.mrf.mxu1  ;;  %v4185_v13 = vpop.f32.mrf.mxu3 }
 0x364   : > { %v4291_v57 = vadd.f32 %v4290_v63, %v4283_v41  ;;  %v4203_v28 = vadd.f32 %v4185_v13, %v4113_v16  ;;  %v4044_v50 = vadd.f32 %v4027_v10, %v6421_v23 }
 0x365   : > { %v3265_v61 = vmul.f32 %v6444_v26, %v3041_v48 }
 0x366   : > { %v2933_v39 = vpop.f32.mrf.mxu0  ;;  %v4212_v36 = vadd.f32 %v6196_v11, %v4203_v28 }
 0x367   : > { %v3296_v46 = vadd.f32 %v3295_v8, %v3265_v61  ;;  %v2974_v62 = vadd.f32 %v2933_v39, %v6076_v43  ;;  %v6479_v43 = vld [vmem:[%s6508_s2] ss:$0 sm:$0xff]  ;;  %v3228_v8 = vpop.permute.xlu2 %3227 }
 0x368   : > { %v4097_v22 = vpop.f32.mrf.mxu2  ;;  %v4221_v49 = vmax.f32 %v4212_v36, 0.0 }
 0x369   : > { %v3010_v2 = vadd.f32 %v6196_v11, %v2974_v62  ;;  %v4114_v32 = vadd.f32 %v4097_v22, %v4044_v50 }
 0x36a   : > { %v4284_v9 = vmul.f32 %v4258_v1, %v4221_v49 }
 0x36b   : > { %v3042_v37 = vmax.f32 %v3010_v2, 0.0  ;;  %v4030_v12 = vpop.f32.mrf.mxu1  ;;  %v4187_v15 = vpop.f32.mrf.mxu3 }
 0x36c   : > { %v4292_v26 = vadd.f32 %v4291_v57, %v4284_v9  ;;  %v4204_v60 = vadd.f32 %v4187_v15, %v4114_v32  ;;  %v4045_v29 = vadd.f32 %v4030_v12, %v6426_v55 }
 0x36d   : > { %v3266_v30 = vmul.f32 %v6450_v6, %v3042_v37  ;;  %v4263_v6 = vpop.permute.xlu1 %4262 }
 0x36e   : > { %v2935_v52 = vpop.f32.mrf.mxu0  ;;  %v4213_v11 = vadd.f32 %v6479_v43, %v4204_v60 }
 0x36f   : > { %v3297_v23 = vadd.f32 %v3296_v46, %v3266_v30  ;;  %v2975_v47 = vadd.f32 %v2935_v52, %v6102_v34  ;;  %v4273_v62 = vpop.permute.xlu2 %4272 }
 0x370   : > { %v4100_v21 = vpop.f32.mrf.mxu2  ;;  %v4222_v44 = vmax.f32 %v4213_v11, 0.0 }
 0x371   : > { %v3011_v27 = vadd.f32 %v6479_v43, %v2975_v47  ;;  %v4115_v25 = vadd.f32 %v4100_v21, %v4045_v29 }
 0x372   : > { %v4285_v45 = vmul.f32 %v4263_v6, %v4222_v44 }
 0x373   : > { %v3043_v56 = vmax.f32 %v3011_v27, 0.0  ;;  %v4032_v59 = vpop.f32.mrf.mxu1  ;;  %v4190_v24 = vpop.f32.mrf.mxu3 }
 0x374   : > { %v4293_v55 = vadd.f32 %v4292_v26, %v4285_v45  ;;  %v4205_v40 = vadd.f32 %v4190_v24, %v4115_v25  ;;  %v4046_v18 = vadd.f32 %v4032_v59, %v6431_v7 }
 0x375   : > { %v3267_v38 = vmul.f32 %v6446_v5, %v3043_v56  ;;  %v3233_v28 = vpop.permute.xlu1 %3232  ;;  %v3238_v56 = vpop.permute.xlu0 %3237 }
 0x376   : > { %v2938_v63 = vpop.f32.mrf.mxu0  ;;  %v4214_v34 = vadd.f32 %v6479_v43, %v4205_v40 }
 0x377   : > { %v3298_v14 = vadd.f32 %v3297_v23, %v3267_v38  ;;  %v2976_v33 = vadd.f32 %v2938_v63, %v6132_v0 }
 0x378   : > { %v4102_v3 = vpop.f32.mrf.mxu2  ;;  %v4223_v35 = vmax.f32 %v4214_v34, 0.0 }
 0x379   : > { %v3012_v20 = vadd.f32 %v6479_v43, %v2976_v33  ;;  %v4116_v58 = vadd.f32 %v4102_v3, %v4046_v18 }
 0x37a   : > { %v4286_v51 = vmul.f32 %v4268_v4, %v4223_v35 }
 0x37b   : > { %v3044_v16 = vmax.f32 %v3012_v20, 0.0  ;;  %v4035_v19 = vpop.f32.mrf.mxu1  ;;  %v4192_v5 = vpop.f32.mrf.mxu3 }
 0x37c   : > { %v4294_v41 = vadd.f32 %v4293_v55, %v4286_v51  ;;  %v4206_v10 = vadd.f32 %v4192_v5, %v4116_v58  ;;  %v4047_v57 = vadd.f32 %v4035_v19, %v6435_v54 }
 0x37d   : > { %v3268_v48 = vmul.f32 %v6457_v17, %v3044_v16  ;;  %v4278_v60 = vpop.permute.xlu1 %4277 }
 0x37e   : > { %v2940_v7 = vpop.f32.mrf.mxu0  ;;  %v4215_v0 = vadd.f32 %v6479_v43, %v4206_v10 }
 0x37f   : > { %v3299_v13 = vadd.f32 %v3298_v14, %v3268_v48  ;;  %v2977_v61 = vadd.f32 %v2940_v7, %v6160_v53 }
 0x380   : > { %v4105_v39 = vpop.f32.mrf.mxu2  ;;  %v4224_v46 = vmax.f32 %v4215_v0, 0.0 }
 0x381   : > { %v3013_v50 = vadd.f32 %v6479_v43, %v2977_v61  ;;  %v4117_v36 = vadd.f32 %v4105_v39, %v4047_v57 }
 0x382   : > { %v4287_v22 = vmul.f32 %v4273_v62, %v4224_v46 }
 0x383   : > { %v3045_v49 = vmax.f32 %v3013_v50, 0.0  ;;  %v4037_v2 = vpop.f32.mrf.mxu1  ;;  %v4195_v17 = vpop.f32.mrf.mxu3 }
 0x384   : > { %v4295_v32 = vadd.f32 %v4294_v41, %v4287_v22  ;;  %v4207_v9 = vadd.f32 %v4195_v17, %v4117_v36 }
 0x385   : > { %v3269_v1 = vmul.f32 %v3228_v8, %v3045_v49 }
 0x386   : > { %v2943_v37 = vpop.f32.mrf.mxu0  ;;  %v4216_v12 = vadd.f32 %v6479_v43, %v4207_v9 }
 0x387   : > { %v3300_v54 = vadd.f32 %v3299_v13, %v3269_v1  ;;  %v2978_v53 = vadd.f32 %v2943_v37, %v6184_v42 }
 0x388   : > { %v4107_v15 = vpop.f32.mrf.mxu2  ;;  %v4225_v26 = vmax.f32 %v4216_v12, 0.0 }
 0x389   : > { %v3014_v30 = vadd.f32 %v6479_v43, %v2978_v53 }
 0x38a   : > { %v4288_v52 = vmul.f32 %v4278_v60, %v4225_v26 }
 0x38b   : > { %v3046_v23 = vmax.f32 %v3014_v30, 0.0  ;;  %v4197_v29 = vpop.f32.mrf.mxu3 }
 0x38c   : > { %v4296_v11 = vadd.f32 %v4295_v32, %v4288_v52 }
 0x38d   : > { %v3270_v47 = vmul.f32 %v3233_v28, %v3046_v23 }
 0x38e   : > { %v2945_v21 = vpop.f32.mrf.mxu0  ;;  %v4297_v44 = vrot.slane %v4296_v11, 4 }
 0x38f   : > { %v3301_v27 = vadd.f32 %v3300_v54, %v3270_v47  ;;  %v2979_v25 = vadd.f32 %v2945_v21, %v6212_v31 }
 0x390   : > { %v4298_v45 = vadd.f32 %v4297_v44, %v4296_v11 }
 0x391   : > { %v3015_v6 = vadd.f32 %v6479_v43, %v2979_v25 }
 0x392   : > { %v4299_v24 = vrot.slane %v4298_v45, 2 }
 0x393   : > { %v3047_v42 = vmax.f32 %v3015_v6, 0.0 }
 0x394   : > { %v4300_v40 = vadd.f32 %v4299_v24, %v4298_v45 }
 0x395   : > { %v3271_v59 = vmul.f32 %v3238_v56, %v3047_v42 }
 0x396   : > { %v4301_v18 = vrot.slane %v4300_v40, 1 }
 0x397   : > { %v3302_v55 = vadd.f32 %v3301_v27, %v3271_v59 }
 0x398   : > { %v4302_v8 = vadd.f32 %v4301_v18, %v4300_v40 }
 0x399   : > { %v3303_v38 = vrot.slane %v3302_v55, 4 }
 0x39b   : > { %v3304_v63 = vadd.f32 %v3303_v38, %v3302_v55 }
 0x39d   : > { %v3305_v14 = vrot.slane %v3304_v63, 2 }
 0x39f   : > { %v3306_v34 = vadd.f32 %v3305_v14, %v3304_v63 }
 0x3a1   : > { %v3307_v33 = vrot.slane %v3306_v34, 1 }
 0x3a3   : > { %v3308_v3 = vadd.f32 %v3307_v33, %v3306_v34 }
 0x3a5   : > { %v4303_v35 = vadd.f32 %v4302_v8, %v3308_v3 }
 0x3a7   : > { %v4304_v31 = vmul.f32 0.00390625, %v4303_v35 }
 0x3a9   : > { %4305 = vst [vmem:[%s193_s7] sm:$0x1] %v4304_v31 }
 0x3aa PF: > { %s14_s15 = sadd.s32 1, %s5114_s15  }
 0x3ab   : > { %p11_p4 = scmp.ge.s32.totalorder %s14_s15, 4  }
 0x3ad   :  { %13 = sbr.rel (!%p11_p4) target bundleno = 1 (0x1), region = 66 }

</bundles_post_ra>
